<compile_context>
chip_gen: v7x
topology: tpu7x:2x2x1
jax: 0.10.0
libtpu: 0.0.40
codegen_flags: <defaults>
</compile_context>

<pallas_src>
import jax
import jax.numpy as jnp
from jax.experimental import pallas as pl
from jax.experimental.pallas import tpu as pltpu


_BT_MAX = 128   # max batch rows per grid step
_NPAD = 128     # lane-dense logits width (>= n_classes)


def _round_up(v, m):
    return ((v + m - 1) // m) * m


# ---------------------------------------------------------------------------
# Fused kernel
# ---------------------------------------------------------------------------

def _simplenet_kernel(x_ref, w1_ref, b1_ref, w2_ref, b2_ref,
                      fw1_ref, fb1_ref, fw2_ref, fb2_ref, o_ref):
    bt = o_ref.shape[0]

    # conv1 (1->10, k=5) as ONE merged-K GEMM.
    #   LHS (24*bt, 140) bf16 : rows = (ho, b), lanes = kh*28 + w
    #   RHS (140, 240)   bf16 : lanes = wo*10 + co
    y1 = jnp.dot(x_ref[...], w1_ref[...],
                 preferred_element_type=jnp.float32) + b1_ref[...]      # f32

    # 2x2 max-pool + ReLU -> one contiguous bf16 slab (12*bt, 230).
    # Row pairs: aligned sublane slices; column pairs: a 10-lane shifted max.
    # Valid lanes are 20*j + ci (ci < 10); the other lanes carry garbage that
    # is neutralised ONLY by the zero rows baked into w2_ref
    # (_banded_conv2_weights) -- keep the two layouts in sync.
    h1_parts = []
    for i in range(12):
        top = y1[(2 * i) * bt:(2 * i + 1) * bt, :]
        bot = y1[(2 * i + 1) * bt:(2 * i + 2) * bt, :]
        hp = jnp.maximum(top, bot)
        h1_parts.append(
            jnp.maximum(jnp.maximum(hp[:, :230], hp[:, 10:]), 0.0)
            .astype(jnp.bfloat16))
    h1 = jnp.concatenate(h1_parts, axis=0)                              # (12*bt, 230)

    # conv2 (10->20, k=5): 5 kh-banded GEMMs; each LHS is a free
    # sublane-aligned row-slice view of the h1 slab.
    # TODO(synk): nn.Dropout2d is identity in eval mode; train-mode channel
    # dropout is not implemented.
    y2 = jnp.dot(h1[:8 * bt, :], w2_ref[0], preferred_element_type=jnp.float32)
    for kh in range(1, 5):
        y2 = y2 + jnp.dot(h1[kh * bt:(kh + 8) * bt, :], w2_ref[kh],
                          preferred_element_type=jnp.float32)
    y2 = y2 + b2_ref[...]                                               # (8*bt, 160)

    # 2x2 max-pool + ReLU.  h2[p]: (bt, 140) bf16, valid lanes 40*q + co
    # (co < 20); garbage lanes are zeroed by the rows of fw1_ref (_fc1_weights).
    h2 = []
    for p in range(4):
        top = y2[(2 * p) * bt:(2 * p + 1) * bt, :]
        bot = y2[(2 * p + 1) * bt:(2 * p + 2) * bt, :]
        hp = jnp.maximum(top, bot)
        h2.append(jnp.maximum(jnp.maximum(hp[:, :140], hp[:, 20:]), 0.0)
                  .astype(jnp.bfloat16))

    # fc1 + ReLU (PyTorch channel-major flatten folded into fw1_ref).
    acc = jnp.dot(h2[0], fw1_ref[0], preferred_element_type=jnp.float32)
    for p in range(1, 4):
        acc = acc + jnp.dot(h2[p], fw1_ref[p],
                            preferred_element_type=jnp.float32)
    hfc = jnp.maximum(acc + fb1_ref[...], 0.0)                          # (bt, 32)
    # TODO(synk): nn.Dropout is identity in eval mode; not implemented.

    # fc2, zero-padded to 128 output lanes for an unmasked lane-dense store.
    logits = jnp.dot(hfc.astype(jnp.bfloat16), fw2_ref[...],
                     preferred_element_type=jnp.float32) + fb2_ref[...]
    o_ref[...] = logits.astype(o_ref.dtype)


# ---------------------------------------------------------------------------
# Trace-time weight transforms (pure JAX, done once under jit)
# ---------------------------------------------------------------------------

def _conv1_weight_matrix(w1):
    # w1 (10,1,5,5) -> W[kh*28 + w, wo*10 + co] = w1[co,0,kh,w-wo], 0<=w-wo<5.
    rel = jnp.arange(28)[:, None] - jnp.arange(24)[None, :]            # (28, 24)
    valid = (rel >= 0) & (rel < 5)
    wt = jnp.transpose(w1[:, 0, :, :], (1, 2, 0)).astype(jnp.float32)  # (kh,kw,co)
    t1 = jnp.where(valid[None, :, :, None], wt[:, jnp.clip(rel, 0, 4), :], 0.0)
    return t1.reshape(140, 240).astype(jnp.bfloat16)


def _banded_conv2_weights(w2):
    # w2 (20,10,5,5); input lanes l = 20*j + ci (j = pooled col, ci < 10;
    # ci >= 10 are the pool's garbage lanes and get ZERO rows),
    # output lanes = wo2*20 + co.
    l = jnp.arange(230)
    jcol, rem = l // 20, l % 20
    wo2 = jnp.arange(8)
    kwr = jcol[:, None] - wo2[None, :]                                 # (230, 8)
    valid = (rem[:, None] < 10) & (kwr >= 0) & (kwr < 5)
    w2t = jnp.transpose(w2, (2, 3, 1, 0)).astype(jnp.float32)          # (kh,kw,ci,co)
    g = w2t[:, jnp.clip(kwr, 0, 4), jnp.clip(rem, 0, 9)[:, None], :]   # (5,230,8,20)
    out = jnp.where(valid[None, :, :, None], g, 0.0).reshape(5, 230, 160)
    return out.astype(jnp.bfloat16)


def _fc1_weights(fw1):
    # fw1 (32,320); PyTorch flatten index = c*16 + h*4 + w; pooled-conv2 lanes
    # are l = 40*w + c (c < 20; c >= 20 garbage lanes get ZERO rows).
    l2 = jnp.arange(140)
    wq, rem = l2 // 40, l2 % 40
    valid = rem < 20
    fr = fw1.reshape(32, 20, 4, 4).astype(jnp.float32)                 # (o,c,h,w)
    g = fr[:, jnp.clip(rem, 0, 19), :, wq]                             # (140,32,4)
    g = jnp.where(valid[:, None, None], g, 0.0)
    return jnp.transpose(g, (2, 0, 1)).astype(jnp.bfloat16)            # (4,140,32)


# ---------------------------------------------------------------------------
# Forward
# ---------------------------------------------------------------------------

def simplenet_forward(x_nchw, params):
    w1, b1, w2, b2, fw1, fb1, fw2, fb2 = params
    assert x_nchw.shape[1:] == (1, 28, 28), "SimpleNet needs (B, 1, 28, 28) input"
    batch = x_nchw.shape[0]
    n_classes = fw2.shape[0]
    assert n_classes <= _NPAD

    # Batch tile: as big as possible (amortizes per-step overhead, full M=128
    # fc tiles), a multiple of 16 (bf16 sublane packing + aligned row slices),
    # and for larger batches sized so >= 2 grid steps exist (v7x has 2 TCs
    # sharing the "parallel" grid axis).
    bt = min(_BT_MAX, _round_up(max(batch // 2, 1), 16))
    assert bt % 16 == 0
    n_tiles = pl.cdiv(batch, bt)
    bp = n_tiles * bt

    # kh-im2col input slab: rows ordered (tile, ho, b_in_tile), lanes kh*28+w.
    x = x_nchw.reshape(batch, 28, 28).astype(jnp.float32)
    x = jnp.pad(x, ((0, bp - batch), (0, 0), (0, 0)))
    slab = jnp.stack([x[:, kh:kh + 24, :] for kh in range(5)], axis=2)  # (bp,24,5,28)
    slab = slab.reshape(bp, 24, 140)
    x2d = (slab.reshape(n_tiles, bt, 24, 140)
               .transpose(0, 2, 1, 3)
               .reshape(n_tiles * 24 * bt, 140)
               .astype(jnp.bfloat16))

    # bf16 matmul weights (banded layouts), f32 biases.
    w1m = _conv1_weight_matrix(w1)          # (140, 240)
    band2 = _banded_conv2_weights(w2)       # (5, 230, 160)
    fw1m = _fc1_weights(fw1)                # (4, 140, 32)
    b1t = jnp.tile(b1.astype(jnp.float32), 24).reshape(1, 240)
    b2t = jnp.tile(b2.astype(jnp.float32), 8).reshape(1, 160)
    fb1r = fb1.astype(jnp.float32).reshape(1, 32)
    fw2p = (jnp.zeros((32, _NPAD), jnp.float32).at[:, :n_classes].set(fw2.T)
            .astype(jnp.bfloat16))
    fb2p = jnp.zeros((1, _NPAD), jnp.float32).at[0, :n_classes].set(fb2)

    out = pl.pallas_call(
        _simplenet_kernel,
        grid=(n_tiles,),
        in_specs=[
            pl.BlockSpec((24 * bt, 140), lambda i: (i, 0)),
            pl.BlockSpec((140, 240), lambda i: (0, 0)),
            pl.BlockSpec((1, 240), lambda i: (0, 0)),
            pl.BlockSpec((5, 230, 160), lambda i: (0, 0, 0)),
            pl.BlockSpec((1, 160), lambda i: (0, 0)),
            pl.BlockSpec((4, 140, 32), lambda i: (0, 0, 0)),
            pl.BlockSpec((1, 32), lambda i: (0, 0)),
            pl.BlockSpec((32, _NPAD), lambda i: (0, 0)),
            pl.BlockSpec((1, _NPAD), lambda i: (0, 0)),
        ],
        out_specs=pl.BlockSpec((bt, _NPAD), lambda i: (i, 0)),
        out_shape=jax.ShapeDtypeStruct((bp, _NPAD), jnp.float32),
        compiler_params=pltpu.CompilerParams(
            dimension_semantics=("parallel",),
            # Per-step live set at bt=128 is ~10 MiB (y1 ~3 MiB, double-buffered
            # input block ~3 MiB, h1/y2 ~2 MiB, weights ~0.3 MiB, output blocks
            # ~0.13 MiB); 48 MiB gives headroom on v5e/v6e (16/32 MiB scoped
            # defaults) and stays under v7x's 64 MiB physical VMEM.
            vmem_limit_bytes=48 * 1024 * 1024,
        ),
    )(x2d, w1m, b1t, band2, b2t, fw1m, fb1r, fw2p, fb2p)

    return out[:batch, :n_classes]


# ---------------------------------------------------------------------------
# Pure-JAX reference (eval-mode PyTorch semantics, all-f32) and params
# ---------------------------------------------------------------------------

def simplenet_reference(x_nchw, params):
    w1, b1, w2, b2, fw1, fb1, fw2, fb2 = params
    dn = ('NCHW', 'OIHW', 'NCHW')
    y1 = jax.lax.conv_general_dilated(x_nchw, w1, (1, 1), 'VALID',
                                      dimension_numbers=dn) + b1[None, :, None, None]
    h1 = jax.nn.relu(jax.lax.reduce_window(y1, -jnp.inf, jax.lax.max,
                                           (1, 1, 2, 2), (1, 1, 2, 2), 'VALID'))
    y2 = jax.lax.conv_general_dilated(h1, w2, (1, 1), 'VALID',
                                      dimension_numbers=dn) + b2[None, :, None, None]
    h2 = jax.nn.relu(jax.lax.reduce_window(y2, -jnp.inf, jax.lax.max,
                                           (1, 1, 2, 2), (1, 1, 2, 2), 'VALID'))
    flat = h2.reshape(x_nchw.shape[0], 320)
    h = jax.nn.relu(flat @ fw1.T + fb1)
    return h @ fw2.T + fb2


def init_params(key, n_classes=10):
    ks = jax.random.split(key, 8)
    w1 = 0.1 * jax.random.normal(ks[0], (10, 1, 5, 5), jnp.float32)
    b1 = 0.1 * jax.random.normal(ks[1], (10,), jnp.float32)
    w2 = 0.1 * jax.random.normal(ks[2], (20, 10, 5, 5), jnp.float32)
    b2 = 0.1 * jax.random.normal(ks[3], (20,), jnp.float32)
    fw1 = 0.1 * jax.random.normal(ks[4], (32, 320), jnp.float32)
    fb1 = 0.1 * jax.random.normal(ks[5], (32,), jnp.float32)
    fw2 = 0.1 * jax.random.normal(ks[6], (n_classes, 32), jnp.float32)
    fb2 = 0.1 * jax.random.normal(ks[7], (n_classes,), jnp.float32)
    return (w1, b1, w2, b2, fw1, fb1, fw2, fb2)


if __name__ == "__main__":
    key = jax.random.PRNGKey(0)
    pkey, xkey = jax.random.split(key)
    params = init_params(pkey)
    # MNIST-shaped input (1x28x28) so the post-conv feature map is 20*4*4 = 320.
    x = jax.random.normal(xkey, (2, 1, 28, 28), jnp.float32)

    out = jax.jit(simplenet_forward)(x, params)
    jax.block_until_ready(out)
    assert out.shape == (2, 10), out.shape
    assert bool(jnp.all(jnp.isfinite(out)))

    ref = simplenet_reference(x, params)
    # Matmul operands are bf16 (f32 accumulation), so the tolerance is set at
    # the bf16 rounding level; a layout/banding bug would produce O(1) errors
    # and still be caught.
    max_err = float(jnp.max(jnp.abs(out - ref)))
    assert bool(jnp.allclose(out, ref, rtol=2e-2, atol=2e-2)), max_err

    print("KERNEL_OK")
</pallas_src>

<mosaic_0001>
module attributes {stable_mosaic.version = 11 : i64} {
  func.func @_simplenet_kernel(%arg0: i32, %arg1: memref<384x140xbf16, #tpu.memory_space<vmem>>, %arg2: memref<140x240xbf16, #tpu.memory_space<vmem>>, %arg3: memref<1x240xf32, #tpu.memory_space<vmem>>, %arg4: memref<5x230x160xbf16, #tpu.memory_space<vmem>>, %arg5: memref<1x160xf32, #tpu.memory_space<vmem>>, %arg6: memref<4x140x32xbf16, #tpu.memory_space<vmem>>, %arg7: memref<1x32xf32, #tpu.memory_space<vmem>>, %arg8: memref<32x128xbf16, #tpu.memory_space<vmem>>, %arg9: memref<1x128xf32, #tpu.memory_space<vmem>>, %arg10: memref<16x128xf32, #tpu.memory_space<vmem>>) attributes {dimension_semantics = [#tpu.dimension_semantics<parallel>], iteration_bounds = array<i64: 1>, scalar_prefetch = 0 : i64, scratch_operands = 0 : i64, tpu.core_type = #tpu.core_type<tc>, window_params = [{transform_indices = @transform_0, window_bounds = array<i64: 384, 140>}, {pipeline_mode = #tpu.pipeline_mode<synchronous>, transform_indices = @transform_1, window_bounds = array<i64: 140, 240>}, {pipeline_mode = #tpu.pipeline_mode<synchronous>, transform_indices = @transform_2, window_bounds = array<i64: 1, 240>}, {pipeline_mode = #tpu.pipeline_mode<synchronous>, transform_indices = @transform_3, window_bounds = array<i64: 5, 230, 160>}, {pipeline_mode = #tpu.pipeline_mode<synchronous>, transform_indices = @transform_4, window_bounds = array<i64: 1, 160>}, {pipeline_mode = #tpu.pipeline_mode<synchronous>, transform_indices = @transform_5, window_bounds = array<i64: 4, 140, 32>}, {pipeline_mode = #tpu.pipeline_mode<synchronous>, transform_indices = @transform_6, window_bounds = array<i64: 1, 32>}, {pipeline_mode = #tpu.pipeline_mode<synchronous>, transform_indices = @transform_7, window_bounds = array<i64: 32, 128>}, {pipeline_mode = #tpu.pipeline_mode<synchronous>, transform_indices = @transform_8, window_bounds = array<i64: 1, 128>}, {transform_indices = @transform_9, window_bounds = array<i64: 16, 128>}]} {
    %c0 = arith.constant 0 : index
    %c0_0 = arith.constant 0 : index
    %0 = vector.load %arg1[%c0, %c0_0] : memref<384x140xbf16, #tpu.memory_space<vmem>>, vector<384x140xbf16>
    %c0_1 = arith.constant 0 : index
    %c0_2 = arith.constant 0 : index
    %1 = vector.load %arg2[%c0_1, %c0_2] : memref<140x240xbf16, #tpu.memory_space<vmem>>, vector<140x240xbf16>
    %cst = arith.constant dense<0.000000e+00> : vector<384x240xf32>
    %2 = tpu.matmul %0, %1, %cst {dimension_numbers = #tpu.dot_dimension_numbers<[1], [0], [0], [1], [0, 0, 1, 1], [], []>} : vector<384x140xbf16>, vector<140x240xbf16>, vector<384x240xf32> -> vector<384x240xf32>
    %c0_3 = arith.constant 0 : index
    %c0_4 = arith.constant 0 : index
    %3 = vector.load %arg3[%c0_3, %c0_4] : memref<1x240xf32, #tpu.memory_space<vmem>>, vector<1x240xf32>
    %4 = vector.broadcast %3 : vector<1x240xf32> to vector<384x240xf32>
    %5 = arith.addf %2, %4 : vector<384x240xf32>
    %6 = vector.extract_strided_slice %5 {offsets = [0, 0], sizes = [16, 240], strides = [1, 1]} : vector<384x240xf32> to vector<16x240xf32>
    %7 = vector.extract_strided_slice %5 {offsets = [16, 0], sizes = [16, 240], strides = [1, 1]} : vector<384x240xf32> to vector<16x240xf32>
    %8 = arith.maximumf %6, %7 : vector<16x240xf32>
    %9 = vector.extract_strided_slice %8 {offsets = [0, 0], sizes = [16, 230], strides = [1, 1]} : vector<16x240xf32> to vector<16x230xf32>
    %10 = vector.extract_strided_slice %8 {offsets = [0, 10], sizes = [16, 230], strides = [1, 1]} : vector<16x240xf32> to vector<16x230xf32>
    %11 = arith.maximumf %9, %10 : vector<16x230xf32>
    %cst_5 = arith.constant 0.000000e+00 : f32
    %12 = vector.broadcast %cst_5 : f32 to vector<16x230xf32>
    %13 = arith.maximumf %11, %12 : vector<16x230xf32>
    %14 = arith.truncf %13 : vector<16x230xf32> to vector<16x230xbf16>
    %15 = vector.extract_strided_slice %5 {offsets = [32, 0], sizes = [16, 240], strides = [1, 1]} : vector<384x240xf32> to vector<16x240xf32>
    %16 = vector.extract_strided_slice %5 {offsets = [48, 0], sizes = [16, 240], strides = [1, 1]} : vector<384x240xf32> to vector<16x240xf32>
    %17 = arith.maximumf %15, %16 : vector<16x240xf32>
    %18 = vector.extract_strided_slice %17 {offsets = [0, 0], sizes = [16, 230], strides = [1, 1]} : vector<16x240xf32> to vector<16x230xf32>
    %19 = vector.extract_strided_slice %17 {offsets = [0, 10], sizes = [16, 230], strides = [1, 1]} : vector<16x240xf32> to vector<16x230xf32>
    %20 = arith.maximumf %18, %19 : vector<16x230xf32>
    %cst_6 = arith.constant 0.000000e+00 : f32
    %21 = vector.broadcast %cst_6 : f32 to vector<16x230xf32>
    %22 = arith.maximumf %20, %21 : vector<16x230xf32>
    %23 = arith.truncf %22 : vector<16x230xf32> to vector<16x230xbf16>
    %24 = vector.extract_strided_slice %5 {offsets = [64, 0], sizes = [16, 240], strides = [1, 1]} : vector<384x240xf32> to vector<16x240xf32>
    %25 = vector.extract_strided_slice %5 {offsets = [80, 0], sizes = [16, 240], strides = [1, 1]} : vector<384x240xf32> to vector<16x240xf32>
    %26 = arith.maximumf %24, %25 : vector<16x240xf32>
    %27 = vector.extract_strided_slice %26 {offsets = [0, 0], sizes = [16, 230], strides = [1, 1]} : vector<16x240xf32> to vector<16x230xf32>
    %28 = vector.extract_strided_slice %26 {offsets = [0, 10], sizes = [16, 230], strides = [1, 1]} : vector<16x240xf32> to vector<16x230xf32>
    %29 = arith.maximumf %27, %28 : vector<16x230xf32>
    %cst_7 = arith.constant 0.000000e+00 : f32
    %30 = vector.broadcast %cst_7 : f32 to vector<16x230xf32>
    %31 = arith.maximumf %29, %30 : vector<16x230xf32>
    %32 = arith.truncf %31 : vector<16x230xf32> to vector<16x230xbf16>
    %33 = vector.extract_strided_slice %5 {offsets = [96, 0], sizes = [16, 240], strides = [1, 1]} : vector<384x240xf32> to vector<16x240xf32>
    %34 = vector.extract_strided_slice %5 {offsets = [112, 0], sizes = [16, 240], strides = [1, 1]} : vector<384x240xf32> to vector<16x240xf32>
    %35 = arith.maximumf %33, %34 : vector<16x240xf32>
    %36 = vector.extract_strided_slice %35 {offsets = [0, 0], sizes = [16, 230], strides = [1, 1]} : vector<16x240xf32> to vector<16x230xf32>
    %37 = vector.extract_strided_slice %35 {offsets = [0, 10], sizes = [16, 230], strides = [1, 1]} : vector<16x240xf32> to vector<16x230xf32>
    %38 = arith.maximumf %36, %37 : vector<16x230xf32>
    %cst_8 = arith.constant 0.000000e+00 : f32
    %39 = vector.broadcast %cst_8 : f32 to vector<16x230xf32>
    %40 = arith.maximumf %38, %39 : vector<16x230xf32>
    %41 = arith.truncf %40 : vector<16x230xf32> to vector<16x230xbf16>
    %42 = vector.extract_strided_slice %5 {offsets = [128, 0], sizes = [16, 240], strides = [1, 1]} : vector<384x240xf32> to vector<16x240xf32>
    %43 = vector.extract_strided_slice %5 {offsets = [144, 0], sizes = [16, 240], strides = [1, 1]} : vector<384x240xf32> to vector<16x240xf32>
    %44 = arith.maximumf %42, %43 : vector<16x240xf32>
    %45 = vector.extract_strided_slice %44 {offsets = [0, 0], sizes = [16, 230], strides = [1, 1]} : vector<16x240xf32> to vector<16x230xf32>
    %46 = vector.extract_strided_slice %44 {offsets = [0, 10], sizes = [16, 230], strides = [1, 1]} : vector<16x240xf32> to vector<16x230xf32>
    %47 = arith.maximumf %45, %46 : vector<16x230xf32>
    %cst_9 = arith.constant 0.000000e+00 : f32
    %48 = vector.broadcast %cst_9 : f32 to vector<16x230xf32>
    %49 = arith.maximumf %47, %48 : vector<16x230xf32>
    %50 = arith.truncf %49 : vector<16x230xf32> to vector<16x230xbf16>
    %51 = vector.extract_strided_slice %5 {offsets = [160, 0], sizes = [16, 240], strides = [1, 1]} : vector<384x240xf32> to vector<16x240xf32>
    %52 = vector.extract_strided_slice %5 {offsets = [176, 0], sizes = [16, 240], strides = [1, 1]} : vector<384x240xf32> to vector<16x240xf32>
    %53 = arith.maximumf %51, %52 : vector<16x240xf32>
    %54 = vector.extract_strided_slice %53 {offsets = [0, 0], sizes = [16, 230], strides = [1, 1]} : vector<16x240xf32> to vector<16x230xf32>
    %55 = vector.extract_strided_slice %53 {offsets = [0, 10], sizes = [16, 230], strides = [1, 1]} : vector<16x240xf32> to vector<16x230xf32>
    %56 = arith.maximumf %54, %55 : vector<16x230xf32>
    %cst_10 = arith.constant 0.000000e+00 : f32
    %57 = vector.broadcast %cst_10 : f32 to vector<16x230xf32>
    %58 = arith.maximumf %56, %57 : vector<16x230xf32>
    %59 = arith.truncf %58 : vector<16x230xf32> to vector<16x230xbf16>
    %60 = vector.extract_strided_slice %5 {offsets = [192, 0], sizes = [16, 240], strides = [1, 1]} : vector<384x240xf32> to vector<16x240xf32>
    %61 = vector.extract_strided_slice %5 {offsets = [208, 0], sizes = [16, 240], strides = [1, 1]} : vector<384x240xf32> to vector<16x240xf32>
    %62 = arith.maximumf %60, %61 : vector<16x240xf32>
    %63 = vector.extract_strided_slice %62 {offsets = [0, 0], sizes = [16, 230], strides = [1, 1]} : vector<16x240xf32> to vector<16x230xf32>
    %64 = vector.extract_strided_slice %62 {offsets = [0, 10], sizes = [16, 230], strides = [1, 1]} : vector<16x240xf32> to vector<16x230xf32>
    %65 = arith.maximumf %63, %64 : vector<16x230xf32>
    %cst_11 = arith.constant 0.000000e+00 : f32
    %66 = vector.broadcast %cst_11 : f32 to vector<16x230xf32>
    %67 = arith.maximumf %65, %66 : vector<16x230xf32>
    %68 = arith.truncf %67 : vector<16x230xf32> to vector<16x230xbf16>
    %69 = vector.extract_strided_slice %5 {offsets = [224, 0], sizes = [16, 240], strides = [1, 1]} : vector<384x240xf32> to vector<16x240xf32>
    %70 = vector.extract_strided_slice %5 {offsets = [240, 0], sizes = [16, 240], strides = [1, 1]} : vector<384x240xf32> to vector<16x240xf32>
    %71 = arith.maximumf %69, %70 : vector<16x240xf32>
    %72 = vector.extract_strided_slice %71 {offsets = [0, 0], sizes = [16, 230], strides = [1, 1]} : vector<16x240xf32> to vector<16x230xf32>
    %73 = vector.extract_strided_slice %71 {offsets = [0, 10], sizes = [16, 230], strides = [1, 1]} : vector<16x240xf32> to vector<16x230xf32>
    %74 = arith.maximumf %72, %73 : vector<16x230xf32>
    %cst_12 = arith.constant 0.000000e+00 : f32
    %75 = vector.broadcast %cst_12 : f32 to vector<16x230xf32>
    %76 = arith.maximumf %74, %75 : vector<16x230xf32>
    %77 = arith.truncf %76 : vector<16x230xf32> to vector<16x230xbf16>
    %78 = vector.extract_strided_slice %5 {offsets = [256, 0], sizes = [16, 240], strides = [1, 1]} : vector<384x240xf32> to vector<16x240xf32>
    %79 = vector.extract_strided_slice %5 {offsets = [272, 0], sizes = [16, 240], strides = [1, 1]} : vector<384x240xf32> to vector<16x240xf32>
    %80 = arith.maximumf %78, %79 : vector<16x240xf32>
    %81 = vector.extract_strided_slice %80 {offsets = [0, 0], sizes = [16, 230], strides = [1, 1]} : vector<16x240xf32> to vector<16x230xf32>
    %82 = vector.extract_strided_slice %80 {offsets = [0, 10], sizes = [16, 230], strides = [1, 1]} : vector<16x240xf32> to vector<16x230xf32>
    %83 = arith.maximumf %81, %82 : vector<16x230xf32>
    %cst_13 = arith.constant 0.000000e+00 : f32
    %84 = vector.broadcast %cst_13 : f32 to vector<16x230xf32>
    %85 = arith.maximumf %83, %84 : vector<16x230xf32>
    %86 = arith.truncf %85 : vector<16x230xf32> to vector<16x230xbf16>
    %87 = vector.extract_strided_slice %5 {offsets = [288, 0], sizes = [16, 240], strides = [1, 1]} : vector<384x240xf32> to vector<16x240xf32>
    %88 = vector.extract_strided_slice %5 {offsets = [304, 0], sizes = [16, 240], strides = [1, 1]} : vector<384x240xf32> to vector<16x240xf32>
    %89 = arith.maximumf %87, %88 : vector<16x240xf32>
    %90 = vector.extract_strided_slice %89 {offsets = [0, 0], sizes = [16, 230], strides = [1, 1]} : vector<16x240xf32> to vector<16x230xf32>
    %91 = vector.extract_strided_slice %89 {offsets = [0, 10], sizes = [16, 230], strides = [1, 1]} : vector<16x240xf32> to vector<16x230xf32>
    %92 = arith.maximumf %90, %91 : vector<16x230xf32>
    %cst_14 = arith.constant 0.000000e+00 : f32
    %93 = vector.broadcast %cst_14 : f32 to vector<16x230xf32>
    %94 = arith.maximumf %92, %93 : vector<16x230xf32>
    %95 = arith.truncf %94 : vector<16x230xf32> to vector<16x230xbf16>
    %96 = vector.extract_strided_slice %5 {offsets = [320, 0], sizes = [16, 240], strides = [1, 1]} : vector<384x240xf32> to vector<16x240xf32>
    %97 = vector.extract_strided_slice %5 {offsets = [336, 0], sizes = [16, 240], strides = [1, 1]} : vector<384x240xf32> to vector<16x240xf32>
    %98 = arith.maximumf %96, %97 : vector<16x240xf32>
    %99 = vector.extract_strided_slice %98 {offsets = [0, 0], sizes = [16, 230], strides = [1, 1]} : vector<16x240xf32> to vector<16x230xf32>
    %100 = vector.extract_strided_slice %98 {offsets = [0, 10], sizes = [16, 230], strides = [1, 1]} : vector<16x240xf32> to vector<16x230xf32>
    %101 = arith.maximumf %99, %100 : vector<16x230xf32>
    %cst_15 = arith.constant 0.000000e+00 : f32
    %102 = vector.broadcast %cst_15 : f32 to vector<16x230xf32>
    %103 = arith.maximumf %101, %102 : vector<16x230xf32>
    %104 = arith.truncf %103 : vector<16x230xf32> to vector<16x230xbf16>
    %105 = vector.extract_strided_slice %5 {offsets = [352, 0], sizes = [16, 240], strides = [1, 1]} : vector<384x240xf32> to vector<16x240xf32>
    %106 = vector.extract_strided_slice %5 {offsets = [368, 0], sizes = [16, 240], strides = [1, 1]} : vector<384x240xf32> to vector<16x240xf32>
    %107 = arith.maximumf %105, %106 : vector<16x240xf32>
    %108 = vector.extract_strided_slice %107 {offsets = [0, 0], sizes = [16, 230], strides = [1, 1]} : vector<16x240xf32> to vector<16x230xf32>
    %109 = vector.extract_strided_slice %107 {offsets = [0, 10], sizes = [16, 230], strides = [1, 1]} : vector<16x240xf32> to vector<16x230xf32>
    %110 = arith.maximumf %108, %109 : vector<16x230xf32>
    %cst_16 = arith.constant 0.000000e+00 : f32
    %111 = vector.broadcast %cst_16 : f32 to vector<16x230xf32>
    %112 = arith.maximumf %110, %111 : vector<16x230xf32>
    %113 = arith.truncf %112 : vector<16x230xf32> to vector<16x230xbf16>
    %114 = tpu.concatenate %14, %23, %32, %41, %50, %59, %68, %77, %86, %95, %104, %113 in 0 : vector<16x230xbf16>, vector<16x230xbf16>, vector<16x230xbf16>, vector<16x230xbf16>, vector<16x230xbf16>, vector<16x230xbf16>, vector<16x230xbf16>, vector<16x230xbf16>, vector<16x230xbf16>, vector<16x230xbf16>, vector<16x230xbf16>, vector<16x230xbf16> -> vector<192x230xbf16>
    %115 = vector.extract_strided_slice %114 {offsets = [0, 0], sizes = [128, 230], strides = [1, 1]} : vector<192x230xbf16> to vector<128x230xbf16>
    %c0_17 = arith.constant 0 : index
    %c0_18 = arith.constant 0 : index
    %c0_19 = arith.constant 0 : index
    %116 = vector.load %arg4[%c0_17, %c0_18, %c0_19] : memref<5x230x160xbf16, #tpu.memory_space<vmem>>, vector<1x230x160xbf16>
    %117 = vector.shape_cast %116 : vector<1x230x160xbf16> to vector<230x160xbf16>
    %cst_20 = arith.constant dense<0.000000e+00> : vector<128x160xf32>
    %118 = tpu.matmul %115, %117, %cst_20 {dimension_numbers = #tpu.dot_dimension_numbers<[1], [0], [0], [1], [0, 0, 1, 1], [], []>} : vector<128x230xbf16>, vector<230x160xbf16>, vector<128x160xf32> -> vector<128x160xf32>
    %119 = vector.extract_strided_slice %114 {offsets = [16, 0], sizes = [128, 230], strides = [1, 1]} : vector<192x230xbf16> to vector<128x230xbf16>
    %c1 = arith.constant 1 : index
    %c0_21 = arith.constant 0 : index
    %c0_22 = arith.constant 0 : index
    %120 = vector.load %arg4[%c1, %c0_21, %c0_22] : memref<5x230x160xbf16, #tpu.memory_space<vmem>>, vector<1x230x160xbf16>
    %121 = vector.shape_cast %120 : vector<1x230x160xbf16> to vector<230x160xbf16>
    %cst_23 = arith.constant dense<0.000000e+00> : vector<128x160xf32>
    %122 = tpu.matmul %119, %121, %cst_23 {dimension_numbers = #tpu.dot_dimension_numbers<[1], [0], [0], [1], [0, 0, 1, 1], [], []>} : vector<128x230xbf16>, vector<230x160xbf16>, vector<128x160xf32> -> vector<128x160xf32>
    %123 = arith.addf %118, %122 : vector<128x160xf32>
    %124 = vector.extract_strided_slice %114 {offsets = [32, 0], sizes = [128, 230], strides = [1, 1]} : vector<192x230xbf16> to vector<128x230xbf16>
    %c2 = arith.constant 2 : index
    %c0_24 = arith.constant 0 : index
    %c0_25 = arith.constant 0 : index
    %125 = vector.load %arg4[%c2, %c0_24, %c0_25] : memref<5x230x160xbf16, #tpu.memory_space<vmem>>, vector<1x230x160xbf16>
    %126 = vector.shape_cast %125 : vector<1x230x160xbf16> to vector<230x160xbf16>
    %cst_26 = arith.constant dense<0.000000e+00> : vector<128x160xf32>
    %127 = tpu.matmul %124, %126, %cst_26 {dimension_numbers = #tpu.dot_dimension_numbers<[1], [0], [0], [1], [0, 0, 1, 1], [], []>} : vector<128x230xbf16>, vector<230x160xbf16>, vector<128x160xf32> -> vector<128x160xf32>
    %128 = arith.addf %123, %127 : vector<128x160xf32>
    %129 = vector.extract_strided_slice %114 {offsets = [48, 0], sizes = [128, 230], strides = [1, 1]} : vector<192x230xbf16> to vector<128x230xbf16>
    %c3 = arith.constant 3 : index
    %c0_27 = arith.constant 0 : index
    %c0_28 = arith.constant 0 : index
    %130 = vector.load %arg4[%c3, %c0_27, %c0_28] : memref<5x230x160xbf16, #tpu.memory_space<vmem>>, vector<1x230x160xbf16>
    %131 = vector.shape_cast %130 : vector<1x230x160xbf16> to vector<230x160xbf16>
    %cst_29 = arith.constant dense<0.000000e+00> : vector<128x160xf32>
    %132 = tpu.matmul %129, %131, %cst_29 {dimension_numbers = #tpu.dot_dimension_numbers<[1], [0], [0], [1], [0, 0, 1, 1], [], []>} : vector<128x230xbf16>, vector<230x160xbf16>, vector<128x160xf32> -> vector<128x160xf32>
    %133 = arith.addf %128, %132 : vector<128x160xf32>
    %134 = vector.extract_strided_slice %114 {offsets = [64, 0], sizes = [128, 230], strides = [1, 1]} : vector<192x230xbf16> to vector<128x230xbf16>
    %c4 = arith.constant 4 : index
    %c0_30 = arith.constant 0 : index
    %c0_31 = arith.constant 0 : index
    %135 = vector.load %arg4[%c4, %c0_30, %c0_31] : memref<5x230x160xbf16, #tpu.memory_space<vmem>>, vector<1x230x160xbf16>
    %136 = vector.shape_cast %135 : vector<1x230x160xbf16> to vector<230x160xbf16>
    %cst_32 = arith.constant dense<0.000000e+00> : vector<128x160xf32>
    %137 = tpu.matmul %134, %136, %cst_32 {dimension_numbers = #tpu.dot_dimension_numbers<[1], [0], [0], [1], [0, 0, 1, 1], [], []>} : vector<128x230xbf16>, vector<230x160xbf16>, vector<128x160xf32> -> vector<128x160xf32>
    %138 = arith.addf %133, %137 : vector<128x160xf32>
    %c0_33 = arith.constant 0 : index
    %c0_34 = arith.constant 0 : index
    %139 = vector.load %arg5[%c0_33, %c0_34] : memref<1x160xf32, #tpu.memory_space<vmem>>, vector<1x160xf32>
    %140 = vector.broadcast %139 : vector<1x160xf32> to vector<128x160xf32>
    %141 = arith.addf %138, %140 : vector<128x160xf32>
    %142 = vector.extract_strided_slice %141 {offsets = [0, 0], sizes = [16, 160], strides = [1, 1]} : vector<128x160xf32> to vector<16x160xf32>
    %143 = vector.extract_strided_slice %141 {offsets = [16, 0], sizes = [16, 160], strides = [1, 1]} : vector<128x160xf32> to vector<16x160xf32>
    %144 = arith.maximumf %142, %143 : vector<16x160xf32>
    %145 = vector.extract_strided_slice %144 {offsets = [0, 0], sizes = [16, 140], strides = [1, 1]} : vector<16x160xf32> to vector<16x140xf32>
    %146 = vector.extract_strided_slice %144 {offsets = [0, 20], sizes = [16, 140], strides = [1, 1]} : vector<16x160xf32> to vector<16x140xf32>
    %147 = arith.maximumf %145, %146 : vector<16x140xf32>
    %cst_35 = arith.constant 0.000000e+00 : f32
    %148 = vector.broadcast %cst_35 : f32 to vector<16x140xf32>
    %149 = arith.maximumf %147, %148 : vector<16x140xf32>
    %150 = arith.truncf %149 : vector<16x140xf32> to vector<16x140xbf16>
    %151 = vector.extract_strided_slice %141 {offsets = [32, 0], sizes = [16, 160], strides = [1, 1]} : vector<128x160xf32> to vector<16x160xf32>
    %152 = vector.extract_strided_slice %141 {offsets = [48, 0], sizes = [16, 160], strides = [1, 1]} : vector<128x160xf32> to vector<16x160xf32>
    %153 = arith.maximumf %151, %152 : vector<16x160xf32>
    %154 = vector.extract_strided_slice %153 {offsets = [0, 0], sizes = [16, 140], strides = [1, 1]} : vector<16x160xf32> to vector<16x140xf32>
    %155 = vector.extract_strided_slice %153 {offsets = [0, 20], sizes = [16, 140], strides = [1, 1]} : vector<16x160xf32> to vector<16x140xf32>
    %156 = arith.maximumf %154, %155 : vector<16x140xf32>
    %cst_36 = arith.constant 0.000000e+00 : f32
    %157 = vector.broadcast %cst_36 : f32 to vector<16x140xf32>
    %158 = arith.maximumf %156, %157 : vector<16x140xf32>
    %159 = arith.truncf %158 : vector<16x140xf32> to vector<16x140xbf16>
    %160 = vector.extract_strided_slice %141 {offsets = [64, 0], sizes = [16, 160], strides = [1, 1]} : vector<128x160xf32> to vector<16x160xf32>
    %161 = vector.extract_strided_slice %141 {offsets = [80, 0], sizes = [16, 160], strides = [1, 1]} : vector<128x160xf32> to vector<16x160xf32>
    %162 = arith.maximumf %160, %161 : vector<16x160xf32>
    %163 = vector.extract_strided_slice %162 {offsets = [0, 0], sizes = [16, 140], strides = [1, 1]} : vector<16x160xf32> to vector<16x140xf32>
    %164 = vector.extract_strided_slice %162 {offsets = [0, 20], sizes = [16, 140], strides = [1, 1]} : vector<16x160xf32> to vector<16x140xf32>
    %165 = arith.maximumf %163, %164 : vector<16x140xf32>
    %cst_37 = arith.constant 0.000000e+00 : f32
    %166 = vector.broadcast %cst_37 : f32 to vector<16x140xf32>
    %167 = arith.maximumf %165, %166 : vector<16x140xf32>
    %168 = arith.truncf %167 : vector<16x140xf32> to vector<16x140xbf16>
    %169 = vector.extract_strided_slice %141 {offsets = [96, 0], sizes = [16, 160], strides = [1, 1]} : vector<128x160xf32> to vector<16x160xf32>
    %170 = vector.extract_strided_slice %141 {offsets = [112, 0], sizes = [16, 160], strides = [1, 1]} : vector<128x160xf32> to vector<16x160xf32>
    %171 = arith.maximumf %169, %170 : vector<16x160xf32>
    %172 = vector.extract_strided_slice %171 {offsets = [0, 0], sizes = [16, 140], strides = [1, 1]} : vector<16x160xf32> to vector<16x140xf32>
    %173 = vector.extract_strided_slice %171 {offsets = [0, 20], sizes = [16, 140], strides = [1, 1]} : vector<16x160xf32> to vector<16x140xf32>
    %174 = arith.maximumf %172, %173 : vector<16x140xf32>
    %cst_38 = arith.constant 0.000000e+00 : f32
    %175 = vector.broadcast %cst_38 : f32 to vector<16x140xf32>
    %176 = arith.maximumf %174, %175 : vector<16x140xf32>
    %177 = arith.truncf %176 : vector<16x140xf32> to vector<16x140xbf16>
    %c0_39 = arith.constant 0 : index
    %c0_40 = arith.constant 0 : index
    %c0_41 = arith.constant 0 : index
    %178 = vector.load %arg6[%c0_39, %c0_40, %c0_41] : memref<4x140x32xbf16, #tpu.memory_space<vmem>>, vector<1x140x32xbf16>
    %179 = vector.shape_cast %178 : vector<1x140x32xbf16> to vector<140x32xbf16>
    %cst_42 = arith.constant dense<0.000000e+00> : vector<16x32xf32>
    %180 = tpu.matmul %150, %179, %cst_42 {dimension_numbers = #tpu.dot_dimension_numbers<[1], [0], [0], [1], [0, 0, 1, 1], [], []>} : vector<16x140xbf16>, vector<140x32xbf16>, vector<16x32xf32> -> vector<16x32xf32>
    %c1_43 = arith.constant 1 : index
    %c0_44 = arith.constant 0 : index
    %c0_45 = arith.constant 0 : index
    %181 = vector.load %arg6[%c1_43, %c0_44, %c0_45] : memref<4x140x32xbf16, #tpu.memory_space<vmem>>, vector<1x140x32xbf16>
    %182 = vector.shape_cast %181 : vector<1x140x32xbf16> to vector<140x32xbf16>
    %cst_46 = arith.constant dense<0.000000e+00> : vector<16x32xf32>
    %183 = tpu.matmul %159, %182, %cst_46 {dimension_numbers = #tpu.dot_dimension_numbers<[1], [0], [0], [1], [0, 0, 1, 1], [], []>} : vector<16x140xbf16>, vector<140x32xbf16>, vector<16x32xf32> -> vector<16x32xf32>
    %184 = arith.addf %180, %183 : vector<16x32xf32>
    %c2_47 = arith.constant 2 : index
    %c0_48 = arith.constant 0 : index
    %c0_49 = arith.constant 0 : index
    %185 = vector.load %arg6[%c2_47, %c0_48, %c0_49] : memref<4x140x32xbf16, #tpu.memory_space<vmem>>, vector<1x140x32xbf16>
    %186 = vector.shape_cast %185 : vector<1x140x32xbf16> to vector<140x32xbf16>
    %cst_50 = arith.constant dense<0.000000e+00> : vector<16x32xf32>
    %187 = tpu.matmul %168, %186, %cst_50 {dimension_numbers = #tpu.dot_dimension_numbers<[1], [0], [0], [1], [0, 0, 1, 1], [], []>} : vector<16x140xbf16>, vector<140x32xbf16>, vector<16x32xf32> -> vector<16x32xf32>
    %188 = arith.addf %184, %187 : vector<16x32xf32>
    %c3_51 = arith.constant 3 : index
    %c0_52 = arith.constant 0 : index
    %c0_53 = arith.constant 0 : index
    %189 = vector.load %arg6[%c3_51, %c0_52, %c0_53] : memref<4x140x32xbf16, #tpu.memory_space<vmem>>, vector<1x140x32xbf16>
    %190 = vector.shape_cast %189 : vector<1x140x32xbf16> to vector<140x32xbf16>
    %cst_54 = arith.constant dense<0.000000e+00> : vector<16x32xf32>
    %191 = tpu.matmul %177, %190, %cst_54 {dimension_numbers = #tpu.dot_dimension_numbers<[1], [0], [0], [1], [0, 0, 1, 1], [], []>} : vector<16x140xbf16>, vector<140x32xbf16>, vector<16x32xf32> -> vector<16x32xf32>
    %192 = arith.addf %188, %191 : vector<16x32xf32>
    %c0_55 = arith.constant 0 : index
    %c0_56 = arith.constant 0 : index
    %193 = vector.load %arg7[%c0_55, %c0_56] : memref<1x32xf32, #tpu.memory_space<vmem>>, vector<1x32xf32>
    %194 = vector.broadcast %193 : vector<1x32xf32> to vector<16x32xf32>
    %195 = arith.addf %192, %194 : vector<16x32xf32>
    %cst_57 = arith.constant 0.000000e+00 : f32
    %196 = vector.broadcast %cst_57 : f32 to vector<16x32xf32>
    %197 = arith.maximumf %195, %196 : vector<16x32xf32>
    %198 = arith.truncf %197 : vector<16x32xf32> to vector<16x32xbf16>
    %c0_58 = arith.constant 0 : index
    %c0_59 = arith.constant 0 : index
    %199 = vector.load %arg8[%c0_58, %c0_59] : memref<32x128xbf16, #tpu.memory_space<vmem>>, vector<32x128xbf16>
    %cst_60 = arith.constant dense<0.000000e+00> : vector<16x128xf32>
    %200 = tpu.matmul %198, %199, %cst_60 {dimension_numbers = #tpu.dot_dimension_numbers<[1], [0], [0], [1], [0, 0, 1, 1], [], []>} : vector<16x32xbf16>, vector<32x128xbf16>, vector<16x128xf32> -> vector<16x128xf32>
    %c0_61 = arith.constant 0 : index
    %c0_62 = arith.constant 0 : index
    %201 = vector.load %arg9[%c0_61, %c0_62] : memref<1x128xf32, #tpu.memory_space<vmem>>, vector<1x128xf32>
    %202 = vector.broadcast %201 : vector<1x128xf32> to vector<16x128xf32>
    %203 = arith.addf %200, %202 : vector<16x128xf32>
    %c0_63 = arith.constant 0 : index
    %c0_64 = arith.constant 0 : index
    %204 = vector.load %arg10[%c0_63, %c0_64] : memref<16x128xf32, #tpu.memory_space<vmem>>, vector<16x128xf32>
    tpu.vector_store %arg10[%c0_63, %c0_64], %203 {strides = array<i32>} : memref<16x128xf32, #tpu.memory_space<vmem>>, vector<16x128xf32>,
    return
  }
  func.func @transform_0(%arg0: i32) -> (i32, i32) {
    %c0_i32 = arith.constant 0 : i32
    %c0_i32_0 = arith.constant 0 : i32
    return %arg0, %c0_i32 : i32, i32
  }
  func.func @transform_1(%arg0: i32) -> (i32, i32) {
    %c0_i32 = arith.constant 0 : i32
    %c0_i32_0 = arith.constant 0 : i32
    %c0_i32_1 = arith.constant 0 : i32
    return %c0_i32, %c0_i32_0 : i32, i32
  }
  func.func @transform_2(%arg0: i32) -> (i32, i32) {
    %c0_i32 = arith.constant 0 : i32
    %c0_i32_0 = arith.constant 0 : i32
    %c0_i32_1 = arith.constant 0 : i32
    return %c0_i32, %c0_i32_0 : i32, i32
  }
  func.func @transform_3(%arg0: i32) -> (i32, i32, i32) {
    %c0_i32 = arith.constant 0 : i32
    %c0_i32_0 = arith.constant 0 : i32
    %c0_i32_1 = arith.constant 0 : i32
    %c0_i32_2 = arith.constant 0 : i32
    return %c0_i32, %c0_i32_0, %c0_i32_1 : i32, i32, i32
  }
  func.func @transform_4(%arg0: i32) -> (i32, i32) {
    %c0_i32 = arith.constant 0 : i32
    %c0_i32_0 = arith.constant 0 : i32
    %c0_i32_1 = arith.constant 0 : i32
    return %c0_i32, %c0_i32_0 : i32, i32
  }
  func.func @transform_5(%arg0: i32) -> (i32, i32, i32) {
    %c0_i32 = arith.constant 0 : i32
    %c0_i32_0 = arith.constant 0 : i32
    %c0_i32_1 = arith.constant 0 : i32
    %c0_i32_2 = arith.constant 0 : i32
    return %c0_i32, %c0_i32_0, %c0_i32_1 : i32, i32, i32
  }
  func.func @transform_6(%arg0: i32) -> (i32, i32) {
    %c0_i32 = arith.constant 0 : i32
    %c0_i32_0 = arith.constant 0 : i32
    %c0_i32_1 = arith.constant 0 : i32
    return %c0_i32, %c0_i32_0 : i32, i32
  }
  func.func @transform_7(%arg0: i32) -> (i32, i32) {
    %c0_i32 = arith.constant 0 : i32
    %c0_i32_0 = arith.constant 0 : i32
    %c0_i32_1 = arith.constant 0 : i32
    return %c0_i32, %c0_i32_0 : i32, i32
  }
  func.func @transform_8(%arg0: i32) -> (i32, i32) {
    %c0_i32 = arith.constant 0 : i32
    %c0_i32_0 = arith.constant 0 : i32
    %c0_i32_1 = arith.constant 0 : i32
    return %c0_i32, %c0_i32_0 : i32, i32
  }
  func.func @transform_9(%arg0: i32) -> (i32, i32) {
    %c0_i32 = arith.constant 0 : i32
    %c0_i32_0 = arith.constant 0 : i32
    return %arg0, %c0_i32 : i32, i32
  }
}

</mosaic_0001>

<bundles_post_ra>
// kernel: tile.13
= control target key start
LH: loop header
LB: loop body
LE: loop exit
PB: predicated region body
PF: predicated region fallthrough
CT: control target
= control target key end

     0   :  { %s34_s0 = inlined_call_operand.vmem [shape: f32[10], index: 0, kind: input, shape index: {}]   ;;  %s35_s1 = inlined_call_operand.vmem [shape: f32[24,10], index: 1, kind: output, shape index: {}]  }
   0x1   :  { %v4_v0 = vld [vmem:[%s34_s0] ss:$0 sm:$0xff] }
   0x2   :  { %5 = vst [vmem:[%s35_s1] sm:$0xff] %v4_v0  ;;  %10 = vst [vmem:[%s35_s1 + $0x8] sm:$0xff] %v4_v0 }
   0x3   :  { %11 = vst [vmem:[%s35_s1 + $0x10] sm:$0xff] %v4_v0 }

// kernel: tile.14
= control target key start
LH: loop header
LB: loop body
LE: loop exit
PB: predicated region body
PF: predicated region fallthrough
CT: control target
= control target key end

     0   :  { %vm9_vm0 = vcmask 64512   ;;  %s220_s12 = smov 120   ;;  %s221_s13 = smov 102   ;;  %vm3_vm1 = vcmask 80896   ;;  %vm13_vm2 = vcmask 15360   ;;  %vm16_vm3 = vcmask 1048512   ;;  %s334_s0 = inlined_call_operand.vmem [shape: f32[24,10], index: 0, kind: input, shape index: {}]   ;;  %s335_s1 = inlined_call_operand.vmem [shape: f32[1,240], index: 1, kind: output, shape index: {}]  }
   0x1   :  { %v172_v0 = vld [vmem:[%s334_s0 + $0xc] sm:$0x1]   ;;  %v175_v3 = vld [vmem:[%s334_s0 + $0x17] sm:$0x1]   ;;  %v174_v4 = vld [vmem:[%s334_s0 + $0xb] sm:$0x1]  }
   0x2   :  { %v173_v1 = vld [vmem:[%s334_s0 + $0xc] sm:$0x1]   ;;  %26 = vrot.lane.b32.xlu1 %v175_v3, %s221_s13  ;;  %v176_v5 = vld [vmem:[%s334_s0 + $0xa] sm:$0x1]   ;;  %s222_s18 = smov 110   ;;  %s223_s19 = smov 100  }
   0x3   :  { %v10_v2 = vsel %vm9_vm0, %v173_v1, %v172_v0  ;;  %v177_v6 = vld [vmem:[%s334_s0 + $0x16] sm:$0x1]   ;;  %v178_v7 = vld [vmem:[%s334_s0 + $0x9] sm:$0x1]   ;;  %s224_s24 = smov 92   ;;  %s225_s25 = smov 90  }
   0x4   :  { %11 = vrot.lane.b32.xlu0 %v10_v2, %s220_s12  ;;  %v179_v8 = vld [vmem:[%s334_s0 + $0x15] sm:$0x1]   ;;  %v180_v9 = vld [vmem:[%s334_s0 + $0x8] sm:$0x1]   ;;  %v2_v10 = vld [vmem:[%s334_s0] sm:$0x1]  }
   0x5   :  { %4 = vst.msk [vmem:[#allocation0] sm:$0x1] %vm3_vm1, %v2_v10   ;;  %s226_s3 = smov 82   ;;  %s227_s4 = smov 80   ;;  %v181_v11 = vld [vmem:[%s334_s0 + $0x14] sm:$0x1]  }
   0x6   :  { %33 = vrot.lane.b32.xlu1 %v176_v5, %s223_s19  ;;  %v182_v12 = vld [vmem:[%s334_s0 + $0x7] sm:$0x1]   ;;  %s228_s9 = smov 72   ;;  %s229_s10 = smov 70   ;;  %v183_v13 = vld [vmem:[%s334_s0 + $0x13] sm:$0x1]  }
   0x7   :  { %v184_v14 = vld [vmem:[%s334_s0 + $0x6] sm:$0x1]   ;;  %s230_s15 = smov 62   ;;  %s231_s16 = smov 60   ;;  %v185_v15 = vld [vmem:[%s334_s0 + $0x12] sm:$0x1]  }
   0x8   :  { %20 = vrot.lane.b32.xlu0 %v174_v4, %s222_s18  ;;  %v186_v16 = vld [vmem:[%s334_s0 + $0x5] sm:$0x1]   ;;  %s232_s21 = smov 52   ;;  %s233_s22 = smov 50   ;;  %v187_v17 = vld [vmem:[%s334_s0 + $0x11] sm:$0x1]  }
   0x9   :  { %v188_v18 = vld [vmem:[%s334_s0 + $0x4] sm:$0x1]   ;;  %s234_s27 = smov 42   ;;  %s235_s28 = smov 40   ;;  %v189_v19 = vld [vmem:[%s334_s0 + $0x10] sm:$0x1]  }
   0xa   :  { %46 = vrot.lane.b32.xlu1 %v178_v7, %s225_s25  ;;  %v190_v20 = vld [vmem:[%s334_s0 + $0x3] sm:$0x1]   ;;  %s237_s5 = smov 30   ;;  %v191_v21 = vld [vmem:[%s334_s0 + $0xf] sm:$0x1]   ;;  %s239_s11 = smov 20  }
   0xb   :  { %v192_v22 = vld [vmem:[%s334_s0 + $0x2] sm:$0x1]   ;;  %v193_v23 = vld [vmem:[%s334_s0 + $0xe] sm:$0x1]   ;;  %v194_v24 = vld [vmem:[%s334_s0 + $0x1] sm:$0x1]  }
   0xc   :  { %39 = vrot.lane.b32.xlu0 %v177_v6, %s224_s24  ;;  %s241_s17 = smov 10   ;;  %v195_v25 = vld [vmem:[%s334_s0 + $0xd] sm:$0x1]   ;;  %s242_s0 = smov 2   ;;  %vm28_vm4 = vcmask 917296   ;;  %vm22_vm5 = vcmask 982896  }
   0xd   :  { %vm35_vm6 = vcmask 900896   ;;  %vm41_vm7 = vcmask 835296   ;;  %vm48_vm8 = vcmask 818896   ;;  %vm54_vm9 = vcmask 753296  }
   0xe   :  { %59 = vrot.lane.b32.xlu1 %v180_v9, %s227_s4  ;;  %s236_s4 = smov 32   ;;  %vm61_vm10 = vcmask 736896   ;;  %vm67_vm11 = vcmask 671296   ;;  %vm74_vm12 = vcmask 654896   ;;  %vm80_vm13 = vcmask 589296  }
   0xf   :  { %vm87_vm14 = vcmask 572896   ;;  %vm93_vm15 = vcmask 507296   ;;  %vm100_vm0 = vcmask 490896   ;;  %vm106_vm1 = vcmask 425296  }
  0x10   :  { %52 = vrot.lane.b32.xlu0 %v179_v8, %s226_s3 }
  0x12   :  { %72 = vrot.lane.b32.xlu1 %v182_v12, %s229_s10  ;;  %s238_s10 = smov 22  }
  0x14   :  { %65 = vrot.lane.b32.xlu0 %v181_v11, %s228_s9 }
  0x16   :  { %85 = vrot.lane.b32.xlu1 %v184_v14, %s231_s16  ;;  %s240_s16 = smov 12  }
  0x18   :  { %78 = vrot.lane.b32.xlu0 %v183_v13, %s230_s15 }
  0x1a   :  { %98 = vrot.lane.b32.xlu1 %v186_v16, %s233_s22 }
  0x1c   :  { %91 = vrot.lane.b32.xlu0 %v185_v15, %s232_s21 }
  0x1e   :  { %111 = vrot.lane.b32.xlu1 %v188_v18, %s235_s28 }
  0x20   :  { %104 = vrot.lane.b32.xlu0 %v187_v17, %s234_s27 }
  0x22   :  { %124 = vrot.lane.b32.xlu1 %v190_v20, %s237_s5 }
  0x24   :  { %117 = vrot.lane.b32.xlu0 %v189_v19, %s236_s4 }
  0x26   :  { %137 = vrot.lane.b32.xlu1 %v192_v22, %s239_s11 }
  0x28   :  { %130 = vrot.lane.b32.xlu0 %v191_v21, %s238_s10 }
  0x2a   :  { %150 = vrot.lane.b32.xlu1 %v194_v24, %s241_s17 }
  0x2c   :  { %143 = vrot.lane.b32.xlu0 %v193_v23, %s240_s16 }
  0x30   :  { %156 = vrot.lane.b32.xlu0 %v195_v25, %s242_s0 }
  0x74   :  { %v27_v27 = vpop.permute.xlu1 %26  }
  0x76   :  { %v12_v26 = vpop.permute.xlu0 %11  }
  0x77   :  { %15 = vst.msk [vmem:[#allocation0 + $0x8] sm:$0x1] %vm13_vm2, %v12_v26   ;;  %vm113_vm2 = vcmask 408896  }
  0x78   :  { %17 = vst.msk [vmem:[#allocation0] sm:$0x1] %vm16_vm3, %v12_v26   ;;  %v34_v29 = vpop.permute.xlu1 %33   ;;  %vm119_vm3 = vcmask 343296  }
  0x79   :  { %30 = vst.msk [vmem:[#allocation0 + $0x8] sm:$0x1] %vm28_vm4, %v27_v27   ;;  %vm126_vm4 = vcmask 326896  }
  0x7a   :  { %v21_v28 = vpop.permute.xlu0 %20  }
  0x7b   :  { %23 = vst.msk [vmem:[#allocation0] sm:$0x1] %vm22_vm5, %v21_v28   ;;  %vm132_vm5 = vcmask 261296  }
  0x7c   :  { %36 = vst.msk [vmem:[#allocation0] sm:$0x1] %vm35_vm6, %v34_v29   ;;  %v47_v31 = vpop.permute.xlu1 %46   ;;  %vm139_vm6 = vcmask 244896  }
  0x7d   :  { %49 = vst.msk [vmem:[#allocation0] sm:$0x1] %vm48_vm8, %v47_v31   ;;  %vm152_vm8 = vcmask 162896  }
  0x7e   :  { %v40_v30 = vpop.permute.xlu0 %39  }
  0x7f   :  { %43 = vst.msk [vmem:[#allocation0 + $0x8] sm:$0x1] %vm41_vm7, %v40_v30   ;;  %vm145_vm7 = vcmask 179296  }
  0x80   :  { %v60_v33 = vpop.permute.xlu1 %59  }
  0x81   :  { %62 = vst.msk [vmem:[#allocation0] sm:$0x1] %vm61_vm10, %v60_v33  }
  0x82   :  { %v53_v32 = vpop.permute.xlu0 %52  }
  0x83   :  { %56 = vst.msk [vmem:[#allocation0 + $0x8] sm:$0x1] %vm54_vm9, %v53_v32   ;;  %vm158_vm9 = vcmask 97296  }
  0x84   :  { %v73_v35 = vpop.permute.xlu1 %72  }
  0x85   :  { %75 = vst.msk [vmem:[#allocation0] sm:$0x1] %vm74_vm12, %v73_v35  }
  0x86   :  { %v66_v34 = vpop.permute.xlu0 %65  }
  0x87   :  { %69 = vst.msk [vmem:[#allocation0 + $0x8] sm:$0x1] %vm67_vm11, %v66_v34  }
  0x88   :  { %v86_v37 = vpop.permute.xlu1 %85  }
  0x89   :  { %88 = vst.msk [vmem:[#allocation0] sm:$0x1] %vm87_vm14, %v86_v37  }
  0x8a   :  { %v79_v36 = vpop.permute.xlu0 %78  }
  0x8b   :  { %82 = vst.msk [vmem:[#allocation0 + $0x8] sm:$0x1] %vm80_vm13, %v79_v36  }
  0x8c   :  { %v99_v39 = vpop.permute.xlu1 %98  }
  0x8d   :  { %101 = vst.msk [vmem:[#allocation0] sm:$0x1] %vm100_vm0, %v99_v39  }
  0x8e   :  { %v92_v38 = vpop.permute.xlu0 %91  }
  0x8f   :  { %95 = vst.msk [vmem:[#allocation0 + $0x8] sm:$0x1] %vm93_vm15, %v92_v38  }
  0x90   :  { %v112_v41 = vpop.permute.xlu1 %111  }
  0x91   :  { %114 = vst.msk [vmem:[#allocation0] sm:$0x1] %vm113_vm2, %v112_v41  }
  0x92   :  { %v105_v40 = vpop.permute.xlu0 %104  }
  0x93   :  { %108 = vst.msk [vmem:[#allocation0 + $0x8] sm:$0x1] %vm106_vm1, %v105_v40  }
  0x94   :  { %v125_v43 = vpop.permute.xlu1 %124  }
  0x95   :  { %127 = vst.msk [vmem:[#allocation0] sm:$0x1] %vm126_vm4, %v125_v43  }
  0x96   :  { %v118_v42 = vpop.permute.xlu0 %117  }
  0x97   :  { %121 = vst.msk [vmem:[#allocation0 + $0x8] sm:$0x1] %vm119_vm3, %v118_v42  }
  0x98   :  { %v138_v45 = vpop.permute.xlu1 %137  }
  0x99   :  { %140 = vst.msk [vmem:[#allocation0] sm:$0x1] %vm139_vm6, %v138_v45  }
  0x9a   :  { %v131_v44 = vpop.permute.xlu0 %130  }
  0x9b   :  { %134 = vst.msk [vmem:[#allocation0 + $0x8] sm:$0x1] %vm132_vm5, %v131_v44  }
  0x9c   :  { %v151_v47 = vpop.permute.xlu1 %150  }
  0x9d   :  { %153 = vst.msk [vmem:[#allocation0] sm:$0x1] %vm152_vm8, %v151_v47  }
  0x9e   :  { %v144_v46 = vpop.permute.xlu0 %143  }
  0x9f   :  { %147 = vst.msk [vmem:[#allocation0 + $0x8] sm:$0x1] %vm145_vm7, %v144_v46  }
  0xa2   :  { %v157_v48 = vpop.permute.xlu0 %156  }
  0xa3   :  { %160 = vst.msk [vmem:[#allocation0 + $0x8] sm:$0x1] %vm158_vm9, %v157_v48  }
  0xa4   :  { %v164_v49 = vld [vmem:[#allocation0] sm:$0x1] }
  0xa5   :  { %166 = vst [vmem:[%s335_s1] sm:$0x1] %v164_v49 }
  0xaa   :  { %v168_v50 = vld [vmem:[#allocation0 + $0x8] sm:$0x1] }
  0xab   :  { %196 = vst [vmem:[%s335_s1 + $0x1] sm:$0x1] %v168_v50 }

// kernel: tile.18
= control target key start
LH: loop header
LB: loop body
LE: loop exit
PB: predicated region body
PF: predicated region fallthrough
CT: control target
= control target key end

     0   :  { %s22_s0 = inlined_call_operand.vmem [shape: f32[20], index: 0, kind: input, shape index: {}]   ;;  %s23_s1 = inlined_call_operand.vmem [shape: f32[8,20], index: 1, kind: output, shape index: {}]  }
   0x1   :  { %v4_v0 = vld [vmem:[%s22_s0] ss:$0 sm:$0xff] }
   0x2   :  { %5 = vst [vmem:[%s23_s1] sm:$0xff] %v4_v0 }

// kernel: tile.19
= control target key start
LH: loop header
LB: loop body
LE: loop exit
PB: predicated region body
PF: predicated region fallthrough
CT: control target
= control target key end

     0   :  { %vm9_vm0 = vcmask 64512   ;;  %s82_s12 = smov 120   ;;  %s83_s13 = smov 80   ;;  %vm3_vm1 = vcmask 162816   ;;  %vm13_vm2 = vcmask 97280   ;;  %vm16_vm3 = vcmask 1048512   ;;  %s132_s0 = inlined_call_operand.vmem [shape: f32[8,20], index: 0, kind: input, shape index: {}]   ;;  %s133_s1 = inlined_call_operand.vmem [shape: f32[1,160], index: 1, kind: output, shape index: {}]  }
   0x1   :  { %v66_v0 = vld [vmem:[%s132_s0 + $0x6] sm:$0x1]   ;;  %v69_v3 = vld [vmem:[%s132_s0 + $0x4] sm:$0x1]   ;;  %v68_v4 = vld [vmem:[%s132_s0 + $0x5] sm:$0x1]  }
   0x2   :  { %v67_v1 = vld [vmem:[%s132_s0 + $0x6] sm:$0x1]   ;;  %26 = vrot.lane.b32.xlu1 %v69_v3, %s83_s13  ;;  %v70_v5 = vld [vmem:[%s132_s0 + $0x3] sm:$0x1]   ;;  %v2_v6 = vld [vmem:[%s132_s0] sm:$0x1]  }
   0x3   :  { %v10_v2 = vsel %vm9_vm0, %v67_v1, %v66_v0  ;;  %4 = vst.msk [vmem:[#allocation0] sm:$0x1] %vm3_vm1, %v2_v6   ;;  %s84_s20 = smov 100   ;;  %s85_s21 = smov 60   ;;  %v71_v7 = vld [vmem:[%s132_s0 + $0x2] sm:$0x1]  }
   0x4   :  { %11 = vrot.lane.b32.xlu0 %v10_v2, %s82_s12  ;;  %v72_v8 = vld [vmem:[%s132_s0 + $0x1] sm:$0x1]   ;;  %s86_s26 = smov 40   ;;  %s87_s27 = smov 20   ;;  %v73_v9 = vld [vmem:[%s132_s0 + $0x7] sm:$0x1]  }
   0x5   :  { %s88_s0 = smov 12   ;;  %vm22_vm4 = vcmask 982816   ;;  %vm28_vm5 = vcmask 818816   ;;  %vm34_vm6 = vcmask 654816   ;;  %vm40_vm7 = vcmask 490816  }
   0x6   :  { %32 = vrot.lane.b32.xlu1 %v70_v5, %s85_s21  ;;  %vm46_vm8 = vcmask 326816   ;;  %vm52_vm9 = vcmask 261216  }
   0x8   :  { %20 = vrot.lane.b32.xlu0 %v68_v4, %s84_s20 }
   0xa   :  { %44 = vrot.lane.b32.xlu1 %v72_v8, %s87_s27 }
   0xc   :  { %38 = vrot.lane.b32.xlu0 %v71_v7, %s86_s26 }
  0x10   :  { %50 = vrot.lane.b32.xlu0 %v73_v9, %s88_s0 }
  0x74   :  { %v27_v11 = vpop.permute.xlu1 %26  }
  0x76   :  { %v12_v10 = vpop.permute.xlu0 %11  }
  0x77   :  { %15 = vst.msk [vmem:[#allocation0 + $0x8] sm:$0x1] %vm13_vm2, %v12_v10  }
  0x78   :  { %17 = vst.msk [vmem:[#allocation0] sm:$0x1] %vm16_vm3, %v12_v10   ;;  %v33_v13 = vpop.permute.xlu1 %32  }
  0x7a   :  { %v21_v12 = vpop.permute.xlu0 %20  }
  0x7b   :  { %23 = vst.msk [vmem:[#allocation0] sm:$0x1] %vm22_vm4, %v21_v12  }
  0x7c   :  { %29 = vst.msk [vmem:[#allocation0] sm:$0x1] %vm28_vm5, %v27_v11   ;;  %v45_v15 = vpop.permute.xlu1 %44  }
  0x7d   :  { %35 = vst.msk [vmem:[#allocation0] sm:$0x1] %vm34_vm6, %v33_v13  }
  0x7e   :  { %v39_v14 = vpop.permute.xlu0 %38  }
  0x7f   :  { %41 = vst.msk [vmem:[#allocation0] sm:$0x1] %vm40_vm7, %v39_v14  }
  0x80   :  { %47 = vst.msk [vmem:[#allocation0] sm:$0x1] %vm46_vm8, %v45_v15  }
  0x82   :  { %v51_v16 = vpop.permute.xlu0 %50  }
  0x83   :  { %54 = vst.msk [vmem:[#allocation0 + $0x8] sm:$0x1] %vm52_vm9, %v51_v16  }
  0x87   :  { %v58_v17 = vld [vmem:[#allocation0] sm:$0x1] }
  0x88   :  { %60 = vst [vmem:[%s133_s1] sm:$0x1] %v58_v17 }
  0x8a   :  { %v62_v18 = vld [vmem:[#allocation0 + $0x8] sm:$0x1] }
  0x8b   :  { %74 = vst [vmem:[%s133_s1 + $0x1] sm:$0x1] %v62_v18 }

// kernel: simplenet_forward.1
= control target key start
LH: loop header
LB: loop body
LE: loop exit
PB: predicated region body
PF: predicated region fallthrough
CT: control target
= control target key end

     0   :  { %vm415_vm0 = vcmask 97280   ;;  %vm488_vm1 = vcmask 1045504   ;;  %vm1382_vm2 = vcmask 1042432   ;;  %s4656_s23 = smov 118   ;;  %vm784_vm3 = vcmask 965632   ;;  %s6172_s1 = inlined_call_operand.vmem [shape: bf16[140,240], index: 1, kind: input, shape index: {}]   ;;  %s6173_s0 = inlined_call_operand.vmem [shape: bf16[384,140], index: 0, kind: input, shape index: {}]   ;;  %s6174_s3 = inlined_call_operand.vmem [shape: bf16[5,230,160], index: 3, kind: input, shape index: {}]   ;;  %s6175_s2 = inlined_call_operand.vmem [shape: f32[1,240], index: 2, kind: input, shape index: {}]   ;;  %s6176_s5 = inlined_call_operand.vmem [shape: bf16[4,140,32], index: 5, kind: input, shape index: {}]   ;;  %s6177_s4 = inlined_call_operand.vmem [shape: f32[1,160], index: 4, kind: input, shape index: {}]   ;;  %s6178_s7 = inlined_call_operand.vmem [shape: bf16[32,128], index: 7, kind: input, shape index: {}]   ;;  %s6179_s6 = inlined_call_operand.vmem [shape: f32[1,32], index: 6, kind: input, shape index: {}]   ;;  %s6180_s8 = inlined_call_operand.vmem [shape: f32[1,128], index: 8, kind: input, shape index: {}]   ;;  %s6181_s9 = inlined_call_operand.vmem [shape: f32[16,128], index: 9, kind: output, shape index: {}]  }
   0x1   :  { %v4299_v0 = vld [vmem:[%s6172_s1 + $0x4] ss:$8 sps:$4 sm:$0xff]   ;;  %v4301_v1 = vld [vmem:[%s6172_s1] ss:$8 sps:$4 sm:$0xff]   ;;  %v4302_v2 = vld [vmem:[%s6172_s1 + $0x14] ss:$8 sps:$4 sm:$0xff]  }
   0x2   :  { %495 = vmatprep.subr.bf16.mxu0 %v4299_v0  ;;  %v4304_v3 = vld [vmem:[%s6172_s1 + $0x10] ss:$8 sps:$4 sm:$0xff]   ;;  %v4305_v4 = vld [vmem:[%s6172_s1 + $0x24] ss:$8 sps:$4 sm:$0xff]   ;;  %v4307_v5 = vld [vmem:[%s6172_s1 + $0x20] ss:$8 sps:$4 sm:$0xff]  }
   0x3   :  { %496 = vmatpush1.bf16.msra.mxu0 %v4301_v1  ;;  %v4308_v6 = vld [vmem:[%s6172_s1 + $0x34] ss:$8 sps:$4 sm:$0xff]   ;;  %v4310_v7 = vld [vmem:[%s6172_s1 + $0x30] ss:$8 sps:$4 sm:$0xff]   ;;  %v4311_v8 = vld [vmem:[%s6172_s1 + $0x44] ss:$8 sps:$4 sm:$0xff]  }
   0x4   :  { %497 = vmatprep.subr.bf16.mxu0 %v4302_v2  ;;  %v4328_v9 = vld [vmem:[%s6173_s0 + $0x4] ss:$8 sps:$4 sm:$0xff]   ;;  %v4313_v10 = vld [vmem:[%s6172_s1 + $0x40] ss:$8 sps:$4 sm:$0xff]   ;;  %v4314_v11 = vld [vmem:[%s6172_s1 + $0x54] ss:$8 sps:$4 sm:$0xff]  }
   0x5   :  { %3561 = vmatprep.mubr.msk.bf16.mxu0 %vm415_vm0, %v4328_v9  ;;  %v4316_v12 = vld [vmem:[%s6172_s1 + $0x50] ss:$8 sps:$4 sm:$0xff]   ;;  %v4317_v13 = vld [vmem:[%s6172_s1 + $0x64] ss:$8 sps:$4 sm:$0xff]   ;;  %v4319_v14 = vld [vmem:[%s6172_s1 + $0x60] ss:$8 sps:$4 sm:$0xff]  }
   0x6   :  { %v4320_v15 = vld [vmem:[%s6172_s1 + $0x74] ss:$8 sps:$4 sm:$0xff]   ;;  %v4322_v16 = vld [vmem:[%s6172_s1 + $0x70] ss:$8 sps:$4 sm:$0xff]   ;;  %v4326_v20 = vld [vmem:[%s6173_s0] ss:$8 sps:$4 sm:$0xff]  }
   0x7   :  { %498 = vmatpush1.bf16.msra.mxu0 %v4304_v3  ;;  %v4323_v17 = vld [vmem:[%s6172_s1 + $0x84] ss:$8 sps:$4 sm:$0x3f]   ;;  %v4325_v18 = vld [vmem:[%s6172_s1 + $0x80] ss:$8 sps:$4 sm:$0x3f]  }
   0x8   :  { %499 = vmatprep.subr.bf16.mxu0 %v4305_v4  ;;  %v490_v19 = vsel %vm488_vm1, %v4325_v18, 0  ;;  %v4329_v21 = vld [vmem:[%s6173_s0 + $0x14] ss:$8 sps:$4 sm:$0xff]   ;;  %v4331_v22 = vld [vmem:[%s6173_s0 + $0x10] ss:$8 sps:$4 sm:$0xff]   ;;  %vm1357_vm4 = vcmask 834560  }
   0x9   :  { %v4332_v23 = vld [vmem:[%s6173_s0 + $0x24] ss:$8 sps:$4 sm:$0xff]   ;;  %v4334_v24 = vld [vmem:[%s6173_s0 + $0x20] ss:$8 sps:$4 sm:$0xff]   ;;  %v4335_v25 = vld [vmem:[%s6173_s0 + $0x34] ss:$8 sps:$4 sm:$0xff]  }
   0xa   :  { %v4337_v26 = vld [vmem:[%s6173_s0 + $0x30] ss:$8 sps:$4 sm:$0xff]   ;;  %v4338_v27 = vld [vmem:[%s6173_s0 + $0x44] ss:$8 sps:$4 sm:$0xff]   ;;  %v4340_v28 = vld [vmem:[%s6173_s0 + $0x40] ss:$8 sps:$4 sm:$0xff]  }
   0xb   :  { %500 = vmatpush1.bf16.msra.mxu0 %v4307_v5  ;;  %v4341_v29 = vld [vmem:[%s6173_s0 + $0x54] ss:$8 sps:$4 sm:$0xff]   ;;  %v4343_v30 = vld [vmem:[%s6173_s0 + $0x50] ss:$8 sps:$4 sm:$0xff]   ;;  %v4344_v31 = vld [vmem:[%s6173_s0 + $0x64] ss:$8 sps:$4 sm:$0xff]  }
   0xc   :  { %501 = vmatprep.subr.bf16.mxu0 %v4308_v6  ;;  %v4346_v32 = vld [vmem:[%s6173_s0 + $0x60] ss:$8 sps:$4 sm:$0xff]   ;;  %v4347_v33 = vld [vmem:[%s6173_s0 + $0x74] ss:$8 sps:$4 sm:$0xff]   ;;  %v4349_v34 = vld [vmem:[%s6173_s0 + $0x70] ss:$8 sps:$4 sm:$0xff]  }
   0xd   :  { %v4350_v35 = vld [vmem:[%s6173_s0 + $0x84] ss:$8 sps:$4 sm:$0xff]   ;;  %v4352_v36 = vld [vmem:[%s6173_s0 + $0x80] ss:$8 sps:$4 sm:$0xff]   ;;  %v4353_v37 = vld [vmem:[%s6173_s0 + $0x94] ss:$8 sps:$4 sm:$0xff]  }
   0xe   :  { %v4355_v38 = vld [vmem:[%s6173_s0 + $0x90] ss:$8 sps:$4 sm:$0xff]   ;;  %v4356_v39 = vld [vmem:[%s6173_s0 + $0xa4] ss:$8 sps:$4 sm:$0xff]   ;;  %v4358_v40 = vld [vmem:[%s6173_s0 + $0xa0] ss:$8 sps:$4 sm:$0xff]  }
   0xf   :  { %502 = vmatpush1.bf16.msra.mxu0 %v4310_v7  ;;  %v4359_v41 = vld [vmem:[%s6173_s0 + $0xb4] ss:$8 sps:$4 sm:$0xff]   ;;  %v4361_v42 = vld [vmem:[%s6173_s0 + $0xb0] ss:$8 sps:$4 sm:$0xff]   ;;  %v4362_v43 = vld [vmem:[%s6173_s0 + $0xc4] ss:$8 sps:$4 sm:$0xff]  }
  0x10   :  { %503 = vmatprep.subr.bf16.mxu0 %v4311_v8  ;;  %v4364_v44 = vld [vmem:[%s6173_s0 + $0xc0] ss:$8 sps:$4 sm:$0xff]   ;;  %v4365_v45 = vld [vmem:[%s6173_s0 + $0xd4] ss:$8 sps:$4 sm:$0xff]   ;;  %v4367_v46 = vld [vmem:[%s6173_s0 + $0xd0] ss:$8 sps:$4 sm:$0xff]  }
  0x11   :  { %v4368_v47 = vld [vmem:[%s6173_s0 + $0xe4] ss:$8 sps:$4 sm:$0xff]   ;;  %v4370_v48 = vld [vmem:[%s6173_s0 + $0xe0] ss:$8 sps:$4 sm:$0xff]   ;;  %v4371_v49 = vld [vmem:[%s6173_s0 + $0xf4] ss:$8 sps:$4 sm:$0xff]  }
  0x12   :  { %v4373_v50 = vld [vmem:[%s6173_s0 + $0xf0] ss:$8 sps:$4 sm:$0xff]   ;;  %v4374_v51 = vld [vmem:[%s6173_s0 + $0x104] ss:$8 sps:$4 sm:$0xff]   ;;  %v4376_v52 = vld [vmem:[%s6173_s0 + $0x100] ss:$8 sps:$4 sm:$0xff]  }
  0x13   :  { %504 = vmatpush1.bf16.msra.mxu0 %v4313_v10  ;;  %v4377_v53 = vld [vmem:[%s6173_s0 + $0x114] ss:$8 sps:$4 sm:$0xff]   ;;  %v4379_v54 = vld [vmem:[%s6173_s0 + $0x110] ss:$8 sps:$4 sm:$0xff]   ;;  %v4380_v55 = vld [vmem:[%s6173_s0 + $0x124] ss:$8 sps:$4 sm:$0xff]  }
  0x14   :  { %505 = vmatprep.subr.bf16.mxu0 %v4314_v11  ;;  %v4382_v56 = vld [vmem:[%s6173_s0 + $0x120] ss:$8 sps:$4 sm:$0xff]   ;;  %v4383_v57 = vld [vmem:[%s6173_s0 + $0x134] ss:$8 sps:$4 sm:$0xff]   ;;  %v4385_v58 = vld [vmem:[%s6173_s0 + $0x130] ss:$8 sps:$4 sm:$0xff]  }
  0x15   :  { %v4386_v59 = vld [vmem:[%s6173_s0 + $0x144] ss:$8 sps:$4 sm:$0xff]   ;;  %v4388_v60 = vld [vmem:[%s6173_s0 + $0x140] ss:$8 sps:$4 sm:$0xff]   ;;  %v4389_v61 = vld [vmem:[%s6173_s0 + $0x154] ss:$8 sps:$4 sm:$0xff]  }
  0x16   :  { %v4391_v62 = vld [vmem:[%s6173_s0 + $0x150] ss:$8 sps:$4 sm:$0xff]   ;;  %v4392_v63 = vld [vmem:[%s6174_s3 + $0xec] ss:$8 sps:$4 sm:$0xff]   ;;  %v4395_v1 = vld [vmem:[%s6174_s3 + $0xfc] ss:$8 sps:$4 sm:$0xff]  }
  0x17   :  { %506 = vmatpush1.bf16.msra.mxu0 %v4316_v12  ;;  %v4394_v0 = vld [vmem:[%s6174_s3 + $0xe8] ss:$8 sps:$4 sm:$0xff]   ;;  %1389 = vmatprep.subr.bf16.mxu1 %v4392_v63  ;;  %v4397_v2 = vld [vmem:[%s6174_s3 + $0xf8] ss:$8 sps:$4 sm:$0xff]   ;;  %v4398_v3 = vld [vmem:[%s6174_s3 + $0x10c] ss:$8 sps:$4 sm:$0xff]  }
  0x18   :  { %507 = vmatprep.subr.bf16.mxu0 %v4317_v13  ;;  %1390 = vmatpush1.bf16.msra.mxu1 %v4394_v0  ;;  %v4400_v4 = vld [vmem:[%s6174_s3 + $0x108] ss:$8 sps:$4 sm:$0xff]   ;;  %v4401_v5 = vld [vmem:[%s6174_s3 + $0x11c] ss:$8 sps:$4 sm:$0xff]   ;;  %v4403_v6 = vld [vmem:[%s6174_s3 + $0x118] ss:$8 sps:$4 sm:$0xff]   ;;  %v101_v13 = vlaneseq }
  0x19   :  { %1391 = vmatprep.subr.bf16.mxu1 %v4395_v1  ;;  %v4404_v7 = vld [vmem:[%s6173_s0 + $0x164] ss:$8 sps:$4 sm:$0xff]   ;;  %v4408_v9 = vld [vmem:[%s6173_s0 + $0x160] ss:$8 sps:$4 sm:$0xff]   ;;  %vm2816_vm5 = vcmask 883712   ;;  %vm4660_vm6 = vmmov 0  }
  0x1a   :  { %v4406_v8 = vld [vmem:[%s6174_s3 + $0x12c] ss:$8 sps:$4 sm:$0xff]   ;;  %v4409_v10 = vld [vmem:[%s6174_s3 + $0x128] ss:$8 sps:$4 sm:$0xff]   ;;  %v4410_v11 = vld [vmem:[%s6174_s3 + $0x13c] ss:$8 sps:$4 sm:$0xff]  }
  0x1b   :  { %508 = vmatpush1.bf16.msra.mxu0 %v4319_v14  ;;  %v4412_v12 = vld [vmem:[%s6174_s3 + $0x138] ss:$8 sps:$4 sm:$0xff]   ;;  %v4413_v14 = vld [vmem:[%s6173_s0 + $0x174] ss:$8 sps:$4 sm:$0xff]   ;;  %v4977_v18 = vshrl.u32 %v101_v13, 7  ;;  %vm3443_vm7 = vcmask 261120  }
  0x1c   :  { %509 = vmatprep.subr.bf16.mxu0 %v4320_v15  ;;  %1392 = vmatpush1.bf16.msra.mxu1 %v4397_v2  ;;  %v4415_v15 = vld [vmem:[%s6174_s3 + $0x14c] ss:$8 sps:$4 sm:$0xff]  }
  0x1d   :  { %1393 = vmatprep.subr.bf16.mxu1 %v4398_v3  ;;  %v3613_v2 = vld [vmem:[%s6174_s3 + $0x1c8] sm:$0x77] }
  0x1f   :  { %510 = vmatpush1.bf16.msra.mxu0 %v4322_v16  ;;  %v4417_v16 = vld [vmem:[%s6173_s0 + $0x170] ss:$8 sps:$4 sm:$0xff]  }
  0x20   :  { %3560 = vmatprep.subr.msk.bf16.mxu0 %vm488_vm1, %v4323_v17  ;;  %1394 = vmatpush1.bf16.msra.mxu1 %v4400_v4  ;;  %v4418_v17 = vld [vmem:[%s6174_s3 + $0x148] ss:$8 sps:$4 sm:$0xff]  }
  0x21   :  { %1395 = vmatprep.subr.bf16.mxu1 %v4401_v5 }
  0x23   :  { %512 = vmatpush1.bf16.msra.mxu0 %v490_v19  ;;  %v4419_v19 = vld [vmem:[%s6174_s3 + $0x15c] ss:$8 sps:$4 sm:$0xff]  }
  0x24   :  { %1396 = vmatpush1.bf16.msra.mxu1 %v4403_v6  ;;  %v3643_v6 = vcombine.high %v3613_v2, %v3613_v2 }
  0x25   :  { %1397 = vmatprep.subr.bf16.mxu1 %v4406_v8 }
  0x26   :  { %528 = vmatmul.mubr.bf16.vlgmr.msra.gmra.mrb[0].mxu0 %v4326_v20  ;;  %v4421_v20 = vld [vmem:[%s6174_s3 + $0x158] ss:$8 sps:$4 sm:$0xff]  }
  0x27   :  { %3562 = vmatprep.mubr.msk.bf16.mxu0 %vm415_vm0, %v4329_v21  ;;  %v99_v21 = vld [vmem:[%s6175_s2] sm:$0x3] }
  0x28   :  { %1398 = vmatpush1.bf16.msra.mxu1 %v4409_v10 }
  0x29   :  { %1399 = vmatprep.subr.bf16.mxu1 %v4410_v11 }
  0x2c   :  { %1400 = vmatpush1.bf16.msra.mxu1 %v4412_v12 }
  0x2d   :  { %1401 = vmatprep.subr.bf16.mxu1 %v4415_v15 }
  0x2e   :  { %538 = vmatmul.mubr.bf16.gmra.mrb[4].mxu0 %v4331_v22 }
  0x2f   :  { %3563 = vmatprep.mubr.msk.bf16.mxu0 %vm415_vm0, %v4332_v23  ;;  %v103_v23 = vsub.s32 0, %v4977_v18 }
  0x30   :  { %1402 = vmatpush1.bf16.msra.mxu1 %v4418_v17 }
  0x31   :  { %1403 = vmatprep.subr.bf16.mxu1 %v4419_v19 }
  0x34   :  { %1404 = vmatpush1.bf16.msra.mxu1 %v4421_v20 }
  0x36   :  { %548 = vmatmul.mubr.bf16.gmra.mrb[8].mxu0 %v4334_v24 }
  0x37   :  { %3564 = vmatprep.mubr.msk.bf16.mxu0 %vm415_vm0, %v4335_v25  ;;  %v6182_v25 = vsub.s32 1, %v4977_v18 }
  0x3e   :  { %558 = vmatmul.mubr.bf16.gmra.mrb[12].mxu0 %v4337_v26 }
  0x3f   :  { %3565 = vmatprep.mubr.msk.bf16.mxu0 %vm415_vm0, %v4338_v27  ;;  %v4422_v27 = vld [vmem:[%s6174_s3 + $0x16c] ss:$8 sps:$4 sm:$0xff]  }
  0x40   :  { %1405 = vmatprep.subr.bf16.mxu1 %v4422_v27 }
  0x46   :  { %568 = vmatmul.mubr.bf16.gmra.mrb[16].mxu0 %v4340_v28 }
  0x47   :  { %3566 = vmatprep.mubr.msk.bf16.mxu0 %vm415_vm0, %v4341_v29  ;;  %v4424_v29 = vld [vmem:[%s6174_s3 + $0x168] ss:$8 sps:$4 sm:$0xff]  }
  0x48   :  { %1406 = vmatpush1.bf16.msra.mxu1 %v4424_v29 }
  0x4e   :  { %578 = vmatmul.mubr.bf16.gmra.mrb[20].mxu0 %v4343_v30  ;;  %v4998_v30 = vrot.slane %v99_v21, %v103_v23 }
  0x4f   :  { %3567 = vmatprep.mubr.msk.bf16.mxu0 %vm415_vm0, %v4344_v31  ;;  %v5002_v31 = vrot.slane %v99_v21, %v6182_v25 }
  0x56   :  { %588 = vmatmul.mubr.bf16.gmra.mrb[24].mxu0 %v4346_v32  ;;  %v4425_v32 = vld [vmem:[%s6174_s3 + $0x17c] ss:$8 sps:$4 sm:$0xff]  }
  0x57   :  { %3568 = vmatprep.mubr.msk.bf16.mxu0 %vm415_vm0, %v4347_v33  ;;  %v4427_v33 = vld [vmem:[%s6174_s3 + $0x178] ss:$8 sps:$4 sm:$0xff]   ;;  %1407 = vmatprep.subr.bf16.mxu1 %v4425_v32 }
  0x58   :  { %1408 = vmatpush1.bf16.msra.mxu1 %v4427_v33 }
  0x5e   :  { %598 = vmatmul.mubr.bf16.gmra.mrb[28].mxu0 %v4349_v34 }
  0x5f   :  { %3569 = vmatprep.mubr.msk.bf16.mxu0 %vm415_vm0, %v4350_v35 }
  0x66   :  { %608 = vmatmul.mubr.bf16.gmra.mrb[32].mxu0 %v4352_v36 }
  0x67   :  { %3570 = vmatprep.mubr.msk.bf16.mxu0 %vm415_vm0, %v4353_v37 }
  0x6e   :  { %618 = vmatmul.mubr.bf16.gmra.mrb[36].mxu0 %v4355_v38 }
  0x6f   :  { %3571 = vmatprep.mubr.msk.bf16.mxu0 %vm415_vm0, %v4356_v39 }
  0x76   :  { %628 = vmatmul.mubr.bf16.gmra.mrb[40].mxu0 %v4358_v40 }
  0x77   :  { %3572 = vmatprep.mubr.msk.bf16.mxu0 %vm415_vm0, %v4359_v41  ;;  %v4428_v41 = vld [vmem:[%s6174_s3 + $0x18c] ss:$8 sps:$4 sm:$0xff]  }
  0x78   :  { %1409 = vmatprep.subr.bf16.mxu1 %v4428_v41 }
  0x7e   :  { %638 = vmatmul.mubr.bf16.gmra.mrb[44].mxu0 %v4361_v42 }
  0x7f   :  { %3573 = vmatprep.mubr.msk.bf16.mxu0 %vm415_vm0, %v4362_v43 }
  0x86   :  { %648 = vmatmul.mubr.bf16.gmra.mrb[48].mxu0 %v4364_v44 }
  0x87   :  { %3574 = vmatprep.mubr.msk.bf16.mxu0 %vm415_vm0, %v4365_v45 }
  0x8e   :  { %658 = vmatmul.mubr.bf16.gmra.mrb[52].mxu0 %v4367_v46  ;;  %v4430_v46 = vld [vmem:[%s6174_s3 + $0x188] ss:$8 sps:$4 sm:$0xff]  }
  0x8f   :  { %3575 = vmatprep.mubr.msk.bf16.mxu0 %vm415_vm0, %v4368_v47  ;;  %1410 = vmatpush1.bf16.msra.mxu1 %v4430_v46 }
  0x96   :  { %668 = vmatmul.mubr.bf16.gmra.mrb[56].mxu0 %v4370_v48 }
  0x97   :  { %3576 = vmatprep.mubr.msk.bf16.mxu0 %vm415_vm0, %v4371_v49 }
  0x9e   :  { %678 = vmatmul.mubr.bf16.gmra.mrb[60].mxu0 %v4373_v50 }
  0x9f   :  { %3577 = vmatprep.mubr.msk.bf16.mxu0 %vm415_vm0, %v4374_v51 }
  0xa6   :  { %688 = vmatmul.mubr.bf16.gmra.mrb[64].mxu0 %v4376_v52  ;;  %v4431_v52 = vld [vmem:[%s6174_s3 + $0x19c] ss:$8 sps:$4 sm:$0xff]  }
  0xa7   :  { %3578 = vmatprep.mubr.msk.bf16.mxu0 %vm415_vm0, %v4377_v53  ;;  %v4433_v53 = vld [vmem:[%s6174_s3 + $0x198] ss:$8 sps:$4 sm:$0xff]   ;;  %1411 = vmatprep.subr.bf16.mxu1 %v4431_v52 }
  0xa8   :  { %1412 = vmatpush1.bf16.msra.mxu1 %v4433_v53 }
  0xae   :  { %698 = vmatmul.mubr.bf16.gmra.mrb[68].mxu0 %v4379_v54 }
  0xaf   :  { %3579 = vmatprep.mubr.msk.bf16.mxu0 %vm415_vm0, %v4380_v55 }
  0xb6   :  { %708 = vmatmul.mubr.bf16.gmra.mrb[72].mxu0 %v4382_v56 }
  0xb7   :  { %3580 = vmatprep.mubr.msk.bf16.mxu0 %vm415_vm0, %v4383_v57  ;;  %v4434_v57 = vld [vmem:[%s6174_s3 + $0x1ac] ss:$8 sps:$4 sm:$0xff]  }
  0xb8   :  { %1413 = vmatprep.subr.bf16.mxu1 %v4434_v57 }
  0xbe   :  { %718 = vmatmul.mubr.bf16.gmra.mrb[76].mxu0 %v4385_v58 }
  0xbf   :  { %3581 = vmatprep.mubr.msk.bf16.mxu0 %vm415_vm0, %v4386_v59  ;;  %v4436_v59 = vld [vmem:[%s6174_s3 + $0x1a8] ss:$8 sps:$4 sm:$0xff]  }
  0xc0   :  { %1414 = vmatpush1.bf16.msra.mxu1 %v4436_v59 }
  0xc6   :  { %728 = vmatmul.mubr.bf16.gmra.mrb[80].mxu0 %v4388_v60  ;;  %v4437_v60 = vld [vmem:[%s6174_s3 + $0x1bc] ss:$8 sps:$4 sm:$0xff]  }
  0xc7   :  { %3582 = vmatprep.mubr.msk.bf16.mxu0 %vm415_vm0, %v4389_v61  ;;  %v4439_v61 = vld [vmem:[%s6174_s3 + $0x1b8] ss:$8 sps:$4 sm:$0xff]   ;;  %1415 = vmatprep.subr.bf16.mxu1 %v4437_v60 }
  0xc8   :  { %1416 = vmatpush1.bf16.msra.mxu1 %v4439_v61 }
  0xc9   :  { %3644 = vmatprep.subr.msk.bf16.mxu1 %vm1382_vm2, %v3643_v6 }
  0xce   :  { %738 = vmatmul.mubr.bf16.gmra.mrb[84].mxu0 %v4391_v62 }
  0xcf   :  { %3583 = vmatprep.mubr.msk.bf16.mxu0 %vm415_vm0, %v4404_v7  ;;  %v3642_v7 = vcombine.low %v3613_v2, %v3613_v2 }
  0xd1   :  { %v1384_v15 = vsel %vm1382_vm2, %v3642_v7, 0 }
  0xd2   :  { %1418 = vmatpush1.bf16.msra.mxu1 %v1384_v15 }
  0xd6   :  { %748 = vmatmul.mubr.bf16.gmra.mrb[88].mxu0 %v4408_v9 }
  0xd7   :  { %3584 = vmatprep.mubr.msk.bf16.mxu0 %vm415_vm0, %v4413_v14 }
  0xde   :  { %758 = vmatmul.mubr.bf16.gmra.mrb[92].mxu0 %v4417_v16 }
  0xf9   :  { %v529_v22 = vpop.f32.mrb[0].mxu0 }
  0xfa   :  { %v531_v24 = vpop.f32.mrb[1].mxu0  ;;  %v530_v35 = vadd.f32 %v529_v22, %v4998_v30 }
  0xfb   :  { %v533_v26 = vpop.f32.mrb[2].mxu0  ;;  %v532_v38 = vadd.f32 %v531_v24, %v5002_v31 }
  0xfc   :  { %v535_v28 = vpop.f32.mrb[3].mxu0  ;;  %v534_v42 = vadd.f32 %v533_v26, %v4998_v30 }
  0xfd   :  { %v536_v47 = vadd.f32 %v535_v28, %v5002_v31 }
 0x101   :  { %v539_v34 = vpop.f32.mrb[4].mxu0 }
 0x102   :  { %v540_v36 = vadd.f32 %v539_v34, %v4998_v30  ;;  %v541_v37 = vpop.f32.mrb[5].mxu0 }
 0x103   :  { %v542_v39 = vadd.f32 %v541_v37, %v5002_v31  ;;  %v543_v40 = vpop.f32.mrb[6].mxu0 }
 0x104   :  { %v5018_v43 = vmax.f32 %v530_v35, %v540_v36  ;;  %v544_v44 = vadd.f32 %v543_v40, %v4998_v30  ;;  %v545_v45 = vpop.f32.mrb[7].mxu0 }
 0x105   :  { %v5025_v48 = vmax.f32 %v532_v38, %v542_v39  ;;  %v546_v49 = vadd.f32 %v545_v45, %v5002_v31 }
 0x106   :  { %v5028_v50 = vmax.f32 %v534_v42, %v544_v44 }
 0x107   :  { %v5030_v51 = vmax.f32 %v536_v47, %v546_v49 }
 0x109   :  { %v549_v54 = vpop.f32.mrb[8].mxu0 }
 0x10a   :  { %v551_v55 = vpop.f32.mrb[9].mxu0  ;;  %v550_v63 = vadd.f32 %v549_v54, %v4998_v30 }
 0x10b   :  { %v553_v56 = vpop.f32.mrb[10].mxu0  ;;  %v552_v3 = vadd.f32 %v551_v55, %v5002_v31 }
 0x10c   :  { %v555_v58 = vpop.f32.mrb[11].mxu0  ;;  %v554_v8 = vadd.f32 %v553_v56, %v4998_v30 }
 0x10d   :  { %v556_v12 = vadd.f32 %v555_v58, %v5002_v31 }
 0x111   :  { %v559_v62 = vpop.f32.mrb[12].mxu0 }
 0x112   :  { %v560_v0 = vadd.f32 %v559_v62, %v4998_v30  ;;  %v561_v1 = vpop.f32.mrb[13].mxu0 }
 0x113   :  { %v562_v4 = vadd.f32 %v561_v1, %v5002_v31  ;;  %v563_v5 = vpop.f32.mrb[14].mxu0 }
 0x114   :  { %v5058_v9 = vmax.f32 %v550_v63, %v560_v0  ;;  %v564_v10 = vadd.f32 %v563_v5, %v4998_v30  ;;  %v565_v11 = vpop.f32.mrb[15].mxu0 }
 0x115   :  { %v5062_v13 = vmax.f32 %v552_v3, %v562_v4  ;;  %v566_v14 = vadd.f32 %v565_v11, %v5002_v31 }
 0x116   :  { %v5067_v16 = vmax.f32 %v554_v8, %v564_v10 }
 0x117   :  { %v5069_v17 = vmax.f32 %v556_v12, %v566_v14  ;;  %v4139_v19 = vpack.i.bf16 %v5062_v13, %v5058_v9 }
 0x119   :  { %v569_v20 = vpop.f32.mrb[16].mxu0  ;;  %4140 = vrot.lane.b32.xlu0 %v4139_v19, %s4656_s23  ;;  %v4144_v24 = vpack.i.bf16 %v5069_v17, %v5067_v16 }
 0x11a   :  { %v571_v21 = vpop.f32.mrb[17].mxu0  ;;  %v570_v28 = vadd.f32 %v569_v20, %v4998_v30 }
 0x11b   :  { %v573_v22 = vpop.f32.mrb[18].mxu0  ;;  %v572_v33 = vadd.f32 %v571_v21, %v5002_v31 }
 0x11c   :  { %v575_v26 = vpop.f32.mrb[19].mxu0  ;;  %v574_v36 = vadd.f32 %v573_v22, %v4998_v30 }
 0x11d   :  { %4145 = vrot.lane.b32.xlu0 %v4144_v24, %s4656_s23  ;;  %v576_v40 = vadd.f32 %v575_v26, %v5002_v31 }
 0x121   :  { %v579_v27 = vpop.f32.mrb[20].mxu0 }
 0x122   :  { %v580_v29 = vadd.f32 %v579_v27, %v4998_v30  ;;  %v581_v32 = vpop.f32.mrb[21].mxu0 }
 0x123   :  { %v582_v34 = vadd.f32 %v581_v32, %v5002_v31  ;;  %v583_v35 = vpop.f32.mrb[22].mxu0 }
 0x124   :  { %v5082_v37 = vmax.f32 %v570_v28, %v580_v29  ;;  %v584_v38 = vadd.f32 %v583_v35, %v4998_v30  ;;  %v585_v39 = vpop.f32.mrb[23].mxu0 }
 0x125   :  { %v5086_v41 = vmax.f32 %v572_v33, %v582_v34  ;;  %v586_v42 = vadd.f32 %v585_v39, %v5002_v31 }
 0x126   :  { %v5089_v44 = vmax.f32 %v574_v36, %v584_v38 }
 0x127   :  { %v5091_v45 = vmax.f32 %v576_v40, %v586_v42  ;;  %v4149_v46 = vpack.i.bf16 %v5086_v41, %v5082_v37 }
 0x129   :  { %v589_v47 = vpop.f32.mrb[24].mxu0  ;;  %4150 = vrot.lane.b32.xlu1 %v4149_v46, %s4656_s23  ;;  %v4154_v53 = vpack.i.bf16 %v5091_v45, %v5089_v44 }
 0x12a   :  { %v591_v49 = vpop.f32.mrb[25].mxu0  ;;  %v590_v56 = vadd.f32 %v589_v47, %v4998_v30 }
 0x12b   :  { %v593_v52 = vpop.f32.mrb[26].mxu0  ;;  %v592_v59 = vadd.f32 %v591_v49, %v5002_v31 }
 0x12c   :  { %v595_v54 = vpop.f32.mrb[27].mxu0  ;;  %v594_v62 = vadd.f32 %v593_v52, %v4998_v30 }
 0x12d   :  { %4155 = vrot.lane.b32.xlu1 %v4154_v53, %s4656_s23  ;;  %v596_v2 = vadd.f32 %v595_v54, %v5002_v31  ;;  %v4444_v53 = vld [vmem:[%s6174_s3 + $0x4] ss:$8 sps:$4 sm:$0xff]  }
 0x12e   :  { %1656 = vmatprep.subr.bf16.mxu1 %v4444_v53 }
 0x131   :  { %v599_v55 = vpop.f32.mrb[28].mxu0 }
 0x132   :  { %v600_v57 = vadd.f32 %v599_v55, %v4998_v30  ;;  %v601_v58 = vpop.f32.mrb[29].mxu0 }
 0x133   :  { %v602_v60 = vadd.f32 %v601_v58, %v5002_v31  ;;  %v603_v61 = vpop.f32.mrb[30].mxu0 }
 0x134   :  { %v5104_v63 = vmax.f32 %v590_v56, %v600_v57  ;;  %v604_v0 = vadd.f32 %v603_v61, %v4998_v30  ;;  %v605_v1 = vpop.f32.mrb[31].mxu0 }
 0x135   :  { %v5108_v3 = vmax.f32 %v592_v59, %v602_v60  ;;  %v606_v4 = vadd.f32 %v605_v1, %v5002_v31 }
 0x136   :  { %v5111_v5 = vmax.f32 %v594_v62, %v604_v0 }
 0x137   :  { %v5113_v6 = vmax.f32 %v596_v2, %v606_v4  ;;  %v4159_v7 = vpack.i.bf16 %v5108_v3, %v5104_v63 }
 0x139   :  { %v609_v8 = vpop.f32.mrb[32].mxu0  ;;  %4160 = vrot.lane.b32.xlu0 %v4159_v7, %s4656_s23  ;;  %v4164_v10 = vpack.i.bf16 %v5113_v6, %v5111_v5 }
 0x13a   :  { %v611_v11 = vpop.f32.mrb[33].mxu0  ;;  %v610_v19 = vadd.f32 %v609_v8, %v4998_v30 }
 0x13b   :  { %v613_v12 = vpop.f32.mrb[34].mxu0  ;;  %4165 = vrot.lane.b32.xlu1 %v4164_v10, %s4656_s23  ;;  %v612_v22 = vadd.f32 %v611_v11, %v5002_v31 }
 0x13c   :  { %v615_v14 = vpop.f32.mrb[35].mxu0  ;;  %v614_v27 = vadd.f32 %v613_v12, %v4998_v30 }
 0x13d   :  { %v616_v33 = vadd.f32 %v615_v14, %v5002_v31 }
 0x141   :  { %v619_v15 = vpop.f32.mrb[36].mxu0 }
 0x142   :  { %v620_v20 = vadd.f32 %v619_v15, %v4998_v30  ;;  %v621_v21 = vpop.f32.mrb[37].mxu0 }
 0x143   :  { %v622_v24 = vadd.f32 %v621_v21, %v5002_v31  ;;  %v623_v26 = vpop.f32.mrb[38].mxu0 }
 0x144   :  { %v5126_v28 = vmax.f32 %v610_v19, %v620_v20  ;;  %v624_v29 = vadd.f32 %v623_v26, %v4998_v30  ;;  %v625_v32 = vpop.f32.mrb[39].mxu0 }
 0x145   :  { %v5130_v34 = vmax.f32 %v612_v22, %v622_v24  ;;  %v626_v35 = vadd.f32 %v625_v32, %v5002_v31 }
 0x146   :  { %v5133_v36 = vmax.f32 %v614_v27, %v624_v29 }
 0x147   :  { %v5135_v38 = vmax.f32 %v616_v33, %v626_v35  ;;  %v4169_v39 = vpack.i.bf16 %v5130_v34, %v5126_v28 }
 0x149   :  { %v629_v40 = vpop.f32.mrb[40].mxu0  ;;  %4170 = vrot.lane.b32.xlu0 %v4169_v39, %s4656_s23  ;;  %v4174_v42 = vpack.i.bf16 %v5135_v38, %v5133_v36 }
 0x14a   :  { %v631_v46 = vpop.f32.mrb[41].mxu0  ;;  %v630_v54 = vadd.f32 %v629_v40, %v4998_v30 }
 0x14b   :  { %v633_v47 = vpop.f32.mrb[42].mxu0  ;;  %4175 = vrot.lane.b32.xlu1 %v4174_v42, %s4656_s23  ;;  %v632_v57 = vadd.f32 %v631_v46, %v5002_v31 }
 0x14c   :  { %v635_v49 = vpop.f32.mrb[43].mxu0  ;;  %v634_v60 = vadd.f32 %v633_v47, %v4998_v30 }
 0x14d   :  { %v636_v1 = vadd.f32 %v635_v49, %v5002_v31 }
 0x151   :  { %v639_v52 = vpop.f32.mrb[44].mxu0 }
 0x152   :  { %v640_v55 = vadd.f32 %v639_v52, %v4998_v30  ;;  %v641_v56 = vpop.f32.mrb[45].mxu0 }
 0x153   :  { %v642_v58 = vadd.f32 %v641_v56, %v5002_v31  ;;  %v643_v59 = vpop.f32.mrb[46].mxu0 }
 0x154   :  { %v5151_v61 = vmax.f32 %v630_v54, %v640_v55  ;;  %v644_v62 = vadd.f32 %v643_v59, %v4998_v30  ;;  %v645_v0 = vpop.f32.mrb[47].mxu0 }
 0x155   :  { %v5155_v2 = vmax.f32 %v632_v57, %v642_v58  ;;  %v646_v4 = vadd.f32 %v645_v0, %v5002_v31 }
 0x156   :  { %v5158_v7 = vmax.f32 %v634_v60, %v644_v62 }
 0x157   :  { %v5160_v8 = vmax.f32 %v636_v1, %v646_v4  ;;  %v4179_v10 = vpack.i.bf16 %v5155_v2, %v5151_v61 }
 0x159   :  { %v649_v11 = vpop.f32.mrb[48].mxu0  ;;  %4180 = vrot.lane.b32.xlu0 %v4179_v10, %s4656_s23  ;;  %v4184_v12 = vpack.i.bf16 %v5160_v8, %v5158_v7 }
 0x15a   :  { %v651_v14 = vpop.f32.mrb[49].mxu0  ;;  %v650_v21 = vadd.f32 %v649_v11, %v4998_v30 }
 0x15b   :  { %v653_v15 = vpop.f32.mrb[50].mxu0  ;;  %4185 = vrot.lane.b32.xlu1 %v4184_v12, %s4656_s23  ;;  %v652_v26 = vadd.f32 %v651_v14, %v5002_v31 }
 0x15c   :  { %v655_v19 = vpop.f32.mrb[51].mxu0  ;;  %v654_v32 = vadd.f32 %v653_v15, %v4998_v30 }
 0x15d   :  { %v656_v40 = vadd.f32 %v655_v19, %v5002_v31 }
 0x161   :  { %v659_v20 = vpop.f32.mrb[52].mxu0 }
 0x162   :  { %v660_v22 = vadd.f32 %v659_v20, %v4998_v30  ;;  %v661_v24 = vpop.f32.mrb[53].mxu0 }
 0x163   :  { %v662_v27 = vadd.f32 %v661_v24, %v5002_v31  ;;  %v663_v29 = vpop.f32.mrb[54].mxu0 }
 0x164   :  { %v5173_v33 = vmax.f32 %v650_v21, %v660_v22  ;;  %v664_v35 = vadd.f32 %v663_v29, %v4998_v30  ;;  %v665_v39 = vpop.f32.mrb[55].mxu0 }
 0x165   :  { %v5177_v42 = vmax.f32 %v652_v26, %v662_v27  ;;  %v666_v46 = vadd.f32 %v665_v39, %v5002_v31 }
 0x166   :  { %v5180_v47 = vmax.f32 %v654_v32, %v664_v35 }
 0x167   :  { %v5182_v49 = vmax.f32 %v656_v40, %v666_v46  ;;  %v4189_v52 = vpack.i.bf16 %v5177_v42, %v5173_v33 }
 0x169   :  { %v669_v53 = vpop.f32.mrb[56].mxu0  ;;  %4190 = vrot.lane.b32.xlu0 %v4189_v52, %s4656_s23  ;;  %v4194_v54 = vpack.i.bf16 %v5182_v49, %v5180_v47 }
 0x16a   :  { %v671_v55 = vpop.f32.mrb[57].mxu0  ;;  %v670_v59 = vadd.f32 %v669_v53, %v4998_v30 }
 0x16b   :  { %v673_v56 = vpop.f32.mrb[58].mxu0  ;;  %4195 = vrot.lane.b32.xlu1 %v4194_v54, %s4656_s23  ;;  %v672_v0 = vadd.f32 %v671_v55, %v5002_v31 }
 0x16c   :  { %v675_v57 = vpop.f32.mrb[59].mxu0  ;;  %v674_v10 = vadd.f32 %v673_v56, %v4998_v30 }
 0x16d   :  { %v676_v15 = vadd.f32 %v675_v57, %v5002_v31 }
 0x171   :  { %v679_v58 = vpop.f32.mrb[60].mxu0 }
 0x172   :  { %v680_v60 = vadd.f32 %v679_v58, %v4998_v30  ;;  %v681_v62 = vpop.f32.mrb[61].mxu0 }
 0x173   :  { %v682_v1 = vadd.f32 %v681_v62, %v5002_v31  ;;  %v683_v4 = vpop.f32.mrb[62].mxu0 }
 0x174   :  { %v5195_v11 = vmax.f32 %v670_v59, %v680_v60  ;;  %v684_v12 = vadd.f32 %v683_v4, %v4998_v30  ;;  %v685_v14 = vpop.f32.mrb[63].mxu0 }
 0x175   :  { %v5199_v19 = vmax.f32 %v672_v0, %v682_v1  ;;  %v686_v20 = vadd.f32 %v685_v14, %v5002_v31 }
 0x176   :  { %v5202_v21 = vmax.f32 %v674_v10, %v684_v12 }
 0x177   :  { %v5204_v22 = vmax.f32 %v676_v15, %v686_v20  ;;  %v4199_v24 = vpack.i.bf16 %v5199_v19, %v5195_v11 }
 0x179   :  { %v689_v26 = vpop.f32.mrb[64].mxu0  ;;  %4200 = vrot.lane.b32.xlu0 %v4199_v24, %s4656_s23  ;;  %v4204_v27 = vpack.i.bf16 %v5204_v22, %v5202_v21  ;;  %v4219_v24 = vpack.i.bf16 %v5025_v48, %v5018_v43 }
 0x17a   :  { %v691_v29 = vpop.f32.mrb[65].mxu0  ;;  %v690_v40 = vadd.f32 %v689_v26, %v4998_v30 }
 0x17b   :  { %v693_v32 = vpop.f32.mrb[66].mxu0  ;;  %4205 = vrot.lane.b32.xlu1 %v4204_v27, %s4656_s23  ;;  %v692_v53 = vadd.f32 %v691_v29, %v5002_v31 }
 0x17c   :  { %v695_v35 = vpop.f32.mrb[67].mxu0  ;;  %v694_v56 = vadd.f32 %v693_v32, %v4998_v30 }
 0x17d   :  { %v696_v60 = vadd.f32 %v695_v35, %v5002_v31  ;;  %v4224_v35 = vpack.i.bf16 %v5030_v51, %v5028_v50 }
 0x181   :  { %v699_v39 = vpop.f32.mrb[68].mxu0 }
 0x182   :  { %v700_v46 = vadd.f32 %v699_v39, %v4998_v30  ;;  %v701_v52 = vpop.f32.mrb[69].mxu0 }
 0x183   :  { %v702_v54 = vadd.f32 %v701_v52, %v5002_v31  ;;  %v703_v55 = vpop.f32.mrb[70].mxu0 }
 0x184   :  { %v5217_v57 = vmax.f32 %v690_v40, %v700_v46  ;;  %v704_v58 = vadd.f32 %v703_v55, %v4998_v30  ;;  %v705_v59 = vpop.f32.mrb[71].mxu0 }
 0x185   :  { %v5221_v62 = vmax.f32 %v692_v53, %v702_v54  ;;  %v706_v0 = vadd.f32 %v705_v59, %v5002_v31 }
 0x186   :  { %v5224_v1 = vmax.f32 %v694_v56, %v704_v58 }
 0x187   :  { %v5226_v4 = vmax.f32 %v696_v60, %v706_v0  ;;  %v4209_v10 = vpack.i.bf16 %v5221_v62, %v5217_v57 }
 0x189   :  { %4210 = vrot.lane.b32.xlu0 %v4209_v10, %s4656_s23  ;;  %v4214_v12 = vpack.i.bf16 %v5226_v4, %v5224_v1  ;;  %v709_v14 = vpop.f32.mrb[72].mxu0 }
 0x18a   :  { %v711_v15 = vpop.f32.mrb[73].mxu0  ;;  %v710_v52 = vadd.f32 %v709_v14, %v4998_v30 }
 0x18b   :  { %4215 = vrot.lane.b32.xlu1 %v4214_v12, %s4656_s23  ;;  %v4141_v20 = vpop.permute.xlu0 %4140  ;;  %v713_v26 = vpop.f32.mrb[74].mxu0  ;;  %v712_v55 = vadd.f32 %v711_v15, %v5002_v31 }
 0x18c   :  { %v4143_v27 = vunpack.i.h.bf16 %v4141_v20  ;;  %v4142_v29 = vunpack.i.l.bf16 %v4141_v20  ;;  %v715_v32 = vpop.f32.mrb[75].mxu0  ;;  %v714_v59 = vadd.f32 %v713_v26, %v4998_v30 }
 0x18d   :  { %4220 = vrot.lane.b32.xlu0 %v4219_v24, %s4656_s23 }
 0x18e   :  { %v817_v39 = vsel %vm784_vm3, %v4142_v29, %v4143_v27  ;;  %v824_v46 = vmax.f32 %v5062_v13, %v4143_v27  ;;  %v716_v13 = vadd.f32 %v715_v32, %v5002_v31 }
 0x18f   :  { %v4146_v40 = vpop.permute.xlu0 %4145  ;;  %4225 = vrot.lane.b32.xlu1 %v4224_v35, %s4656_s23  ;;  %v823_v58 = vmax.f32 %v5058_v9, %v817_v39 }
 0x190   :  { %v4148_v53 = vunpack.i.h.bf16 %v4146_v40  ;;  %v4147_v54 = vunpack.i.l.bf16 %v4146_v40  ;;  %v828_v27 = vmax.f32 %v824_v46, 0.0 }
 0x191   :  { %v719_v56 = vpop.f32.mrb[76].mxu0  ;;  %v827_v39 = vmax.f32 %v823_v58, 0.0 }
 0x192   :  { %v826_v60 = vmax.f32 %v5069_v17, %v4148_v53  ;;  %v818_v0 = vsel %vm784_vm3, %v4147_v54, %v4148_v53  ;;  %v720_v10 = vadd.f32 %v719_v56, %v4998_v30  ;;  %v721_v12 = vpop.f32.mrb[77].mxu0 }
 0x193   :  { %v722_v14 = vadd.f32 %v721_v12, %v5002_v31  ;;  %v723_v20 = vpop.f32.mrb[78].mxu0  ;;  %v825_v15 = vmax.f32 %v5067_v16, %v818_v0  ;;  %v4442_v16 = vld [vmem:[%s6174_s3] ss:$8 sps:$4 sm:$0xff]   ;;  %v4450_v12 = vld [vmem:[%s6174_s3 + $0x24] ss:$8 sps:$4 sm:$0xff]  }
 0x194   :  { %v5252_v24 = vmax.f32 %v710_v52, %v720_v10  ;;  %v724_v9 = vadd.f32 %v723_v20, %v4998_v30  ;;  %v725_v26 = vpop.f32.mrb[79].mxu0  ;;  %v830_v17 = vmax.f32 %v826_v60, 0.0  ;;  %v4445_v60 = vld [vmem:[%s6174_s3 + $0x10] ss:$8 sps:$4 sm:$0xff]  }
 0x195   :  { %v5255_v29 = vmax.f32 %v712_v55, %v722_v14  ;;  %v726_v35 = vadd.f32 %v725_v26, %v5002_v31  ;;  %v829_v40 = vmax.f32 %v825_v15, 0.0  ;;  %v4447_v55 = vld [vmem:[%s6174_s3 + $0x14] ss:$8 sps:$4 sm:$0xff]  }
 0x196   :  { %v5258_v32 = vmax.f32 %v714_v59, %v724_v9  ;;  %v5260_v53 = vpack.c.bf16 %v830_v17, %v828_v27  ;;  %v4448_v9 = vld [vmem:[%s6174_s3 + $0x20] ss:$8 sps:$4 sm:$0xff]   ;;  %v4453_v27 = vld [vmem:[%s6174_s3 + $0x34] ss:$8 sps:$4 sm:$0xff]  }
 0x197   :  { %v5265_v52 = vmax.f32 %v716_v13, %v726_v35  ;;  %v5267_v54 = vpack.c.bf16 %v829_v40, %v827_v39  ;;  %v4229_v46 = vpack.i.bf16 %v5255_v29, %v5252_v24 }
 0x198   :  { %3645 = vmatprep.mubr.msk.bf16.mxu1 %vm1357_vm4, %v5260_v53 }
 0x199   :  { %1422 = vmatmul.mubr.bf16.vlgmr.msra.gmra.mrb[0].mxu1 %v5267_v54  ;;  %4230 = vrot.lane.b32.xlu0 %v4229_v46, %s4656_s23  ;;  %v4234_v56 = vpack.i.bf16 %v5265_v52, %v5258_v32  ;;  %v729_v58 = vpop.f32.mrb[80].mxu0 }
 0x19a   :  { %v731_v59 = vpop.f32.mrb[81].mxu0  ;;  %1657 = vmatpush1.bf16.msra.mxu1 %v4442_v16  ;;  %v730_v40 = vadd.f32 %v729_v58, %v4998_v30 }
 0x19b   :  { %v4151_v0 = vpop.permute.xlu1 %4150  ;;  %4235 = vrot.lane.b32.xlu1 %v4234_v56, %s4656_s23  ;;  %v733_v10 = vpop.f32.mrb[82].mxu0  ;;  %1658 = vmatprep.subr.bf16.mxu1 %v4447_v55  ;;  %v732_v46 = vadd.f32 %v731_v59, %v5002_v31 }
 0x19c   :  { %v4153_v13 = vunpack.i.h.bf16 %v4151_v0  ;;  %v4152_v14 = vunpack.i.l.bf16 %v4151_v0  ;;  %v735_v20 = vpop.f32.mrb[83].mxu0  ;;  %v734_v0 = vadd.f32 %v733_v10, %v4998_v30 }
 0x19e   :  { %v849_v15 = vsel %vm784_vm3, %v4152_v14, %v4153_v13  ;;  %1659 = vmatpush1.bf16.msra.mxu1 %v4445_v60  ;;  %v856_v17 = vmax.f32 %v5086_v41, %v4153_v13  ;;  %v4451_v41 = vld [vmem:[%s6174_s3 + $0x30] ss:$8 sps:$4 sm:$0xff]  }
 0x19f   :  { %v4156_v26 = vpop.permute.xlu1 %4155  ;;  %1660 = vmatprep.subr.bf16.mxu1 %v4450_v12  ;;  %v855_v16 = vmax.f32 %v5082_v37, %v849_v15  ;;  %v736_v37 = vadd.f32 %v735_v20, %v5002_v31 }
 0x1a0   :  { %v4158_v35 = vunpack.i.h.bf16 %v4156_v26  ;;  %v4157_v39 = vunpack.i.l.bf16 %v4156_v26  ;;  %v860_v10 = vmax.f32 %v856_v17, 0.0  ;;  %v4454_v17 = vld [vmem:[%s6174_s3 + $0x40] ss:$8 sps:$4 sm:$0xff]  }
 0x1a1   :  { %v739_v55 = vpop.f32.mrb[84].mxu0 }
 0x1a2   :  { %v858_v56 = vmax.f32 %v5091_v45, %v4158_v35  ;;  %v850_v60 = vsel %vm784_vm3, %v4157_v39, %v4158_v35  ;;  %v740_v12 = vadd.f32 %v739_v55, %v4998_v30  ;;  %v741_v14 = vpop.f32.mrb[85].mxu0  ;;  %1661 = vmatpush1.bf16.msra.mxu1 %v4448_v9  ;;  %v4456_v45 = vld [vmem:[%s6174_s3 + $0x44] ss:$8 sps:$4 sm:$0xff]   ;;  %v859_v39 = vmax.f32 %v855_v16, 0.0 }
 0x1a3   :  { %v857_v58 = vmax.f32 %v5089_v44, %v850_v60  ;;  %v742_v59 = vadd.f32 %v741_v14, %v5002_v31  ;;  %v743_v13 = vpop.f32.mrb[86].mxu0  ;;  %1662 = vmatprep.subr.bf16.mxu1 %v4453_v27 }
 0x1a4   :  { %v862_v15 = vmax.f32 %v858_v56, 0.0  ;;  %v5311_v26 = vmax.f32 %v730_v40, %v740_v12  ;;  %v744_v9 = vadd.f32 %v743_v13, %v4998_v30  ;;  %v745_v35 = vpop.f32.mrb[87].mxu0  ;;  %v4457_v12 = vld [vmem:[%s6174_s3 + $0x50] ss:$8 sps:$4 sm:$0xff]  }
 0x1a5   :  { %v861_v55 = vmax.f32 %v857_v58, 0.0  ;;  %v5314_v44 = vmax.f32 %v732_v46, %v742_v59  ;;  %v746_v20 = vadd.f32 %v745_v35, %v5002_v31  ;;  %v4459_v46 = vld [vmem:[%s6174_s3 + $0x54] ss:$8 sps:$4 sm:$0xff]  }
 0x1a6   :  { %v5317_v60 = vpack.c.bf16 %v862_v15, %v860_v10  ;;  %v5319_v27 = vmax.f32 %v734_v0, %v744_v9  ;;  %1663 = vmatpush1.bf16.msra.mxu1 %v4451_v41  ;;  %v4462_v41 = vld [vmem:[%s6174_s3 + $0x64] ss:$8 sps:$4 sm:$0xff]   ;;  %v4460_v9 = vld [vmem:[%s6174_s3 + $0x60] ss:$8 sps:$4 sm:$0xff]  }
 0x1a7   :  { %v5324_v40 = vpack.c.bf16 %v861_v55, %v859_v39  ;;  %v5326_v56 = vmax.f32 %v736_v37, %v746_v20  ;;  %v4239_v16 = vpack.i.bf16 %v5314_v44, %v5311_v26  ;;  %1664 = vmatprep.subr.bf16.mxu1 %v4456_v45  ;;  %v4465_v39 = vld [vmem:[%s6174_s3 + $0x74] ss:$8 sps:$4 sm:$0xff]  }
 0x1a8   :  { %3646 = vmatprep.mubr.msk.bf16.mxu1 %vm1357_vm4, %v5317_v60 }
 0x1a9   :  { %1432 = vmatmul.mubr.bf16.gmra.mrb[4].mxu1 %v5324_v40  ;;  %v4244_v0 = vpack.i.bf16 %v5326_v56, %v5319_v27  ;;  %4240 = vrot.lane.b32.xlu0 %v4239_v16, %s4656_s23 }
 0x1aa   :  { %1665 = vmatpush1.bf16.msra.mxu1 %v4454_v17 }
 0x1ab   :  { %v4161_v14 = vpop.permute.xlu0 %4160  ;;  %4245 = vrot.lane.b32.xlu1 %v4244_v0, %s4656_s23  ;;  %1666 = vmatprep.subr.bf16.mxu1 %v4459_v46  ;;  %v4463_v46 = vld [vmem:[%s6174_s3 + $0x70] ss:$8 sps:$4 sm:$0xff]  }
 0x1ac   :  { %v4163_v58 = vunpack.i.h.bf16 %v4161_v14  ;;  %v4162_v37 = vunpack.i.l.bf16 %v4161_v14 }
 0x1ad   :  { %v4166_v59 = vpop.permute.xlu1 %4165 }
 0x1ae   :  { %v888_v13 = vmax.f32 %v5108_v3, %v4163_v58  ;;  %v881_v45 = vsel %vm784_vm3, %v4162_v37, %v4163_v58  ;;  %v4168_v10 = vunpack.i.h.bf16 %v4166_v59  ;;  %v4167_v15 = vunpack.i.l.bf16 %v4166_v59  ;;  %1667 = vmatpush1.bf16.msra.mxu1 %v4457_v12  ;;  %v4468_v12 = vld [vmem:[%s6174_s3 + $0x84] ss:$8 sps:$4 sm:$0xff]   ;;  %v4469_v58 = vld [vmem:[%s6174_s3 + $0x90] ss:$8 sps:$4 sm:$0xff]  }
 0x1af   :  { %v887_v35 = vmax.f32 %v5104_v63, %v881_v45  ;;  %1668 = vmatprep.subr.bf16.mxu1 %v4462_v41  ;;  %v4471_v41 = vld [vmem:[%s6174_s3 + $0x94] ss:$8 sps:$4 sm:$0xff]   ;;  %v4474_v59 = vld [vmem:[%s6174_s3 + $0xa4] ss:$8 sps:$4 sm:$0xff]  }
 0x1b0   :  { %v890_v55 = vmax.f32 %v5113_v6, %v4168_v10  ;;  %v882_v3 = vsel %vm784_vm3, %v4167_v15, %v4168_v10  ;;  %v892_v17 = vmax.f32 %v888_v13, 0.0 }
 0x1b1   :  { %v889_v20 = vmax.f32 %v5111_v5, %v882_v3  ;;  %v891_v0 = vmax.f32 %v887_v35, 0.0  ;;  %v4466_v5 = vld [vmem:[%s6174_s3 + $0x80] ss:$8 sps:$4 sm:$0xff]  }
 0x1b2   :  { %v894_v16 = vmax.f32 %v890_v55, 0.0  ;;  %1669 = vmatpush1.bf16.msra.mxu1 %v4460_v9  ;;  %v4472_v55 = vld [vmem:[%s6174_s3 + $0xa0] ss:$8 sps:$4 sm:$0xff]  }
 0x1b3   :  { %v893_v63 = vmax.f32 %v889_v20, 0.0  ;;  %1670 = vmatprep.subr.bf16.mxu1 %v4465_v39  ;;  %v4477_v20 = vld [vmem:[%s6174_s3 + $0xb4] ss:$8 sps:$4 sm:$0xff]  }
 0x1b4   :  { %v5364_v14 = vpack.c.bf16 %v894_v16, %v892_v17 }
 0x1b5   :  { %v5366_v6 = vpack.c.bf16 %v893_v63, %v891_v0 }
 0x1b6   :  { %3647 = vmatprep.mubr.msk.bf16.mxu1 %vm1357_vm4, %v5364_v14  ;;  %1671 = vmatpush1.bf16.msra.mxu1 %v4463_v46  ;;  %v749_v46 = vpop.f32.mrb[88].mxu0 }
 0x1b7   :  { %1442 = vmatmul.mubr.bf16.gmra.mrb[8].mxu1 %v5366_v6  ;;  %1672 = vmatprep.subr.bf16.mxu1 %v4468_v12  ;;  %v4475_v12 = vld [vmem:[%s6174_s3 + $0xb0] ss:$8 sps:$4 sm:$0xff]  }
 0x1ba   :  { %1673 = vmatpush1.bf16.msra.mxu1 %v4466_v5 }
 0x1bb   :  { %v4171_v37 = vpop.permute.xlu0 %4170  ;;  %1674 = vmatprep.subr.bf16.mxu1 %v4471_v41 }
 0x1bc   :  { %v4173_v13 = vunpack.i.h.bf16 %v4171_v37  ;;  %v4172_v45 = vunpack.i.l.bf16 %v4171_v37 }
 0x1bd   :  { %v4176_v10 = vpop.permute.xlu1 %4175 }
 0x1be   :  { %v920_v15 = vmax.f32 %v5130_v34, %v4173_v13  ;;  %v913_v9 = vsel %vm784_vm3, %v4172_v45, %v4173_v13  ;;  %v4178_v35 = vunpack.i.h.bf16 %v4176_v10  ;;  %v4177_v39 = vunpack.i.l.bf16 %v4176_v10  ;;  %1675 = vmatpush1.bf16.msra.mxu1 %v4469_v58  ;;  %v4483_v13 = vld [vmem:[%s6174_s3 + $0xd4] ss:$8 sps:$4 sm:$0xff]   ;;  %v1181_v45 = vld [vmem:[%s6174_s3 + $0xe0] sm:$0x77] }
 0x1bf   :  { %v919_v3 = vmax.f32 %v5126_v28, %v913_v9  ;;  %1676 = vmatprep.subr.bf16.mxu1 %v4474_v59  ;;  %v751_v28 = vpop.f32.mrb[89].mxu0  ;;  %v4478_v59 = vld [vmem:[%s6174_s3 + $0xc0] ss:$8 sps:$4 sm:$0xff]  }
 0x1c0   :  { %v922_v17 = vmax.f32 %v5135_v38, %v4178_v35  ;;  %v914_v34 = vsel %vm784_vm3, %v4177_v39, %v4178_v35  ;;  %v924_v0 = vmax.f32 %v920_v15, 0.0  ;;  %v4480_v38 = vld [vmem:[%s6174_s3 + $0xc4] ss:$8 sps:$4 sm:$0xff]   ;;  %v753_v58 = vpop.f32.mrb[90].mxu0  ;;  %v750_v15 = vadd.f32 %v749_v46, %v4998_v30  ;;  %v4481_v39 = vld [vmem:[%s6174_s3 + $0xd0] ss:$8 sps:$4 sm:$0xff]  }
 0x1c1   :  { %v921_v16 = vmax.f32 %v5133_v36, %v914_v34  ;;  %v923_v5 = vmax.f32 %v919_v3, 0.0  ;;  %v755_v10 = vpop.f32.mrb[91].mxu0  ;;  %v752_v9 = vadd.f32 %v751_v28, %v5002_v31  ;;  %v3681_v34 = vcombine.low %v1181_v45, %v1181_v45 }
 0x1c2   :  { %v926_v63 = vmax.f32 %v922_v17, 0.0  ;;  %1677 = vmatpush1.bf16.msra.mxu1 %v4472_v55  ;;  %v759_v35 = vpop.f32.mrb[92].mxu0  ;;  %v3682_v55 = vcombine.high %v1181_v45, %v1181_v45 }
 0x1c3   :  { %v925_v41 = vmax.f32 %v921_v16, 0.0  ;;  %1678 = vmatprep.subr.bf16.mxu1 %v4477_v20  ;;  %v760_v3 = vadd.f32 %v759_v35, %v4998_v30  ;;  %v761_v20 = vpop.f32.mrb[93].mxu0  ;;  %v754_v16 = vadd.f32 %v753_v58, %v4998_v30 }
 0x1c4   :  { %v5401_v37 = vpack.c.bf16 %v926_v63, %v924_v0  ;;  %v756_v0 = vadd.f32 %v755_v10, %v5002_v31  ;;  %v762_v46 = vadd.f32 %v761_v20, %v5002_v31  ;;  %v763_v63 = vpop.f32.mrb[94].mxu0 }
 0x1c5   :  { %v5403_v36 = vpack.c.bf16 %v925_v41, %v923_v5  ;;  %v5426_v5 = vmax.f32 %v750_v15, %v760_v3  ;;  %v764_v41 = vadd.f32 %v763_v63, %v4998_v30  ;;  %v1651_v15 = vsel %vm1382_vm2, %v3681_v34, 0  ;;  %v4488_v30 = vld [vmem:[%s6174_s3 + $0x1d4] ss:$8 sps:$4 sm:$0xff]  }
 0x1c6   :  { %3648 = vmatprep.mubr.msk.bf16.mxu1 %vm1357_vm4, %v5401_v37  ;;  %1679 = vmatpush1.bf16.msra.mxu1 %v4475_v12  ;;  %v5429_v35 = vmax.f32 %v752_v9, %v762_v46 }
 0x1c7   :  { %1452 = vmatmul.mubr.bf16.gmra.mrb[12].mxu1 %v5403_v36  ;;  %1680 = vmatprep.subr.bf16.mxu1 %v4480_v38  ;;  %v765_v38 = vpop.f32.mrb[95].mxu0  ;;  %v5440_v9 = vmax.f32 %v754_v16, %v764_v41 }
 0x1ca   :  { %1681 = vmatpush1.bf16.msra.mxu1 %v4478_v59 }
 0x1cb   :  { %v4181_v17 = vpop.permute.xlu0 %4180  ;;  %1682 = vmatprep.subr.bf16.mxu1 %v4483_v13  ;;  %v766_v13 = vadd.f32 %v765_v38, %v5002_v31 }
 0x1cc   :  { %v4183_v12 = vunpack.i.h.bf16 %v4181_v17  ;;  %v4182_v28 = vunpack.i.l.bf16 %v4181_v17 }
 0x1cd   :  { %v4186_v59 = vpop.permute.xlu1 %4185  ;;  %v5442_v31 = vmax.f32 %v756_v0, %v766_v13 }
 0x1ce   :  { %v952_v45 = vmax.f32 %v5155_v2, %v4183_v12  ;;  %v945_v58 = vsel %vm784_vm3, %v4182_v28, %v4183_v12  ;;  %v4188_v10 = vunpack.i.h.bf16 %v4186_v59  ;;  %v4187_v25 = vunpack.i.l.bf16 %v4186_v59  ;;  %1683 = vmatpush1.bf16.msra.mxu1 %v4481_v39 }
 0x1cf   :  { %v951_v20 = vmax.f32 %v5151_v61, %v945_v58  ;;  %3683 = vmatprep.subr.msk.bf16.mxu1 %vm1382_vm2, %v3682_v55  ;;  %v4249_v39 = vpack.i.bf16 %v5429_v35, %v5426_v5  ;;  %v4254_v55 = vpack.i.bf16 %v5442_v31, %v5440_v9 }
 0x1d0   :  { %v954_v2 = vmax.f32 %v5160_v8, %v4188_v10  ;;  %v946_v3 = vsel %vm784_vm3, %v4187_v25, %v4188_v10  ;;  %v956_v17 = vmax.f32 %v952_v45, 0.0 }
 0x1d1   :  { %v953_v61 = vmax.f32 %v5158_v7, %v946_v3  ;;  %4250 = vrot.lane.b32.xlu0 %v4249_v39, %s4656_s23  ;;  %v955_v16 = vmax.f32 %v951_v20, 0.0  ;;  %4255 = vrot.lane.b32.xlu1 %v4254_v55, %s4656_s23 }
 0x1d2   :  { %v958_v34 = vmax.f32 %v954_v2, 0.0  ;;  %1685 = vmatpush1.bf16.msra.mxu1 %v1651_v15 }
 0x1d3   :  { %v957_v0 = vmax.f32 %v953_v61, 0.0  ;;  %1953 = vmatprep.subr.bf16.mxu1 %v4488_v30 }
 0x1d4   :  { %v5453_v8 = vpack.c.bf16 %v958_v34, %v956_v17 }
 0x1d5   :  { %v5455_v25 = vpack.c.bf16 %v957_v0, %v955_v16 }
 0x1d6   :  { %3649 = vmatprep.mubr.msk.bf16.mxu1 %vm1357_vm4, %v5453_v8 }
 0x1d7   :  { %1462 = vmatmul.mubr.bf16.gmra.mrb[16].mxu1 %v5455_v25 }
 0x1db   :  { %v4191_v7 = vpop.permute.xlu0 %4190 }
 0x1dc   :  { %v4193_v46 = vunpack.i.h.bf16 %v4191_v7  ;;  %v4192_v63 = vunpack.i.l.bf16 %v4191_v7 }
 0x1dd   :  { %v4196_v12 = vpop.permute.xlu1 %4195 }
 0x1de   :  { %v984_v28 = vmax.f32 %v5177_v42, %v4193_v46  ;;  %v977_v41 = vsel %vm784_vm3, %v4192_v63, %v4193_v46  ;;  %v4198_v38 = vunpack.i.h.bf16 %v4196_v12  ;;  %v4197_v59 = vunpack.i.l.bf16 %v4196_v12 }
 0x1df   :  { %v983_v13 = vmax.f32 %v5173_v33, %v977_v41 }
 0x1e0   :  { %v986_v45 = vmax.f32 %v5182_v49, %v4198_v38  ;;  %v978_v58 = vsel %vm784_vm3, %v4197_v59, %v4198_v38  ;;  %v988_v20 = vmax.f32 %v984_v28, 0.0 }
 0x1e1   :  { %v985_v10 = vmax.f32 %v5180_v47, %v978_v58  ;;  %v987_v30 = vmax.f32 %v983_v13, 0.0 }
 0x1e2   :  { %v990_v15 = vmax.f32 %v986_v45, 0.0 }
 0x1e3   :  { %v989_v2 = vmax.f32 %v985_v10, 0.0 }
 0x1e4   :  { %v5466_v3 = vpack.c.bf16 %v990_v15, %v988_v20 }
 0x1e5   :  { %v5468_v39 = vpack.c.bf16 %v989_v2, %v987_v30 }
 0x1e6   :  { %3650 = vmatprep.mubr.msk.bf16.mxu1 %vm1357_vm4, %v5466_v3 }
 0x1e7   :  { %1472 = vmatmul.mubr.bf16.gmra.mrb[20].mxu1 %v5468_v39 }
 0x1eb   :  { %v4201_v33 = vpop.permute.xlu0 %4200 }
 0x1ec   :  { %v4203_v42 = vunpack.i.h.bf16 %v4201_v33  ;;  %v4202_v49 = vunpack.i.l.bf16 %v4201_v33 }
 0x1ed   :  { %v4206_v61 = vpop.permute.xlu1 %4205 }
 0x1ee   :  { %v1016_v55 = vmax.f32 %v5199_v19, %v4203_v42  ;;  %v1009_v47 = vsel %vm784_vm3, %v4202_v49, %v4203_v42  ;;  %v4208_v17 = vunpack.i.h.bf16 %v4206_v61  ;;  %v4207_v34 = vunpack.i.l.bf16 %v4206_v61 }
 0x1ef   :  { %v1015_v16 = vmax.f32 %v5195_v11, %v1009_v47 }
 0x1f0   :  { %v1018_v0 = vmax.f32 %v5204_v22, %v4208_v17  ;;  %v1010_v7 = vsel %vm784_vm3, %v4207_v34, %v4208_v17  ;;  %v1020_v63 = vmax.f32 %v1016_v55, 0.0 }
 0x1f1   :  { %v1017_v46 = vmax.f32 %v5202_v21, %v1010_v7  ;;  %v1019_v28 = vmax.f32 %v1015_v16, 0.0 }
 0x1f2   :  { %v1022_v12 = vmax.f32 %v1018_v0, 0.0 }
 0x1f3   :  { %v1021_v41 = vmax.f32 %v1017_v46, 0.0 }
 0x1f4   :  { %v5479_v38 = vpack.c.bf16 %v1022_v12, %v1020_v63 }
 0x1f5   :  { %v5481_v59 = vpack.c.bf16 %v1021_v41, %v1019_v28 }
 0x1f6   :  { %3651 = vmatprep.mubr.msk.bf16.mxu1 %vm1357_vm4, %v5479_v38 }
 0x1f7   :  { %1482 = vmatmul.mubr.bf16.gmra.mrb[24].mxu1 %v5481_v59 }
 0x1fb   :  { %v4211_v11 = vpop.permute.xlu0 %4210 }
 0x1fc   :  { %v4213_v19 = vunpack.i.h.bf16 %v4211_v11  ;;  %v4212_v22 = vunpack.i.l.bf16 %v4211_v11 }
 0x1fd   :  { %v4216_v13 = vpop.permute.xlu1 %4215 }
 0x1fe   :  { %v1048_v45 = vmax.f32 %v5221_v62, %v4213_v19  ;;  %v1041_v21 = vsel %vm784_vm3, %v4212_v22, %v4213_v19  ;;  %v4218_v58 = vunpack.i.h.bf16 %v4216_v13  ;;  %v4217_v10 = vunpack.i.l.bf16 %v4216_v13  ;;  %v4486_v19 = vld [vmem:[%s6174_s3 + $0x1d0] ss:$8 sps:$4 sm:$0xff]   ;;  %v4494_v13 = vld [vmem:[%s6174_s3 + $0x1f4] ss:$8 sps:$4 sm:$0xff]  }
 0x1ff   :  { %v1047_v20 = vmax.f32 %v5217_v57, %v1041_v21  ;;  %v4221_v15 = vpop.permute.xlu0 %4220  ;;  %v4497_v21 = vld [vmem:[%s6174_s3 + $0x204] ss:$8 sps:$4 sm:$0xff]  }
 0x200   :  { %v1050_v30 = vmax.f32 %v5226_v4, %v4218_v58  ;;  %v1042_v2 = vsel %vm784_vm3, %v4217_v10, %v4218_v58  ;;  %v4223_v33 = vunpack.i.h.bf16 %v4221_v15  ;;  %v1052_v42 = vmax.f32 %v1048_v45, 0.0  ;;  %v4492_v45 = vld [vmem:[%s6174_s3 + $0x1f0] ss:$8 sps:$4 sm:$0xff]   ;;  %v4500_v58 = vld [vmem:[%s6174_s3 + $0x214] ss:$8 sps:$4 sm:$0xff]  }
 0x201   :  { %v1049_v49 = vmax.f32 %v5224_v1, %v1042_v2  ;;  %v4222_v61 = vunpack.i.l.bf16 %v4221_v15  ;;  %v4226_v55 = vpop.permute.xlu1 %4225  ;;  %v1051_v16 = vmax.f32 %v1047_v20, 0.0  ;;  %v4498_v10 = vld [vmem:[%s6174_s3 + $0x210] ss:$8 sps:$4 sm:$0xff]   ;;  %v4501_v20 = vld [vmem:[%s6174_s3 + $0x220] ss:$8 sps:$4 sm:$0xff]  }
 0x202   :  { %v1054_v47 = vmax.f32 %v1050_v30, 0.0  ;;  %v792_v62 = vmax.f32 %v5025_v48, %v4223_v33  ;;  %v4228_v17 = vunpack.i.h.bf16 %v4226_v55  ;;  %v4227_v34 = vunpack.i.l.bf16 %v4226_v55  ;;  %v4506_v15 = vld [vmem:[%s6174_s3 + $0x234] ss:$8 sps:$4 sm:$0xff]   ;;  %v4504_v30 = vld [vmem:[%s6174_s3 + $0x230] ss:$8 sps:$4 sm:$0xff]  }
 0x203   :  { %v1053_v0 = vmax.f32 %v1049_v49, 0.0  ;;  %v785_v57 = vsel %vm784_vm3, %v4222_v61, %v4223_v33  ;;  %v4509_v2 = vld [vmem:[%s6174_s3 + $0x244] ss:$8 sps:$4 sm:$0xff]   ;;  %v4507_v33 = vld [vmem:[%s6174_s3 + $0x240] ss:$8 sps:$4 sm:$0xff]  }
 0x204   :  { %v5493_v7 = vpack.c.bf16 %v1054_v47, %v1052_v42  ;;  %v794_v4 = vmax.f32 %v5030_v51, %v4228_v17  ;;  %v786_v46 = vsel %vm784_vm3, %v4227_v34, %v4228_v17  ;;  %v796_v1 = vmax.f32 %v792_v62, 0.0  ;;  %v4512_v42 = vld [vmem:[%s6174_s3 + $0x254] ss:$8 sps:$4 sm:$0xff]   ;;  %v4510_v49 = vld [vmem:[%s6174_s3 + $0x250] ss:$8 sps:$4 sm:$0xff]  }
 0x205   :  { %v5498_v63 = vpack.c.bf16 %v1053_v0, %v1051_v16  ;;  %v793_v28 = vmax.f32 %v5028_v50, %v786_v46  ;;  %v791_v48 = vmax.f32 %v5018_v43, %v785_v57  ;;  %v4491_v50 = vld [vmem:[%s6174_s3 + $0x1e4] ss:$8 sps:$4 sm:$0xff]   ;;  %v4489_v43 = vld [vmem:[%s6174_s3 + $0x1e0] ss:$8 sps:$4 sm:$0xff]   ;;  %v4518_v47 = vld [vmem:[%s6174_s3 + $0x274] ss:$8 sps:$4 sm:$0xff]  }
 0x206   :  { %v798_v12 = vmax.f32 %v794_v4, 0.0  ;;  %3652 = vmatprep.mubr.msk.bf16.mxu1 %vm1357_vm4, %v5493_v7  ;;  %v4515_v61 = vld [vmem:[%s6174_s3 + $0x264] ss:$8 sps:$4 sm:$0xff]   ;;  %v4513_v55 = vld [vmem:[%s6174_s3 + $0x260] ss:$8 sps:$4 sm:$0xff]  }
 0x207   :  { %1492 = vmatmul.mubr.bf16.gmra.mrb[28].mxu1 %v5498_v63  ;;  %v797_v11 = vmax.f32 %v793_v28, 0.0  ;;  %v795_v51 = vmax.f32 %v791_v48, 0.0  ;;  %v4516_v62 = vld [vmem:[%s6174_s3 + $0x270] ss:$8 sps:$4 sm:$0xff]   ;;  %v4521_v17 = vld [vmem:[%s6174_s3 + $0x284] ss:$8 sps:$4 sm:$0xff]  }
 0x208   :  { %v800_v41 = vpack.c.bf16 %v798_v12, %v796_v1  ;;  %v4519_v34 = vld [vmem:[%s6174_s3 + $0x280] ss:$8 sps:$4 sm:$0xff]   ;;  %v4524_v16 = vld [vmem:[%s6174_s3 + $0x294] ss:$8 sps:$4 sm:$0xff]   ;;  %v4522_v0 = vld [vmem:[%s6174_s3 + $0x290] ss:$8 sps:$4 sm:$0xff]  }
 0x209   :  { %v799_v22 = vpack.c.bf16 %v797_v11, %v795_v51  ;;  %v4527_v57 = vld [vmem:[%s6174_s3 + $0x2a4] ss:$8 sps:$4 sm:$0xff]   ;;  %v3720_v4 = vld [vmem:[%s6174_s3 + $0x2b0] sm:$0x77]  ;;  %v4525_v46 = vld [vmem:[%s6174_s3 + $0x2a0] ss:$8 sps:$4 sm:$0xff]  }
 0x20a   :  { %3684 = vmatprep.mubr.msk.bf16.mxu1 %vm1357_vm4, %v800_v41  ;;  %v3750_v1 = vcombine.high %v3720_v4, %v3720_v4  ;;  %v3749_v12 = vcombine.low %v3720_v4, %v3720_v4  ;;  %v4532_v48 = vld [vmem:[%s6174_s3 + $0x2bc] ss:$8 sps:$4 sm:$0xff]   ;;  %v4530_v41 = vld [vmem:[%s6174_s3 + $0x2b8] ss:$8 sps:$4 sm:$0xff]   ;;  %v4535_v11 = vld [vmem:[%s6174_s3 + $0x2cc] ss:$8 sps:$4 sm:$0xff]  }
 0x20b   :  { %v4538_v51 = vld [vmem:[%s6174_s3 + $0x2dc] ss:$8 sps:$4 sm:$0xff]  }
 0x20c   :  { %v1948_v28 = vsel %vm1382_vm2, %v3749_v12, 0  ;;  %v4571_v12 = vld [vmem:[%s6174_s3 + $0x38c] ss:$8 sps:$4 sm:$0xff]  }
 0x20f   :  { %1689 = vmatmul.mubr.bf16.vlgmr.msra.gmra.mrb[0].mxu1 %v799_v22  ;;  %v4539_v22 = vld [vmem:[%s6174_s3 + $0x2e8] ss:$8 sps:$4 sm:$0xff]  }
 0x210   :  { %1954 = vmatpush1.bf16.msra.mxu1 %v4486_v19  ;;  %3685 = vmatprep.mubr.msk.bf16.mxu1 %vm1357_vm4, %v5260_v53  ;;  %v4495_v53 = vld [vmem:[%s6174_s3 + $0x200] ss:$8 sps:$4 sm:$0xff]  }
 0x211   :  { %1955 = vmatprep.subr.bf16.mxu1 %v4491_v50  ;;  %v4536_v19 = vld [vmem:[%s6174_s3 + $0x2d8] ss:$8 sps:$4 sm:$0xff]   ;;  %v4544_v50 = vld [vmem:[%s6174_s3 + $0x2fc] ss:$8 sps:$4 sm:$0xff]  }
 0x214   :  { %1956 = vmatpush1.bf16.msra.mxu1 %v4489_v43  ;;  %v4542_v43 = vld [vmem:[%s6174_s3 + $0x2f8] ss:$8 sps:$4 sm:$0xff]  }
 0x215   :  { %1957 = vmatprep.subr.bf16.mxu1 %v4494_v13  ;;  %v4547_v13 = vld [vmem:[%s6174_s3 + $0x30c] ss:$8 sps:$4 sm:$0xff]  }
 0x217   :  { %1699 = vmatmul.mubr.bf16.gmra.mrb[4].mxu1 %v5267_v54  ;;  %v4503_v54 = vld [vmem:[%s6174_s3 + $0x224] ss:$8 sps:$4 sm:$0xff]  }
 0x218   :  { %3686 = vmatprep.mubr.msk.bf16.mxu1 %vm1357_vm4, %v5317_v60  ;;  %1958 = vmatpush1.bf16.msra.mxu1 %v4492_v45  ;;  %v4545_v45 = vld [vmem:[%s6174_s3 + $0x308] ss:$8 sps:$4 sm:$0xff]  }
 0x219   :  { %1959 = vmatprep.subr.bf16.mxu1 %v4497_v21  ;;  %v4550_v21 = vld [vmem:[%s6174_s3 + $0x31c] ss:$8 sps:$4 sm:$0xff]  }
 0x21c   :  { %1960 = vmatpush1.bf16.msra.mxu1 %v4495_v53  ;;  %v4548_v53 = vld [vmem:[%s6174_s3 + $0x318] ss:$8 sps:$4 sm:$0xff]  }
 0x21d   :  { %1961 = vmatprep.subr.bf16.mxu1 %v4500_v58  ;;  %v4553_v58 = vld [vmem:[%s6174_s3 + $0x32c] ss:$8 sps:$4 sm:$0xff]  }
 0x21f   :  { %1709 = vmatmul.mubr.bf16.gmra.mrb[8].mxu1 %v5324_v40 }
 0x220   :  { %3687 = vmatprep.mubr.msk.bf16.mxu1 %vm1357_vm4, %v5364_v14  ;;  %1962 = vmatpush1.bf16.msra.mxu1 %v4498_v10  ;;  %v4551_v10 = vld [vmem:[%s6174_s3 + $0x328] ss:$8 sps:$4 sm:$0xff]  }
 0x221   :  { %1963 = vmatprep.subr.bf16.mxu1 %v4503_v54  ;;  %v4556_v54 = vld [vmem:[%s6174_s3 + $0x33c] ss:$8 sps:$4 sm:$0xff]  }
 0x224   :  { %1964 = vmatpush1.bf16.msra.mxu1 %v4501_v20  ;;  %v4554_v20 = vld [vmem:[%s6174_s3 + $0x338] ss:$8 sps:$4 sm:$0xff]  }
 0x225   :  { %1965 = vmatprep.subr.bf16.mxu1 %v4506_v15  ;;  %v4559_v15 = vld [vmem:[%s6174_s3 + $0x34c] ss:$8 sps:$4 sm:$0xff]  }
 0x227   :  { %1719 = vmatmul.mubr.bf16.gmra.mrb[12].mxu1 %v5366_v6 }
 0x228   :  { %3688 = vmatprep.mubr.msk.bf16.mxu1 %vm1357_vm4, %v5401_v37  ;;  %1966 = vmatpush1.bf16.msra.mxu1 %v4504_v30  ;;  %v4236_v30 = vpop.permute.xlu1 %4235 }
 0x229   :  { %1967 = vmatprep.subr.bf16.mxu1 %v4509_v2  ;;  %v4557_v2 = vld [vmem:[%s6174_s3 + $0x348] ss:$8 sps:$4 sm:$0xff]  }
 0x22c   :  { %1968 = vmatpush1.bf16.msra.mxu1 %v4507_v33  ;;  %v4231_v33 = vpop.permute.xlu0 %4230 }
 0x22d   :  { %1969 = vmatprep.subr.bf16.mxu1 %v4512_v42  ;;  %v4562_v42 = vld [vmem:[%s6174_s3 + $0x35c] ss:$8 sps:$4 sm:$0xff]  }
 0x22f   :  { %1729 = vmatmul.mubr.bf16.gmra.mrb[16].mxu1 %v5403_v36 }
 0x230   :  { %3689 = vmatprep.mubr.msk.bf16.mxu1 %vm1357_vm4, %v5453_v8  ;;  %1970 = vmatpush1.bf16.msra.mxu1 %v4510_v49  ;;  %v4238_v49 = vunpack.i.h.bf16 %v4236_v30 }
 0x231   :  { %1971 = vmatprep.subr.bf16.mxu1 %v4515_v61  ;;  %v4233_v61 = vunpack.i.h.bf16 %v4231_v33 }
 0x234   :  { %1972 = vmatpush1.bf16.msra.mxu1 %v4513_v55  ;;  %v4560_v55 = vld [vmem:[%s6174_s3 + $0x358] ss:$8 sps:$4 sm:$0xff]  }
 0x235   :  { %1973 = vmatprep.subr.bf16.mxu1 %v4518_v47  ;;  %v4565_v47 = vld [vmem:[%s6174_s3 + $0x36c] ss:$8 sps:$4 sm:$0xff]  }
 0x237   :  { %1739 = vmatmul.mubr.bf16.gmra.mrb[20].mxu1 %v5455_v25 }
 0x238   :  { %3690 = vmatprep.mubr.msk.bf16.mxu1 %vm1357_vm4, %v5466_v3  ;;  %1974 = vmatpush1.bf16.msra.mxu1 %v4516_v62  ;;  %v1082_v62 = vmax.f32 %v5265_v52, %v4238_v49 }
 0x239   :  { %1975 = vmatprep.subr.bf16.mxu1 %v4521_v17  ;;  %v4237_v17 = vunpack.i.l.bf16 %v4236_v30  ;;  %v4591_v30 = vld [vmem:[%s6174_s3 + $0x3f4] ss:$8 sps:$4 sm:$0xff]  }
 0x23a   :  { %v1086_v52 = vmax.f32 %v1082_v62, 0.0  ;;  %v4603_v62 = vld [vmem:[%s6174_s3 + $0x434] ss:$8 sps:$4 sm:$0xff]  }
 0x23b   :  { %v1074_v4 = vsel %vm784_vm3, %v4237_v17, %v4238_v49  ;;  %v4597_v49 = vld [vmem:[%s6174_s3 + $0x414] ss:$8 sps:$4 sm:$0xff]   ;;  %v4246_v17 = vpop.permute.xlu1 %4245 }
 0x23c   :  { %1976 = vmatpush1.bf16.msra.mxu1 %v4519_v34  ;;  %v1080_v34 = vmax.f32 %v5255_v29, %v4233_v61 }
 0x23d   :  { %1977 = vmatprep.subr.bf16.mxu1 %v4524_v16  ;;  %v4232_v16 = vunpack.i.l.bf16 %v4231_v33  ;;  %v4594_v33 = vld [vmem:[%s6174_s3 + $0x404] ss:$8 sps:$4 sm:$0xff]  }
 0x23f   :  { %1749 = vmatmul.mubr.bf16.gmra.mrb[24].mxu1 %v5468_v39  ;;  %v1073_v29 = vsel %vm784_vm3, %v4232_v16, %v4233_v61  ;;  %v4595_v61 = vld [vmem:[%s6174_s3 + $0x410] ss:$8 sps:$4 sm:$0xff]  }
 0x240   :  { %3691 = vmatprep.mubr.msk.bf16.mxu1 %vm1357_vm4, %v5479_v38  ;;  %1978 = vmatpush1.bf16.msra.mxu1 %v4522_v0  ;;  %v4563_v0 = vld [vmem:[%s6174_s3 + $0x368] ss:$8 sps:$4 sm:$0xff]  }
 0x241   :  { %1979 = vmatprep.subr.bf16.mxu1 %v4527_v57  ;;  %v4568_v57 = vld [vmem:[%s6174_s3 + $0x37c] ss:$8 sps:$4 sm:$0xff]   ;;  %v4601_v16 = vld [vmem:[%s6174_s3 + $0x430] ss:$8 sps:$4 sm:$0xff]  }
 0x244   :  { %1980 = vmatpush1.bf16.msra.mxu1 %v4525_v46  ;;  %v1084_v46 = vmax.f32 %v1080_v34, 0.0  ;;  %v4241_v34 = vpop.permute.xlu0 %4240 }
 0x245   :  { %3751 = vmatprep.subr.msk.bf16.mxu1 %vm1382_vm2, %v3750_v1  ;;  %v4566_v1 = vld [vmem:[%s6174_s3 + $0x378] ss:$8 sps:$4 sm:$0xff]  }
 0x247   :  { %1759 = vmatmul.mubr.bf16.gmra.mrb[28].mxu1 %v5481_v59 }
 0x248   :  { %3752 = vmatprep.mubr.msk.bf16.mxu1 %vm1357_vm4, %v5317_v60  ;;  %1982 = vmatpush1.bf16.msra.mxu1 %v1948_v28  ;;  %v4533_v60 = vld [vmem:[%s6174_s3 + $0x2c8] ss:$8 sps:$4 sm:$0xff]   ;;  %v1081_v28 = vmax.f32 %v5258_v32, %v1074_v4 }
 0x249   :  { %2282 = vmatprep.subr.bf16.mxu1 %v4532_v48  ;;  %v5719_v48 = vpack.c.bf16 %v1086_v52, %v1084_v46  ;;  %v4243_v52 = vunpack.i.h.bf16 %v4241_v34  ;;  %v4604_v4 = vld [vmem:[%s6174_s3 + $0x440] ss:$8 sps:$4 sm:$0xff]   ;;  %v4609_v46 = vld [vmem:[%s6174_s3 + $0x454] ss:$8 sps:$4 sm:$0xff]  }
 0x24a   :  { %v1085_v32 = vmax.f32 %v1081_v28, 0.0  ;;  %v4242_v28 = vunpack.i.l.bf16 %v4241_v34 }
 0x24f   :  { %1986 = vmatmul.mubr.bf16.vlgmr.msra.gmra.mrb[0].mxu1 %v5324_v40  ;;  %v4541_v40 = vld [vmem:[%s6174_s3 + $0x2ec] ss:$8 sps:$4 sm:$0xff]  }
 0x250   :  { %2283 = vmatpush1.bf16.msra.mxu1 %v4530_v41  ;;  %3753 = vmatprep.mubr.msk.bf16.mxu1 %vm1357_vm4, %v5364_v14  ;;  %v3788_v41 = vld [vmem:[%s6174_s3 + $0x398] sm:$0x77] }
 0x251   :  { %2284 = vmatprep.subr.bf16.mxu1 %v4535_v11  ;;  %v1079_v11 = vmax.f32 %v5252_v24, %v1073_v29 }
 0x254   :  { %2285 = vmatpush1.bf16.msra.mxu1 %v4533_v60  ;;  %v4569_v60 = vld [vmem:[%s6174_s3 + $0x388] ss:$8 sps:$4 sm:$0xff]  }
 0x255   :  { %2286 = vmatprep.subr.bf16.mxu1 %v4538_v51  ;;  %v3818_v51 = vcombine.high %v3788_v41, %v3788_v41 }
 0x257   :  { %1996 = vmatmul.mubr.bf16.gmra.mrb[4].mxu1 %v5366_v6 }
 0x258   :  { %3754 = vmatprep.mubr.msk.bf16.mxu1 %vm1357_vm4, %v5401_v37  ;;  %2287 = vmatpush1.bf16.msra.mxu1 %v4536_v19  ;;  %v3817_v19 = vcombine.low %v3788_v41, %v3788_v41  ;;  %v4607_v41 = vld [vmem:[%s6174_s3 + $0x450] ss:$8 sps:$4 sm:$0xff]  }
 0x259   :  { %2288 = vmatprep.subr.bf16.mxu1 %v4541_v40  ;;  %v1083_v40 = vmax.f32 %v1079_v11, 0.0  ;;  %v4612_v11 = vld [vmem:[%s6174_s3 + $0x464] ss:$8 sps:$4 sm:$0xff]  }
 0x25a   :  { %v2277_v24 = vsel %vm1382_vm2, %v3817_v19, 0  ;;  %v4615_v19 = vld [vmem:[%s6174_s3 + $0x474] ss:$8 sps:$4 sm:$0xff]  }
 0x25c   :  { %2289 = vmatpush1.bf16.msra.mxu1 %v4539_v22  ;;  %v5731_v22 = vpack.c.bf16 %v1085_v32, %v1083_v40  ;;  %v1105_v32 = vsel %vm784_vm3, %v4242_v28, %v4243_v52 }
 0x25d   :  { %2290 = vmatprep.subr.bf16.mxu1 %v4544_v50  ;;  %v4576_v50 = vld [vmem:[%s6174_s3 + $0x3a4] ss:$8 sps:$4 sm:$0xff]   ;;  %v1111_v40 = vmax.f32 %v5311_v26, %v1105_v32 }
 0x25f   :  { %2006 = vmatmul.mubr.bf16.gmra.mrb[8].mxu1 %v5403_v36 }
 0x260   :  { %3755 = vmatprep.mubr.msk.bf16.mxu1 %vm1357_vm4, %v5453_v8  ;;  %2291 = vmatpush1.bf16.msra.mxu1 %v4542_v43  ;;  %v4618_v43 = vld [vmem:[%s6176_s5 + $0x48] sm:$0xff]  }
 0x261   :  { %2292 = vmatprep.subr.bf16.mxu1 %v4547_v13  ;;  %v4657_v13 = vmov 0  }
 0x262   :  { %3025 = vmatprep.subr.bf16.mxu0 %v4657_v13 }
 0x263   :  { %3026 = vmatpush1.bf16.msra.mxu0 %v4618_v43  ;;  %v3856_v43 = vld [vmem:[%s6174_s3 + $0x480] sm:$0x77] }
 0x264   :  { %2293 = vmatpush1.bf16.msra.mxu1 %v4545_v45  ;;  %v4619_v45 = vld [vmem:[%s6176_s5 + $0x50] sm:$0xff]   ;;  %3027 = vmatprep.subr.bf16.mxu0 %v4657_v13  ;;  %v3886_v26 = vcombine.high %v3856_v43, %v3856_v43 }
 0x265   :  { %2294 = vmatprep.subr.bf16.mxu1 %v4550_v21  ;;  %v4574_v21 = vld [vmem:[%s6174_s3 + $0x3a0] ss:$8 sps:$4 sm:$0xff]  }
 0x267   :  { %2016 = vmatmul.mubr.bf16.gmra.mrb[12].mxu1 %v5455_v25  ;;  %3028 = vmatpush1.bf16.msra.mxu0 %v4619_v45  ;;  %v4613_v45 = vld [vmem:[%s6174_s3 + $0x470] ss:$8 sps:$4 sm:$0xff]  }
 0x268   :  { %3756 = vmatprep.mubr.msk.bf16.mxu1 %vm1357_vm4, %v5466_v3  ;;  %2295 = vmatpush1.bf16.msra.mxu1 %v4548_v53  ;;  %v4577_v53 = vld [vmem:[%s6174_s3 + $0x3b0] ss:$8 sps:$4 sm:$0xff]  }
 0x269   :  { %2296 = vmatprep.subr.bf16.mxu1 %v4553_v58  ;;  %v4582_v58 = vld [vmem:[%s6174_s3 + $0x3c4] ss:$8 sps:$4 sm:$0xff]   ;;  %3029 = vmatprep.subr.bf16.mxu0 %v4657_v13 }
 0x26c   :  { %2297 = vmatpush1.bf16.msra.mxu1 %v4551_v10  ;;  %v4580_v10 = vld [vmem:[%s6174_s3 + $0x3c0] ss:$8 sps:$4 sm:$0xff]  }
 0x26d   :  { %2298 = vmatprep.subr.bf16.mxu1 %v4556_v54  ;;  %v4585_v54 = vld [vmem:[%s6174_s3 + $0x3d4] ss:$8 sps:$4 sm:$0xff]  }
 0x26f   :  { %2026 = vmatmul.mubr.bf16.gmra.mrb[16].mxu1 %v5468_v39 }
 0x270   :  { %3757 = vmatprep.mubr.msk.bf16.mxu1 %vm1357_vm4, %v5479_v38  ;;  %2299 = vmatpush1.bf16.msra.mxu1 %v4554_v20  ;;  %v4588_v20 = vld [vmem:[%s6174_s3 + $0x3e4] ss:$8 sps:$4 sm:$0xff]  }
 0x271   :  { %2300 = vmatprep.subr.bf16.mxu1 %v4559_v15  ;;  %v4586_v15 = vld [vmem:[%s6174_s3 + $0x3e0] ss:$8 sps:$4 sm:$0xff]  }
 0x274   :  { %2301 = vmatpush1.bf16.msra.mxu1 %v4557_v2  ;;  %v4589_v2 = vld [vmem:[%s6174_s3 + $0x3f0] ss:$8 sps:$4 sm:$0xff]  }
 0x275   :  { %2302 = vmatprep.subr.bf16.mxu1 %v4562_v42  ;;  %v4592_v42 = vld [vmem:[%s6174_s3 + $0x400] ss:$8 sps:$4 sm:$0xff]  }
 0x277   :  { %2036 = vmatmul.mubr.bf16.gmra.mrb[20].mxu1 %v5481_v59 }
 0x278   :  { %3758 = vmatprep.mubr.msk.bf16.mxu1 %vm1357_vm4, %v5493_v7  ;;  %2303 = vmatpush1.bf16.msra.mxu1 %v4560_v55  ;;  %v4600_v55 = vld [vmem:[%s6174_s3 + $0x424] ss:$8 sps:$4 sm:$0xff]  }
 0x279   :  { %2304 = vmatprep.subr.bf16.mxu1 %v4565_v47  ;;  %v4598_v47 = vld [vmem:[%s6174_s3 + $0x420] ss:$8 sps:$4 sm:$0xff]  }
 0x27c   :  { %2305 = vmatpush1.bf16.msra.mxu1 %v4563_v0  ;;  %v4606_v0 = vld [vmem:[%s6174_s3 + $0x444] ss:$8 sps:$4 sm:$0xff]  }
 0x27d   :  { %2306 = vmatprep.subr.bf16.mxu1 %v4568_v57  ;;  %v4248_v57 = vunpack.i.h.bf16 %v4246_v17 }
 0x27f   :  { %2046 = vmatmul.mubr.bf16.gmra.mrb[24].mxu1 %v5498_v63  ;;  %v1114_v29 = vmax.f32 %v5326_v56, %v4248_v57 }
 0x280   :  { %3759 = vmatprep.mubr.msk.bf16.mxu1 %vm1357_vm4, %v5719_v48  ;;  %2307 = vmatpush1.bf16.msra.mxu1 %v4566_v1  ;;  %v4247_v1 = vunpack.i.l.bf16 %v4246_v17 }
 0x281   :  { %2308 = vmatprep.subr.bf16.mxu1 %v4571_v12  ;;  %v1112_v12 = vmax.f32 %v5314_v44, %v4243_v52  ;;  %v1118_v56 = vmax.f32 %v1114_v29, 0.0 }
 0x283   :  { %v1116_v44 = vmax.f32 %v1112_v12, 0.0 }
 0x284   :  { %2309 = vmatpush1.bf16.msra.mxu1 %v4569_v60  ;;  %v1106_v60 = vsel %vm784_vm3, %v4247_v1, %v4248_v57 }
 0x285   :  { %3819 = vmatprep.subr.msk.bf16.mxu1 %vm1382_vm2, %v3818_v51  ;;  %v4610_v51 = vld [vmem:[%s6174_s3 + $0x460] ss:$8 sps:$4 sm:$0xff]  }
 0x287   :  { %2056 = vmatmul.mubr.bf16.gmra.mrb[28].mxu1 %v5731_v22 }
 0x288   :  { %3820 = vmatprep.mubr.msk.bf16.mxu1 %vm1357_vm4, %v5364_v14  ;;  %2311 = vmatpush1.bf16.msra.mxu1 %v2277_v24  ;;  %v4579_v14 = vld [vmem:[%s6174_s3 + $0x3b4] ss:$8 sps:$4 sm:$0xff]   ;;  %v1113_v24 = vmax.f32 %v5319_v27, %v1106_v60 }
 0x289   :  { %2611 = vmatprep.subr.bf16.mxu1 %v4576_v50  ;;  %v1120_v50 = vpack.c.bf16 %v1118_v56, %v1116_v44 }
 0x28f   :  { %2315 = vmatmul.mubr.bf16.vlgmr.msra.gmra.mrb[0].mxu1 %v5366_v6  ;;  %v4583_v6 = vld [vmem:[%s6174_s3 + $0x3d0] ss:$8 sps:$4 sm:$0xff]  }
 0x290   :  { %2612 = vmatpush1.bf16.msra.mxu1 %v4574_v21  ;;  %3821 = vmatprep.mubr.msk.bf16.mxu1 %vm1357_vm4, %v5401_v37  ;;  %v1115_v21 = vmax.f32 %v1111_v40, 0.0 }
 0x291   :  { %2613 = vmatprep.subr.bf16.mxu1 %v4579_v14  ;;  %v1117_v14 = vmax.f32 %v1113_v24, 0.0 }
 0x293   :  { %v1119_v27 = vpack.c.bf16 %v1117_v14, %v1115_v21 }
 0x294   :  { %2614 = vmatpush1.bf16.msra.mxu1 %v4577_v53  ;;  %v3885_v53 = vcombine.low %v3856_v43, %v3856_v43 }
 0x295   :  { %2615 = vmatprep.subr.bf16.mxu1 %v4582_v58 }
 0x296   :  { %v2606_v58 = vsel %vm1382_vm2, %v3885_v53, 0 }
 0x297   :  { %2325 = vmatmul.mubr.bf16.gmra.mrb[4].mxu1 %v5403_v36 }
 0x298   :  { %3822 = vmatprep.mubr.msk.bf16.mxu1 %vm1357_vm4, %v5453_v8  ;;  %2616 = vmatpush1.bf16.msra.mxu1 %v4580_v10 }
 0x299   :  { %2617 = vmatprep.subr.bf16.mxu1 %v4585_v54 }
 0x29c   :  { %2618 = vmatpush1.bf16.msra.mxu1 %v4583_v6 }
 0x29d   :  { %2619 = vmatprep.subr.bf16.mxu1 %v4588_v20 }
 0x29f   :  { %2335 = vmatmul.mubr.bf16.gmra.mrb[8].mxu1 %v5455_v25 }
 0x2a0   :  { %3823 = vmatprep.mubr.msk.bf16.mxu1 %vm1357_vm4, %v5466_v3  ;;  %2620 = vmatpush1.bf16.msra.mxu1 %v4586_v15 }
 0x2a1   :  { %2621 = vmatprep.subr.bf16.mxu1 %v4591_v30  ;;  %v4623_v30 = vld [vmem:[%s6176_s5 + $0x70] sm:$0xff]  }
 0x2a4   :  { %2622 = vmatpush1.bf16.msra.mxu1 %v4589_v2  ;;  %v4624_v2 = vld [vmem:[%s6176_s5 + $0x78] sm:$0xff]  }
 0x2a5   :  { %2623 = vmatprep.subr.bf16.mxu1 %v4594_v33  ;;  %v4625_v33 = vld [vmem:[%s6176_s5 + $0x80] sm:$0xff]  }
 0x2a7   :  { %2345 = vmatmul.mubr.bf16.gmra.mrb[12].mxu1 %v5468_v39 }
 0x2a8   :  { %3824 = vmatprep.mubr.msk.bf16.mxu1 %vm1357_vm4, %v5479_v38  ;;  %2624 = vmatpush1.bf16.msra.mxu1 %v4592_v42  ;;  %v4626_v42 = vld [vmem:[%s6176_s5 + $0x88] sm:$0x3f]  }
 0x2a9   :  { %2625 = vmatprep.subr.bf16.mxu1 %v4597_v49  ;;  %v3023_v49 = vsel %vm488_vm1, %v4626_v42, 0 }
 0x2ac   :  { %2626 = vmatpush1.bf16.msra.mxu1 %v4595_v61 }
 0x2ad   :  { %2627 = vmatprep.subr.bf16.mxu1 %v4600_v55 }
 0x2af   :  { %2355 = vmatmul.mubr.bf16.gmra.mrb[16].mxu1 %v5481_v59 }
 0x2b0   :  { %3825 = vmatprep.mubr.msk.bf16.mxu1 %vm1357_vm4, %v5493_v7  ;;  %2628 = vmatpush1.bf16.msra.mxu1 %v4598_v47  ;;  %v2756_v47 = vld [vmem:[%s6177_s4] sm:$0x3]  ;;  %s4658_s4 = smov 108  }
 0x2b1   :  { %2629 = vmatprep.subr.bf16.mxu1 %v4603_v62  ;;  %v5922_v34 = vrot.slane %v2756_v47, %v103_v23 }
 0x2b4   :  { %2630 = vmatpush1.bf16.msra.mxu1 %v4601_v16  ;;  %v6183_v16 = vsub.s32 1, %v4977_v18 }
 0x2b5   :  { %2631 = vmatprep.subr.bf16.mxu1 %v4606_v0 }
 0x2b6   :  { %v5926_v0 = vrot.slane %v2756_v47, %v6183_v16 }
 0x2b7   :  { %2365 = vmatmul.mubr.bf16.gmra.mrb[20].mxu1 %v5498_v63 }
 0x2b8   :  { %3826 = vmatprep.mubr.msk.bf16.mxu1 %vm1357_vm4, %v5719_v48  ;;  %2632 = vmatpush1.bf16.msra.mxu1 %v4604_v4 }
 0x2b9   :  { %2633 = vmatprep.subr.bf16.mxu1 %v4609_v46 }
 0x2bc   :  { %2634 = vmatpush1.bf16.msra.mxu1 %v4607_v41 }
 0x2bd   :  { %2635 = vmatprep.subr.bf16.mxu1 %v4612_v11 }
 0x2bf   :  { %2375 = vmatmul.mubr.bf16.gmra.mrb[24].mxu1 %v5731_v22 }
 0x2c0   :  { %3827 = vmatprep.mubr.msk.bf16.mxu1 %vm1357_vm4, %v1120_v50  ;;  %2636 = vmatpush1.bf16.msra.mxu1 %v4610_v51 }
 0x2c1   :  { %2637 = vmatprep.subr.bf16.mxu1 %v4615_v19 }
 0x2c4   :  { %2638 = vmatpush1.bf16.msra.mxu1 %v4613_v45 }
 0x2c5   :  { %3887 = vmatprep.subr.msk.bf16.mxu1 %vm1382_vm2, %v3886_v26 }
 0x2c7   :  { %2385 = vmatmul.mubr.bf16.gmra.mrb[28].mxu1 %v1119_v27 }
 0x2c8   :  { %3888 = vmatprep.mubr.msk.bf16.mxu1 %vm1357_vm4, %v5401_v37  ;;  %2640 = vmatpush1.bf16.msra.mxu1 %v2606_v58  ;;  %v4256_v37 = vpop.permute.xlu1 %4255 }
 0x2cf   :  { %2644 = vmatmul.mubr.bf16.vlgmr.msra.gmra.mrb[0].mxu1 %v5403_v36  ;;  %v4251_v36 = vpop.permute.xlu0 %4250 }
 0x2d0   :  { %3889 = vmatprep.mubr.msk.bf16.mxu1 %vm1357_vm4, %v5453_v8  ;;  %v4258_v8 = vunpack.i.h.bf16 %v4256_v37 }
 0x2d7   :  { %2654 = vmatmul.mubr.bf16.gmra.mrb[4].mxu1 %v5455_v25  ;;  %v4253_v25 = vunpack.i.h.bf16 %v4251_v36 }
 0x2d8   :  { %3890 = vmatprep.mubr.msk.bf16.mxu1 %vm1357_vm4, %v5466_v3  ;;  %v1146_v3 = vmax.f32 %v5442_v31, %v4258_v8 }
 0x2d9   :  { %v1144_v10 = vmax.f32 %v5429_v35, %v4253_v25 }
 0x2db   :  { %v1148_v54 = vmax.f32 %v1144_v10, 0.0 }
 0x2df   :  { %2664 = vmatmul.mubr.bf16.gmra.mrb[8].mxu1 %v5468_v39  ;;  %v4257_v39 = vunpack.i.l.bf16 %v4256_v37 }
 0x2e0   :  { %3891 = vmatprep.mubr.msk.bf16.mxu1 %vm1357_vm4, %v5479_v38  ;;  %v4252_v38 = vunpack.i.l.bf16 %v4251_v36 }
 0x2e7   :  { %2674 = vmatmul.mubr.bf16.gmra.mrb[12].mxu1 %v5481_v59  ;;  %v1150_v59 = vmax.f32 %v1146_v3, 0.0 }
 0x2e8   :  { %3892 = vmatprep.mubr.msk.bf16.mxu1 %vm1357_vm4, %v5493_v7  ;;  %v1138_v7 = vsel %vm784_vm3, %v4257_v39, %v4258_v8 }
 0x2e9   :  { %v1145_v6 = vmax.f32 %v5440_v9, %v1138_v7  ;;  %v1152_v20 = vpack.c.bf16 %v1150_v59, %v1148_v54  ;;  %v4622_v9 = vld [vmem:[%s6176_s5 + $0x68] sm:$0xff]  }
 0x2eb   :  { %v1149_v31 = vmax.f32 %v1145_v6, 0.0 }
 0x2ef   :  { %2684 = vmatmul.mubr.bf16.gmra.mrb[16].mxu1 %v5498_v63  ;;  %v1137_v63 = vsel %vm784_vm3, %v4252_v38, %v4253_v25 }
 0x2f0   :  { %3893 = vmatprep.mubr.msk.bf16.mxu1 %vm1357_vm4, %v5719_v48  ;;  %v1143_v48 = vmax.f32 %v5426_v5, %v1137_v63  ;;  %v4621_v5 = vld [vmem:[%s6176_s5 + $0x60] sm:$0xff]  }
 0x2f2   :  { %v1147_v35 = vmax.f32 %v1143_v48, 0.0 }
 0x2f4   :  { %v1151_v15 = vpack.c.bf16 %v1149_v31, %v1147_v35 }
 0x2f7   :  { %2694 = vmatmul.mubr.bf16.gmra.mrb[20].mxu1 %v5731_v22  ;;  %v4620_v22 = vld [vmem:[%s6176_s5 + $0x58] sm:$0xff]  }
 0x2f8   :  { %3894 = vmatprep.mubr.msk.bf16.mxu1 %vm1357_vm4, %v1120_v50  ;;  %3030 = vmatpush1.bf16.msra.mxu0 %v4620_v22 }
 0x2f9   :  { %3031 = vmatprep.subr.bf16.mxu0 %v4657_v13 }
 0x2fc   :  { %3032 = vmatpush1.bf16.msra.mxu0 %v4621_v5 }
 0x2fd   :  { %3033 = vmatprep.subr.bf16.mxu0 %v4657_v13 }
 0x2ff   :  { %2704 = vmatmul.mubr.bf16.gmra.mrb[24].mxu1 %v1119_v27 }
 0x300   :  { %3895 = vmatprep.mubr.msk.bf16.mxu1 %vm1357_vm4, %v1152_v20  ;;  %3034 = vmatpush1.bf16.msra.mxu0 %v4622_v9 }
 0x301   :  { %3035 = vmatprep.subr.bf16.mxu0 %v4657_v13 }
 0x304   :  { %3036 = vmatpush1.bf16.msra.mxu0 %v4623_v30 }
 0x305   :  { %3037 = vmatprep.subr.bf16.mxu0 %v4657_v13 }
 0x307   :  { %2714 = vmatmul.mubr.bf16.gmra.mrb[28].mxu1 %v1151_v15 }
 0x308   :  { %3038 = vmatpush1.bf16.msra.mxu0 %v4624_v2 }
 0x309   :  { %3039 = vmatprep.subr.bf16.mxu0 %v4657_v13 }
 0x30c   :  { %3040 = vmatpush1.bf16.msra.mxu0 %v4625_v33 }
 0x30d   :  { %3041 = vmatprep.subr.bf16.mxu0 %v4657_v13 }
 0x310   :  { %3042 = vmatpush1.bf16.msra.mxu0 %v3023_v49 }
 0x311   :  { %3125 = vmatprep.subr.bf16.mxu0 %v4657_v13 }
 0x3a2   :  { %v2645_v61 = vpop.f32.mrb[0].mxu1 }
 0x3a3   :  { %v2647_v55 = vpop.f32.mrb[1].mxu1  ;;  %v2768_v52 = vadd.f32 %v5922_v34, %v2645_v61 }
 0x3a4   :  { %v2649_v62 = vpop.f32.mrb[2].mxu1  ;;  %v2769_v29 = vadd.f32 %v5926_v0, %v2647_v55 }
 0x3a5   :  { %v2651_v17 = vpop.f32.mrb[3].mxu1  ;;  %v2770_v28 = vadd.f32 %v5922_v34, %v2649_v62 }
 0x3a6   :  { %v2771_v11 = vadd.f32 %v5926_v0, %v2651_v17 }
 0x3aa   :  { %v2655_v57 = vpop.f32.mrb[4].mxu1 }
 0x3ab   :  { %v2772_v4 = vadd.f32 %v5922_v34, %v2655_v57  ;;  %v2657_v46 = vpop.f32.mrb[5].mxu1 }
 0x3ac   :  { %v2773_v1 = vadd.f32 %v5926_v0, %v2657_v46  ;;  %v2659_v12 = vpop.f32.mrb[6].mxu1 }
 0x3ad   :  { %v5933_v41 = vmax.f32 %v2768_v52, %v2772_v4  ;;  %v2774_v23 = vadd.f32 %v5922_v34, %v2659_v12  ;;  %v2661_v18 = vpop.f32.mrb[7].mxu1 }
 0x3ae   :  { %v5937_v56 = vmax.f32 %v2769_v29, %v2773_v1  ;;  %v2775_v60 = vadd.f32 %v5926_v0, %v2661_v18 }
 0x3af   :  { %v5940_v44 = vmax.f32 %v2770_v28, %v2774_v23 }
 0x3b0   :  { %v5942_v32 = vmax.f32 %v2771_v11, %v2775_v60  ;;  %v4269_v48 = vpack.i.bf16 %v5937_v56, %v5933_v41 }
 0x3b2   :  { %v2665_v51 = vpop.f32.mrb[8].mxu1  ;;  %v4274_v20 = vpack.i.bf16 %v5942_v32, %v5940_v44 }
 0x3b3   :  { %v2667_v19 = vpop.f32.mrb[9].mxu1  ;;  %v2776_v43 = vadd.f32 %v5922_v34, %v2665_v51 }
 0x3b4   :  { %v2669_v40 = vpop.f32.mrb[10].mxu1  ;;  %v2777_v14 = vadd.f32 %v5926_v0, %v2667_v19 }
 0x3b5   :  { %v2671_v24 = vpop.f32.mrb[11].mxu1  ;;  %v2778_v27 = vadd.f32 %v5922_v34, %v2669_v40 }
 0x3b6   :  { %v2779_v8 = vadd.f32 %v5926_v0, %v2671_v24 }
 0x3ba   :  { %v2675_v50 = vpop.f32.mrb[12].mxu1 }
 0x3bb   :  { %v2780_v45 = vadd.f32 %v5922_v34, %v2675_v50  ;;  %v2677_v21 = vpop.f32.mrb[13].mxu1 }
 0x3bc   :  { %v2781_v26 = vadd.f32 %v5926_v0, %v2677_v21  ;;  %v2679_v53 = vpop.f32.mrb[14].mxu1 }
 0x3bd   :  { %v5949_v58 = vmax.f32 %v2776_v43, %v2780_v45  ;;  %v2782_v37 = vadd.f32 %v5922_v34, %v2679_v53  ;;  %v2681_v36 = vpop.f32.mrb[15].mxu1 }
 0x3be   :  { %v5953_v25 = vmax.f32 %v2777_v14, %v2781_v26  ;;  %v2783_v3 = vadd.f32 %v5926_v0, %v2681_v36 }
 0x3bf   :  { %v5956_v39 = vmax.f32 %v2778_v27, %v2782_v37 }
 0x3c0   :  { %v5958_v10 = vmax.f32 %v2779_v8, %v2783_v3  ;;  %v4259_v38 = vpack.i.bf16 %v5953_v25, %v5949_v58 }
 0x3c2   :  { %4260 = vrot.lane.b32.xlu0 %v4259_v38, %s4658_s4  ;;  %v2685_v59 = vpop.f32.mrb[16].mxu1  ;;  %v4264_v7 = vpack.i.bf16 %v5958_v10, %v5956_v39 }
 0x3c3   :  { %v2687_v54 = vpop.f32.mrb[17].mxu1  ;;  %v2784_v31 = vadd.f32 %v5922_v34, %v2685_v59 }
 0x3c4   :  { %4265 = vrot.lane.b32.xlu1 %v4264_v7, %s4658_s4  ;;  %v2689_v63 = vpop.f32.mrb[18].mxu1  ;;  %v2785_v5 = vadd.f32 %v5926_v0, %v2687_v54 }
 0x3c5   :  { %v2691_v6 = vpop.f32.mrb[19].mxu1  ;;  %v2786_v2 = vadd.f32 %v5922_v34, %v2689_v63 }
 0x3c6   :  { %4270 = vrot.lane.b32.xlu0 %v4269_v48, %s4658_s4  ;;  %v2787_v61 = vadd.f32 %v5926_v0, %v2691_v6 }
 0x3c8   :  { %4275 = vrot.lane.b32.xlu1 %v4274_v20, %s4658_s4 }
 0x3ca   :  { %v2695_v35 = vpop.f32.mrb[20].mxu1 }
 0x3cb   :  { %v2788_v15 = vadd.f32 %v5922_v34, %v2695_v35  ;;  %v2697_v22 = vpop.f32.mrb[21].mxu1 }
 0x3cc   :  { %v2789_v9 = vadd.f32 %v5926_v0, %v2697_v22  ;;  %v2699_v30 = vpop.f32.mrb[22].mxu1 }
 0x3cd   :  { %v5977_v33 = vmax.f32 %v2784_v31, %v2788_v15  ;;  %v2790_v42 = vadd.f32 %v5922_v34, %v2699_v30  ;;  %v2701_v49 = vpop.f32.mrb[23].mxu1 }
 0x3ce   :  { %v5981_v55 = vmax.f32 %v2785_v5, %v2789_v9  ;;  %v2791_v47 = vadd.f32 %v5926_v0, %v2701_v49  ;;  %v4630_v49 = vld [vmem:[%s6176_s5 + $0x18] sm:$0xff]  }
 0x3cf   :  { %v5984_v62 = vmax.f32 %v2786_v2, %v2790_v42 }
 0x3d0   :  { %v5986_v17 = vmax.f32 %v2787_v61, %v2791_v47  ;;  %v4279_v16 = vpack.i.bf16 %v5981_v55, %v5977_v33  ;;  %v4631_v61 = vld [vmem:[%s6176_s5 + $0x20] sm:$0xff]   ;;  %v4632_v47 = vld [vmem:[%s6176_s5 + $0x28] sm:$0xff]  }
 0x3d2   :  { %4280 = vrot.lane.b32.xlu0 %v4279_v16, %s4658_s4  ;;  %v2705_v57 = vpop.f32.mrb[24].mxu1  ;;  %v4284_v52 = vpack.i.bf16 %v5986_v17, %v5984_v62 }
 0x3d3   :  { %v2707_v4 = vpop.f32.mrb[25].mxu1  ;;  %v2792_v12 = vadd.f32 %v5922_v34, %v2705_v57 }
 0x3d4   :  { %4285 = vrot.lane.b32.xlu1 %v4284_v52, %s4658_s4  ;;  %v2709_v46 = vpop.f32.mrb[26].mxu1  ;;  %v2793_v18 = vadd.f32 %v5926_v0, %v2707_v4  ;;  %v4633_v4 = vld [vmem:[%s6176_s5 + $0x30] sm:$0xff]  }
 0x3d5   :  { %v2711_v29 = vpop.f32.mrb[27].mxu1  ;;  %v2794_v51 = vadd.f32 %v5922_v34, %v2709_v46 }
 0x3d6   :  { %v2795_v50 = vadd.f32 %v5926_v0, %v2711_v29 }
 0x3da   :  { %v2715_v1 = vpop.f32.mrb[28].mxu1 }
 0x3db   :  { %v2796_v28 = vadd.f32 %v5922_v34, %v2715_v1  ;;  %v2717_v23 = vpop.f32.mrb[29].mxu1 }
 0x3dc   :  { %v2797_v11 = vadd.f32 %v5926_v0, %v2717_v23  ;;  %v2719_v60 = vpop.f32.mrb[30].mxu1  ;;  %v4634_v23 = vld [vmem:[%s6176_s5 + $0x38] sm:$0xff]  }
 0x3dd   :  { %v5999_v19 = vmax.f32 %v2792_v12, %v2796_v28  ;;  %v2798_v40 = vadd.f32 %v5922_v34, %v2719_v60  ;;  %v2721_v24 = vpop.f32.mrb[31].mxu1 }
 0x3de   :  { %v6003_v43 = vmax.f32 %v2793_v18, %v2797_v11  ;;  %v2799_v45 = vadd.f32 %v5926_v0, %v2721_v24  ;;  %v4635_v11 = vld [vmem:[%s6176_s5 + $0x40] sm:$0x3f]  }
 0x3df   :  { %v6006_v21 = vmax.f32 %v2794_v51, %v2798_v40 }
 0x3e0   :  { %v6008_v14 = vmax.f32 %v2795_v50, %v2799_v45  ;;  %v4289_v26 = vpack.i.bf16 %v6003_v43, %v5999_v19  ;;  %v3123_v50 = vsel %vm488_vm1, %v4635_v11, 0 }
 0x3e2   :  { %4290 = vrot.lane.b32.xlu0 %v4289_v26, %s4658_s4  ;;  %v4294_v53 = vpack.i.bf16 %v6008_v14, %v6006_v21 }
 0x3e4   :  { %4295 = vrot.lane.b32.xlu1 %v4294_v53, %s4658_s4  ;;  %v4636_v53 = vld [vmem:[%s6176_s5 + $0x90] sm:$0xff]  }
 0x434   :  { %v4261_v34 = vpop.permute.xlu0 %4260 }
 0x435   :  { %v4263_v27 = vunpack.i.h.bf16 %v4261_v34  ;;  %v4262_v37 = vunpack.i.l.bf16 %v4261_v34 }
 0x436   :  { %v4266_v36 = vpop.permute.xlu1 %4265 }
 0x437   :  { %v2856_v0 = vmax.f32 %v5953_v25, %v4263_v27  ;;  %v2849_v8 = vsel %vm2816_vm5, %v4262_v37, %v4263_v27  ;;  %v4268_v3 = vunpack.i.h.bf16 %v4266_v36  ;;  %v4267_v38 = vunpack.i.l.bf16 %v4266_v36  ;;  %v4639_v27 = vld [vmem:[%s6176_s5 + $0xa8] sm:$0xff]   ;;  %v4640_v37 = vld [vmem:[%s6176_s5 + $0xb0] sm:$0xff]   ;;  %v4641_v36 = vld [vmem:[%s6176_s5 + $0xb8] sm:$0xff]  }
 0x438   :  { %v2855_v59 = vmax.f32 %v5949_v58, %v2849_v8  ;;  %v4271_v7 = vpop.permute.xlu0 %4270  ;;  %v4627_v58 = vld [vmem:[%s6176_s5] sm:$0xff]  }
 0x439   :  { %v2858_v54 = vmax.f32 %v5958_v10, %v4268_v3  ;;  %v2850_v63 = vsel %vm2816_vm5, %v4267_v38, %v4268_v3  ;;  %v4273_v48 = vunpack.i.h.bf16 %v4271_v7  ;;  %v2860_v35 = vmax.f32 %v2856_v0, 0.0  ;;  %v4642_v38 = vld [vmem:[%s6176_s5 + $0xc0] sm:$0xff]  }
 0x43a   :  { %v2857_v6 = vmax.f32 %v5956_v39, %v2850_v63  ;;  %v4276_v20 = vpop.permute.xlu1 %4275  ;;  %v2859_v22 = vmax.f32 %v2855_v59, 0.0  ;;  %v4272_v52 = vunpack.i.l.bf16 %v4271_v7 }
 0x43b   :  { %v2862_v31 = vmax.f32 %v2858_v54, 0.0  ;;  %v2824_v15 = vmax.f32 %v5937_v56, %v4273_v48  ;;  %v4278_v25 = vunpack.i.h.bf16 %v4276_v20  ;;  %v4628_v56 = vld [vmem:[%s6176_s5 + $0x8] sm:$0xff]   ;;  %v4277_v16 = vunpack.i.l.bf16 %v4276_v20 }
 0x43c   :  { %v2861_v5 = vmax.f32 %v2857_v6, 0.0  ;;  %v2817_v12 = vsel %vm2816_vm5, %v4272_v52, %v4273_v48  ;;  %v4643_v6 = vld [vmem:[%s6176_s5 + $0xc8] sm:$0xff]   ;;  %v4653_v52 = vld [vmem:[%s6176_s5 + $0x118] sm:$0x3f]  }
 0x43d   :  { %v2864_v9 = vpack.c.bf16 %v2862_v31, %v2860_v35  ;;  %v2826_v30 = vmax.f32 %v5942_v32, %v4278_v25  ;;  %v2828_v2 = vmax.f32 %v2824_v15, 0.0  ;;  %v4629_v32 = vld [vmem:[%s6176_s5 + $0x10] sm:$0xff]   ;;  %v2818_v29 = vsel %vm2816_vm5, %v4277_v16, %v4278_v25 }
 0x43e   :  { %v2863_v10 = vpack.c.bf16 %v2861_v5, %v2859_v22  ;;  %v2825_v18 = vmax.f32 %v5940_v44, %v2818_v29  ;;  %v2823_v51 = vmax.f32 %v5933_v41, %v2817_v12  ;;  %v4644_v35 = vld [vmem:[%s6176_s5 + $0xd0] sm:$0x3f]   ;;  %v3363_v29 = vsel %vm488_vm1, %v4653_v52, 0 }
 0x43f   :  { %v2830_v42 = vmax.f32 %v2826_v30, 0.0  ;;  %3923 = vmatprep.mubr.msk.bf16.mxu0 %vm415_vm0, %v2864_v9  ;;  %v3242_v5 = vsel %vm488_vm1, %v4644_v35, 0  ;;  %v4652_v16 = vld [vmem:[%s6176_s5 + $0x110] sm:$0xff]  }
 0x440   :  { %3058 = vmatmul.mubr.bf16.vlgmr.msra.gmra.mrb[96].mxu0 %v2863_v10  ;;  %v2829_v24 = vmax.f32 %v2825_v18, 0.0  ;;  %v2827_v44 = vmax.f32 %v2823_v51, 0.0 }
 0x441   :  { %v2832_v39 = vpack.c.bf16 %v2830_v42, %v2828_v2  ;;  %3126 = vmatpush1.bf16.msra.mxu0 %v4627_v58  ;;  %v4645_v58 = vld [vmem:[%s6176_s5 + $0xd8] sm:$0xff]   ;;  %v4648_v2 = vld [vmem:[%s6176_s5 + $0xf0] sm:$0xff]  }
 0x442   :  { %3127 = vmatprep.subr.bf16.mxu0 %v4657_v13  ;;  %v2831_v34 = vpack.c.bf16 %v2829_v24, %v2827_v44  ;;  %v4649_v42 = vld [vmem:[%s6176_s5 + $0xf8] sm:$0xff]  }
 0x443   :  { %3933 = vmatprep.mubr.msk.bf16.mxu0 %vm415_vm0, %v2832_v39  ;;  %v4650_v39 = vld [vmem:[%s6176_s5 + $0x100] sm:$0xff]  }
 0x444   :  { %v4281_v46 = vpop.permute.xlu0 %4280 }
 0x445   :  { %3128 = vmatpush1.bf16.msra.mxu0 %v4628_v56  ;;  %v4283_v28 = vunpack.i.h.bf16 %v4281_v46  ;;  %v4282_v3 = vunpack.i.l.bf16 %v4281_v46 }
 0x446   :  { %3129 = vmatprep.subr.bf16.mxu0 %v4657_v13  ;;  %v4286_v57 = vpop.permute.xlu1 %4285 }
 0x447   :  { %v4288_v1 = vunpack.i.h.bf16 %v4286_v57  ;;  %v2888_v40 = vmax.f32 %v5981_v55, %v4283_v28  ;;  %v4637_v55 = vld [vmem:[%s6176_s5 + $0x98] sm:$0xff]   ;;  %v4287_v0 = vunpack.i.l.bf16 %v4286_v57  ;;  %v2881_v63 = vsel %vm2816_vm5, %v4282_v3, %v4283_v28 }
 0x448   :  { %v2887_v15 = vmax.f32 %v5977_v33, %v2881_v63  ;;  %v4659_v28 = vmov 0.0  }
 0x449   :  { %3130 = vmatpush1.bf16.msra.mxu0 %v4629_v32  ;;  %v2890_v60 = vmax.f32 %v5986_v17, %v4288_v1  ;;  %v2892_v26 = vmax.f32 %v2888_v40, 0.0  ;;  %v4638_v17 = vld [vmem:[%s6176_s5 + $0xa0] sm:$0xff]   ;;  %v2882_v7 = vsel %vm2816_vm5, %v4287_v0, %v4288_v1 }
 0x44a   :  { %3131 = vmatprep.subr.bf16.mxu0 %v4657_v13  ;;  %v2889_v20 = vmax.f32 %v5984_v62, %v2882_v7  ;;  %v2891_v62 = vmax.f32 %v2887_v15, 0.0 }
 0x44b   :  { %v2894_v45 = vmax.f32 %v2890_v60, 0.0 }
 0x44c   :  { %v2893_v22 = vmax.f32 %v2889_v20, 0.0 }
 0x44d   :  { %3132 = vmatpush1.bf16.msra.mxu0 %v4630_v49  ;;  %v2896_v41 = vpack.c.bf16 %v2894_v45, %v2892_v26  ;;  %v4651_v49 = vld [vmem:[%s6176_s5 + $0x108] sm:$0xff]  }
 0x44e   :  { %3133 = vmatprep.subr.bf16.mxu0 %v4657_v13  ;;  %v2895_v10 = vpack.c.bf16 %v2893_v22, %v2891_v62 }
 0x451   :  { %3134 = vmatpush1.bf16.msra.mxu0 %v4631_v61 }
 0x452   :  { %3135 = vmatprep.subr.bf16.mxu0 %v4657_v13 }
 0x454   :  { %v4291_v59 = vpop.permute.xlu0 %4290 }
 0x455   :  { %3136 = vmatpush1.bf16.msra.mxu0 %v4632_v47  ;;  %v4293_v48 = vunpack.i.h.bf16 %v4291_v59  ;;  %v4292_v32 = vunpack.i.l.bf16 %v4291_v59 }
 0x456   :  { %3137 = vmatprep.subr.bf16.mxu0 %v4657_v13  ;;  %v4296_v8 = vpop.permute.xlu1 %4295 }
 0x457   :  { %v4298_v54 = vunpack.i.h.bf16 %v4296_v8  ;;  %v2920_v25 = vmax.f32 %v6003_v43, %v4293_v48  ;;  %v4646_v43 = vld [vmem:[%s6176_s5 + $0xe0] sm:$0xff]   ;;  %v4297_v56 = vunpack.i.l.bf16 %v4296_v8  ;;  %v2913_v47 = vsel %vm2816_vm5, %v4292_v32, %v4293_v48 }
 0x458   :  { %v3991_v48 = vld [vmem:[%s6180_s8] ss:$0 sm:$0xff] }
 0x459   :  { %3138 = vmatpush1.bf16.msra.mxu0 %v4633_v4  ;;  %v2922_v31 = vmax.f32 %v6008_v14, %v4298_v54  ;;  %v2924_v30 = vmax.f32 %v2920_v25, 0.0  ;;  %v4647_v14 = vld [vmem:[%s6176_s5 + $0xe8] sm:$0xff]   ;;  %v2914_v61 = vsel %vm2816_vm5, %v4297_v56, %v4298_v54  ;;  %v2919_v4 = vmax.f32 %v5999_v19, %v2913_v47 }
 0x45a   :  { %3139 = vmatprep.subr.bf16.mxu0 %v4657_v13  ;;  %v2921_v57 = vmax.f32 %v6006_v21, %v2914_v61  ;;  %v4654_v21 = vld [vmem:[%s6178_s7] sm:$0xff]   ;;  %v4655_v19 = vld [vmem:[%s6178_s7 + $0x8] sm:$0xff]  }
 0x45b   :  { %v2926_v9 = vmax.f32 %v2922_v31, 0.0  ;;  %v2923_v1 = vmax.f32 %v2919_v4, 0.0 }
 0x45c   :  { %v2925_v46 = vmax.f32 %v2921_v57, 0.0 }
 0x45d   :  { %3140 = vmatpush1.bf16.msra.mxu0 %v4634_v23  ;;  %v2928_v33 = vpack.c.bf16 %v2926_v9, %v2924_v30 }
 0x45e   :  { %3141 = vmatprep.subr.bf16.mxu0 %v4657_v13  ;;  %v2927_v12 = vpack.c.bf16 %v2925_v46, %v2923_v1 }
 0x461   :  { %3142 = vmatpush1.bf16.msra.mxu0 %v3123_v50 }
 0x462   :  { %3244 = vmatprep.subr.bf16.mxu0 %v4657_v13 }
 0x464   :  { %3158 = vmatmul.mubr.bf16.vlgmr.msra.gmra.mrb[100].mxu0 %v2831_v34 }
 0x465   :  { %3245 = vmatpush1.bf16.msra.mxu0 %v4636_v53  ;;  %3961 = vmatprep.mubr.msk.bf16.mxu0 %vm415_vm0, %v2896_v41 }
 0x466   :  { %3246 = vmatprep.subr.bf16.mxu0 %v4657_v13 }
 0x469   :  { %3247 = vmatpush1.bf16.msra.mxu0 %v4637_v55 }
 0x46a   :  { %3248 = vmatprep.subr.bf16.mxu0 %v4657_v13 }
 0x46d   :  { %3249 = vmatpush1.bf16.msra.mxu0 %v4638_v17 }
 0x46e   :  { %3250 = vmatprep.subr.bf16.mxu0 %v4657_v13 }
 0x471   :  { %3251 = vmatpush1.bf16.msra.mxu0 %v4639_v27  ;;  %v3990_v27 = vld [vmem:[%s6179_s6] ss:$0 sm:$0xff] }
 0x472   :  { %3252 = vmatprep.subr.bf16.mxu0 %v4657_v13 }
 0x475   :  { %3253 = vmatpush1.bf16.msra.mxu0 %v4640_v37 }
 0x476   :  { %3254 = vmatprep.subr.bf16.mxu0 %v4657_v13 }
 0x479   :  { %3255 = vmatpush1.bf16.msra.mxu0 %v4641_v36 }
 0x47a   :  { %3256 = vmatprep.subr.bf16.mxu0 %v4657_v13 }
 0x47d   :  { %3257 = vmatpush1.bf16.msra.mxu0 %v4642_v38 }
 0x47e   :  { %3258 = vmatprep.subr.bf16.mxu0 %v4657_v13 }
 0x481   :  { %3259 = vmatpush1.bf16.msra.mxu0 %v4643_v6 }
 0x482   :  { %3260 = vmatprep.subr.bf16.mxu0 %v4657_v13 }
 0x485   :  { %3261 = vmatpush1.bf16.msra.mxu0 %v3242_v5 }
 0x486   :  { %3365 = vmatprep.subr.bf16.mxu0 %v4657_v13 }
 0x488   :  { %3277 = vmatmul.mubr.bf16.vlgmr.msra.gmra.mrb[104].mxu0 %v2895_v10 }
 0x489   :  { %3366 = vmatpush1.bf16.msra.mxu0 %v4645_v58  ;;  %3989 = vmatprep.mubr.msk.bf16.mxu0 %vm415_vm0, %v2928_v33 }
 0x48a   :  { %3367 = vmatprep.subr.bf16.mxu0 %v4657_v13 }
 0x48d   :  { %3368 = vmatpush1.bf16.msra.mxu0 %v4646_v43 }
 0x48e   :  { %3369 = vmatprep.subr.bf16.mxu0 %v4657_v13 }
 0x491   :  { %3370 = vmatpush1.bf16.msra.mxu0 %v4647_v14 }
 0x492   :  { %3371 = vmatprep.subr.bf16.mxu0 %v4657_v13 }
 0x495   :  { %3372 = vmatpush1.bf16.msra.mxu0 %v4648_v2 }
 0x496   :  { %3373 = vmatprep.subr.bf16.mxu0 %v4657_v13 }
 0x499   :  { %3374 = vmatpush1.bf16.msra.mxu0 %v4649_v42 }
 0x49a   :  { %3375 = vmatprep.subr.bf16.mxu0 %v4657_v13 }
 0x49d   :  { %3376 = vmatpush1.bf16.msra.mxu0 %v4650_v39 }
 0x49e   :  { %3377 = vmatprep.subr.bf16.mxu0 %v4657_v13 }
 0x4a1   :  { %3378 = vmatpush1.bf16.msra.mxu0 %v4651_v49 }
 0x4a2   :  { %3379 = vmatprep.subr.bf16.mxu0 %v4657_v13 }
 0x4a5   :  { %3380 = vmatpush1.bf16.msra.mxu0 %v4652_v16 }
 0x4a6   :  { %3381 = vmatprep.subr.bf16.mxu0 %v4657_v13 }
 0x4a9   :  { %3382 = vmatpush1.bf16.msra.mxu0 %v3363_v29 }
 0x4aa   :  { %3998 = vmatprep.subr.bf16.mxu0 %v4659_v28 }
 0x4ac   :  { %3398 = vmatmul.mubr.bf16.vlgmr.msra.gmra.mrb[108].mxu0 %v2927_v12 }
 0x4ad   :  { %3999 = vmatpush3.bf16.msra.mxu0 %v4654_v21  ;;  %4002 = vmatprep.mubr.msk.bf16.mxu0 %vm4660_vm6, %v4659_v28 }
 0x4ae   :  { %4000 = vmatprep.subr.bf16.mxu0 %v4659_v28 }
 0x4b1   :  { %4001 = vmatpush3.bf16.msra.mxu0 %v4655_v19 }
 0x513   :  { %v3059_v13 = vpop.f32.mrb[96].mxu0 }
 0x514   :  { %v3061_v23 = vpop.f32.mrb[97].mxu0 }
 0x515   :  { %v3062_v18 = vpop.f32.mrb[98].mxu0 }
 0x516   :  { %v3064_v11 = vpop.f32.mrb[99].mxu0 }
 0x537   :  { %v3159_v60 = vpop.f32.mrb[100].mxu0 }
 0x538   :  { %v3160_v51 = vadd.f32 %v3159_v60, %v3059_v13  ;;  %v3161_v40 = vpop.f32.mrb[101].mxu0 }
 0x539   :  { %v3162_v24 = vpop.f32.mrb[102].mxu0 }
 0x53a   :  { %v3163_v50 = vadd.f32 %v3162_v24, %v3062_v18  ;;  %v3164_v45 = vpop.f32.mrb[103].mxu0 }
 0x55b   :  { %v3278_v44 = vpop.f32.mrb[104].mxu0 }
 0x55c   :  { %v3285_v26 = vadd.f32 %v3278_v44, %v3160_v51  ;;  %v3280_v53 = vpop.f32.mrb[105].mxu0 }
 0x55d   :  { %v3281_v34 = vpop.f32.mrb[106].mxu0 }
 0x55e   :  { %v3286_v41 = vadd.f32 %v3281_v34, %v3163_v50  ;;  %v3283_v55 = vpop.f32.mrb[107].mxu0 }
 0x57f   :  { %v3399_v17 = vpop.f32.mrb[108].mxu0 }
 0x580   :  { %v3406_v37 = vadd.f32 %v3399_v17, %v3285_v26  ;;  %v3401_v36 = vpop.f32.mrb[109].mxu0 }
 0x581   :  { %v3402_v0 = vpop.f32.mrb[110].mxu0 }
 0x582   :  { %v3415_v8 = vadd.f32 %v3990_v27, %v3406_v37  ;;  %v3407_v3 = vadd.f32 %v3402_v0, %v3286_v41  ;;  %v3404_v38 = vpop.f32.mrb[111].mxu0 }
 0x584   :  { %v3416_v59 = vadd.f32 %v3990_v27, %v3407_v3  ;;  %v3417_v7 = vmax.f32 %v3415_v8, 0.0 }
 0x586   :  { %v3418_v54 = vmax.f32 %v3416_v59, 0.0 }
 0x588   :  { %v3419_v63 = vpack.c.bf16 %v3418_v54, %v3417_v7 }
 0x58a   :  { %4003 = vmatmul.mubr.msk.bf16.vlgmr.msra.gmra.mrb[112].mxu0 %vm3443_vm7, %v3419_v63 }
 0x65d   :  { %v3481_v6 = vpop.f32.mrb[112].mxu0 }
 0x65e   :  { %v3482_v20 = vadd.f32 %v3991_v48, %v3481_v6  ;;  %v4004_v35 = vpop.f32.mrb[113].mxu0 }
 0x65f   :  { %v3484_v31 = vpop.f32.mrb[114].mxu0 }
 0x660   :  { %3488 = vst [vmem:[%s6181_s9] sm:$0xff] %v3482_v20  ;;  %v3485_v15 = vadd.f32 %v3991_v48, %v3484_v31  ;;  %v4005_v25 = vpop.f32.mrb[115].mxu0 }
 0x662   :  { %3489 = vst [vmem:[%s6181_s9 + $0x8] sm:$0xff] %v3485_v15 }

</bundles_post_ra>
